<compile_context>
chip_gen: v6e
topology: v6e:2x2x1
jax: 0.10.0
libtpu: 0.0.40
codegen_flags: <defaults>
</compile_context>

<pallas_src>
import jax
import jax.numpy as jnp
from jax.experimental import pallas as pl
from jax.experimental.pallas import tpu as pltpu

F32 = jnp.float32
BF16 = jnp.bfloat16
VMEM_SPEC = pl.BlockSpec(memory_space=pltpu.MemorySpace.VMEM)

LSTM_H = 1 + 23 + 1 + 1 + 15   # 41
TEXT_DIM = 768
TEXT_HID = int(0.5 * 768)      # 384 (only used at init; the two layers fold)
NORM_DIM = 20 + 1 + 15         # 36
PRE_DIM = 5                    # verified, description, gender, verified_type, has_url
HP = 128                       # per-gate lane padding (lane-aligned gate slots)
GATES_W = 4 * HP               # 512
MAX_ROW_TILE = 256             # row tile for the streamed head stage


def _round_up(x, m):
    return ((x + m - 1) // m) * m


# ---------------------------------------------------------------------------
# Stage 1: folded text heads, row-tiled & streamed
# ---------------------------------------------------------------------------
def _head_kernel(text_ref, emb_ref, com_ref, base_ref,
                 wA_ref, wB_ref, wC_ref, out_ref):
    acc = base_ref[...]                                         # (tm, 36) f32
    acc = acc + jnp.dot(text_ref[...], wA_ref[...],
                        preferred_element_type=jnp.float32)
    acc = acc + jnp.dot(emb_ref[...], wB_ref[...],
                        preferred_element_type=jnp.float32)
    acc = acc + jnp.dot(com_ref[...], wC_ref[...],
                        preferred_element_type=jnp.float32)
    out_ref[...] = acc


def _head_stage(p, text_bf, emb_bf, com_bf, norm_base):
    n = text_bf.shape[0]
    tm = min(MAX_ROW_TILE, _round_up(n, 8))
    grid = (pl.cdiv(n, tm),)

    def row_spec(shape):
        return pl.BlockSpec(shape, lambda i: (i, 0))

    w_spec = pl.BlockSpec((TEXT_DIM, NORM_DIM), lambda i: (0, 0))
    return pl.pallas_call(
        _head_kernel,
        out_shape=jax.ShapeDtypeStruct((n, NORM_DIM), F32),
        grid=grid,
        in_specs=[row_spec((tm, TEXT_DIM)), row_spec((tm, TEXT_DIM)),
                  row_spec((tm, TEXT_DIM)), row_spec((tm, NORM_DIM)),
                  w_spec, w_spec, w_spec],
        out_specs=row_spec((tm, NORM_DIM)),
        compiler_params=pltpu.CompilerParams(
            dimension_semantics=("parallel",)),
    )(text_bf, emb_bf, com_bf, norm_base, p["wA36"], p["wB36"], p["wC36"])


# ---------------------------------------------------------------------------
# Stage 2: BatchNorm1d + LSTM recurrence + batched Linear/sigmoid epilogue
# ---------------------------------------------------------------------------
def _bn_lstm_kernel(norm_in_ref, pre5_ref, gamma_ref, beta_ref,
                    wih_pre_ref, wih_norm_ref, whh_ref, bg_ref,
                    wlin_ref, blin_ref, out_ref, gx_ref):
    n = out_ref.shape[0]

    # BatchNorm1d, training mode (batch stats, biased variance, eps=1e-5)
    x = norm_in_ref[...]                                        # (N, 36)
    mean = jnp.mean(x, axis=0, keepdims=True)
    var = jnp.mean((x - mean) ** 2, axis=0, keepdims=True)
    normed = ((x - mean) * jax.lax.rsqrt(var + 1e-5)
              * gamma_ref[...] + beta_ref[...])                 # (N, 36)

    # LSTM input GEMM hoisted out of the recurrence.
    # mix_input = [pre5 | normed]; W_ih rows are split accordingly so the
    # concatenation is never materialized.  Padded gate lanes are zero.
    gx_ref[...] = (jnp.dot(pre5_ref[...], wih_pre_ref[...],
                           preferred_element_type=jnp.float32)
                   + jnp.dot(normed, wih_norm_ref[...],
                             preferred_element_type=jnp.float32)
                   + bg_ref[...])                               # (N, 512)

    whh = whh_ref[...]                                          # (128, 512)

    def step(t, carry):
        h, c = carry                                            # (1,128) each
        gates = gx_ref[pl.ds(t, 1), :] + jnp.dot(
            h, whh, preferred_element_type=jnp.float32)         # (1, 512)
        i = jax.nn.sigmoid(gates[:, 0 * HP:1 * HP])
        f = jax.nn.sigmoid(gates[:, 1 * HP:2 * HP])
        g = jnp.tanh(gates[:, 2 * HP:3 * HP])
        o = jax.nn.sigmoid(gates[:, 3 * HP:4 * HP])
        c = f * c + i * g
        h = o * jnp.tanh(c)
        # stash h_t into the just-consumed gx row (lanes 0..127) so the final
        # Linear+sigmoid can run batched after the loop.
        gx_ref[pl.ds(t, 1), pl.ds(0, HP)] = h
        return h, c

    h0 = jnp.zeros((1, HP), jnp.float32)
    c0 = jnp.zeros((1, HP), jnp.float32)
    unroll = True if n <= 64 else 8
    jax.lax.fori_loop(0, n, step, (h0, c0), unroll=unroll)

    # Batched epilogue: Linear(41,1) + sigmoid as one matmul + one store.
    h_all = gx_ref[:, :HP]                                      # (N, 128)
    logit = jnp.dot(h_all, wlin_ref[...],
                    preferred_element_type=jnp.float32) + blin_ref[...]
    out_ref[...] = jax.nn.sigmoid(logit)


def _bn_lstm_stage(p, norm_in, pre5):
    n = norm_in.shape[0]
    return pl.pallas_call(
        _bn_lstm_kernel,
        out_shape=jax.ShapeDtypeStruct((n, 1), F32),
        in_specs=[VMEM_SPEC] * 10,
        out_specs=VMEM_SPEC,
        scratch_shapes=[pltpu.VMEM((n, GATES_W), F32)],   # x@W_ih / h storage
        compiler_params=pltpu.CompilerParams(
            vmem_limit_bytes=48 * 1024 * 1024),           # safe on v5e/v6e/v7x
    )(norm_in, pre5, p["bn_gamma"], p["bn_beta"],
      p["wih_pre"], p["wih_norm"], p["whh"], p["b_gates"],
      p["wlin_col"], p["blin"])


# ---------------------------------------------------------------------------
# Parameter construction (deterministic, PyTorch-style uniform fan-in init)
# ---------------------------------------------------------------------------
def _uniform(key, shape, bound):
    return jax.random.uniform(key, shape, F32, minval=-bound, maxval=bound)


def init_params(key):
    ks = jax.random.split(key, 24)
    p = {}
    b768 = 1.0 / jnp.sqrt(768.0)
    b384 = 1.0 / jnp.sqrt(384.0)

    def folded_head(k0, k1, k2, k3, col):
        w1 = _uniform(k0, (TEXT_DIM, TEXT_HID), b768)
        b1 = _uniform(k1, (1, TEXT_HID), b768)
        w2 = _uniform(k2, (TEXT_HID, 1), b384)
        b2 = _uniform(k3, (1, 1), b384)
        # (x@w1 + b1)@w2 + b2 == x@(w1@w2) + (b1@w2 + b2)  (exact; the module
        # has no activation/dropout between the two Linears)
        wc = w1 @ w2                                             # (768, 1)
        bc = b1 @ w2 + b2                                        # (1, 1)
        # fold the one-hot scatter (column `col` of norm_input) into the weight
        w36 = jnp.zeros((TEXT_DIM, NORM_DIM), F32).at[:, col].set(wc[:, 0])
        return w36.astype(BF16), bc

    p["wA36"], p["bA"] = folded_head(ks[0], ks[1], ks[2], ks[3], 0)    # text_linear1/2
    p["wB36"], p["bB"] = folded_head(ks[4], ks[5], ks[6], ks[7], 19)   # text_linear3/4
    p["wC36"], p["bC"] = folded_head(ks[8], ks[9], ks[10], ks[11], 20) # text_linear5/6

    # BatchNorm1d(36), default affine init
    p["bn_gamma"] = jnp.ones((1, NORM_DIM), F32)
    p["bn_beta"] = jnp.zeros((1, NORM_DIM), F32)

    # LSTM(41, 41): PyTorch layout (4H, IN) / (4H, H), gate order i, f, g, o.
    bl = 1.0 / jnp.sqrt(float(LSTM_H))
    w_ih = _uniform(ks[12], (4 * LSTM_H, LSTM_H), bl)
    w_hh = _uniform(ks[13], (4 * LSTM_H, LSTM_H), bl)
    b_ih = _uniform(ks[14], (4 * LSTM_H,), bl)
    b_hh = _uniform(ks[15], (4 * LSTM_H,), bl)

    wih_packed = jnp.zeros((LSTM_H, GATES_W), F32)    # (41, 512)
    whh_packed = jnp.zeros((HP, GATES_W), F32)        # (128, 512)
    b_packed = jnp.zeros((1, GATES_W), F32)           # (1, 512)
    for k in range(4):
        rows = slice(k * LSTM_H, (k + 1) * LSTM_H)
        cols = slice(k * HP, k * HP + LSTM_H)
        wih_packed = wih_packed.at[:, cols].set(w_ih[rows, :].T)
        whh_packed = whh_packed.at[:LSTM_H, cols].set(w_hh[rows, :].T)
        b_packed = b_packed.at[0, cols].set(b_ih[rows] + b_hh[rows])
    # mix_input = [pre5(5) | norm_input(36)]  ->  split W_ih rows accordingly
    p["wih_pre"] = wih_packed[:PRE_DIM, :]            # (5, 512)
    p["wih_norm"] = wih_packed[PRE_DIM:, :]           # (36, 512)
    p["whh"] = whh_packed
    p["b_gates"] = b_packed

    # final Linear(41, 1) as a lane-padded column vector for the batched epilogue
    wlin = _uniform(ks[16], (1, LSTM_H), bl)
    p["wlin_col"] = jnp.zeros((HP, 1), F32).at[:LSTM_H, 0].set(wlin[0])
    p["blin"] = _uniform(ks[17], (1, 1), bl)

    # location_linear(10, 1) is defined by the module but never used in forward
    p["wloc"] = _uniform(ks[18], (10, 1), 1.0 / jnp.sqrt(10.0))
    p["bloc"] = _uniform(ks[19], (1, 1), 1.0 / jnp.sqrt(10.0))

    # --- guard the lane-padding invariants the kernel relies on --------------
    assert bool(jnp.all(p["whh"][LSTM_H:, :] == 0.0))            # padded h rows
    assert bool(jnp.all(p["wlin_col"][LSTM_H:, :] == 0.0))       # padded h lanes
    for k in range(4):
        pad = slice(k * HP + LSTM_H, (k + 1) * HP)
        assert bool(jnp.all(p["wih_pre"][:, pad] == 0.0))
        assert bool(jnp.all(p["wih_norm"][:, pad] == 0.0))
        assert bool(jnp.all(p["whh"][:, pad] == 0.0))
        assert bool(jnp.all(p["b_gates"][:, pad] == 0.0))
    return p


# ---------------------------------------------------------------------------
# Forward pass mirroring Model.forward
# ---------------------------------------------------------------------------
@jax.jit
def forward(params,
            text_embedding, verified, description, gender, messages, followers,
            location_embedding, friends, verified_type, comments, pics, likes,
            reposts, time_interval, has_url, emb, comment_embedding, positive,
            negative, neutral, tree_avg_length, is_positive, is_negative,
            friends_followers_rate, comments_reposts_rate, likes_reposts_rate,
            total_at_num, reposts_tree_max_length, useful_comment_rate,
            positive_max, negative_max, neutral_max, positive_original,
            negative_original, neutral_original):
    p = params
    n = text_embedding.shape[0]
    # (tree_length / abs_minus_emotion in the reference forward are dead code)

    # head biases occupy norm_input columns 0 / 19 / 20 (matvec added in-kernel)
    bA = jnp.broadcast_to(p["bA"], (n, 1))
    bB = jnp.broadcast_to(p["bB"], (n, 1))
    bC = jnp.broadcast_to(p["bC"], (n, 1))

    # norm_input layout (36 cols):
    #  0: text head | 1: messages | 2: followers | 3-12: location_embedding |
    # 13: friends | 14: comments | 15: pics | 16: likes | 17: reposts |
    # 18: time_interval | 19: emb head | 20: comment head | 21-35: emotion
    norm_base = jnp.concatenate([
        bA, messages, followers, location_embedding, friends, comments, pics,
        likes, reposts, time_interval, bB, bC,
        positive, negative, neutral,
        positive_max, negative_max, neutral_max,
        positive_original - positive, negative_original - negative,
        neutral_original - neutral,
        positive_original - positive_max, negative_original - negative_max,
        neutral_original - neutral_max,
        positive_original, negative_original, neutral_original], axis=1)

    # first 5 columns of mix_input
    pre5 = jnp.concatenate(
        [verified, description, gender, verified_type, has_url], axis=1)

    # bf16 for the HBM-bandwidth-bound head stage (ideally the producer already
    # emits bf16 embeddings; BatchNorm re-normalizes so the impact is tiny).
    text_bf = text_embedding.astype(BF16)
    emb_bf = emb.astype(BF16)
    com_bf = comment_embedding.astype(BF16)

    norm_in = _head_stage(p, text_bf, emb_bf, com_bf, norm_base)   # (N, 36)
    return _bn_lstm_stage(p, norm_in, pre5)                        # (N, 1)


# ---------------------------------------------------------------------------
if __name__ == "__main__":
    N = 8
    key = jax.random.PRNGKey(0)
    kin, kpar = jax.random.split(key)

    scalar_names = [
        "verified", "description", "gender", "messages", "followers", "friends",
        "verified_type", "comments", "pics", "likes", "reposts", "time_interval",
        "has_url", "positive", "negative", "neutral", "tree_avg_length",
        "is_positive", "is_negative", "friends_followers_rate",
        "comments_reposts_rate", "likes_reposts_rate", "total_at_num",
        "reposts_tree_max_length", "useful_comment_rate", "positive_max",
        "negative_max", "neutral_max", "positive_original", "negative_original",
        "neutral_original",
    ]
    keys = jax.random.split(kin, len(scalar_names) + 4)
    inputs = {name: jax.random.normal(keys[i], (N, 1), F32)
              for i, name in enumerate(scalar_names)}
    inputs["text_embedding"] = jax.random.normal(keys[-4], (N, TEXT_DIM), F32)
    inputs["emb"] = jax.random.normal(keys[-3], (N, TEXT_DIM), F32)
    inputs["comment_embedding"] = jax.random.normal(keys[-2], (N, TEXT_DIM), F32)
    inputs["location_embedding"] = jax.random.normal(keys[-1], (N, 10), F32)

    params = init_params(kpar)

    out = forward(
        params,
        inputs["text_embedding"], inputs["verified"], inputs["description"],
        inputs["gender"], inputs["messages"], inputs["followers"],
        inputs["location_embedding"], inputs["friends"], inputs["verified_type"],
        inputs["comments"], inputs["pics"], inputs["likes"], inputs["reposts"],
        inputs["time_interval"], inputs["has_url"], inputs["emb"],
        inputs["comment_embedding"], inputs["positive"], inputs["negative"],
        inputs["neutral"], inputs["tree_avg_length"], inputs["is_positive"],
        inputs["is_negative"], inputs["friends_followers_rate"],
        inputs["comments_reposts_rate"], inputs["likes_reposts_rate"],
        inputs["total_at_num"], inputs["reposts_tree_max_length"],
        inputs["useful_comment_rate"], inputs["positive_max"],
        inputs["negative_max"], inputs["neutral_max"],
        inputs["positive_original"], inputs["negative_original"],
        inputs["neutral_original"],
    )
    out = jax.block_until_ready(out)
    assert out.shape == (N, 1) and out.dtype == jnp.float32
    assert bool(jnp.all(jnp.isfinite(out)))
    assert bool(jnp.all((out > 0.0) & (out < 1.0)))   # sigmoid range
    print("KERNEL_OK")
</pallas_src>

<mosaic_0001>
module attributes {stable_mosaic.version = 11 : i64} {
  func.func @_head_kernel(%arg0: i32, %arg1: memref<8x768xbf16, #tpu.memory_space<vmem>>, %arg2: memref<8x768xbf16, #tpu.memory_space<vmem>>, %arg3: memref<8x768xbf16, #tpu.memory_space<vmem>>, %arg4: memref<8x36xf32, #tpu.memory_space<vmem>>, %arg5: memref<768x36xbf16, #tpu.memory_space<vmem>>, %arg6: memref<768x36xbf16, #tpu.memory_space<vmem>>, %arg7: memref<768x36xbf16, #tpu.memory_space<vmem>>, %arg8: memref<8x36xf32, #tpu.memory_space<vmem>>) attributes {dimension_semantics = [#tpu.dimension_semantics<parallel>], iteration_bounds = array<i64: 1>, scalar_prefetch = 0 : i64, scratch_operands = 0 : i64, tpu.core_type = #tpu.core_type<tc>, window_params = [{transform_indices = @transform_0, window_bounds = array<i64: 8, 768>}, {transform_indices = @transform_1, window_bounds = array<i64: 8, 768>}, {transform_indices = @transform_2, window_bounds = array<i64: 8, 768>}, {transform_indices = @transform_3, window_bounds = array<i64: 8, 36>}, {pipeline_mode = #tpu.pipeline_mode<synchronous>, transform_indices = @transform_4, window_bounds = array<i64: 768, 36>}, {pipeline_mode = #tpu.pipeline_mode<synchronous>, transform_indices = @transform_5, window_bounds = array<i64: 768, 36>}, {pipeline_mode = #tpu.pipeline_mode<synchronous>, transform_indices = @transform_6, window_bounds = array<i64: 768, 36>}, {transform_indices = @transform_7, window_bounds = array<i64: 8, 36>}]} {
    %c0 = arith.constant 0 : index
    %c0_0 = arith.constant 0 : index
    %0 = vector.load %arg4[%c0, %c0_0] : memref<8x36xf32, #tpu.memory_space<vmem>>, vector<8x36xf32>
    %c0_1 = arith.constant 0 : index
    %c0_2 = arith.constant 0 : index
    %1 = vector.load %arg1[%c0_1, %c0_2] : memref<8x768xbf16, #tpu.memory_space<vmem>>, vector<8x768xbf16>
    %c0_3 = arith.constant 0 : index
    %c0_4 = arith.constant 0 : index
    %2 = vector.load %arg5[%c0_3, %c0_4] : memref<768x36xbf16, #tpu.memory_space<vmem>>, vector<768x36xbf16>
    %cst = arith.constant dense<0.000000e+00> : vector<8x36xf32>
    %3 = tpu.matmul %1, %2, %cst {dimension_numbers = #tpu.dot_dimension_numbers<[1], [0], [0], [1], [0, 0, 1, 1], [], []>} : vector<8x768xbf16>, vector<768x36xbf16>, vector<8x36xf32> -> vector<8x36xf32>
    %4 = arith.addf %0, %3 : vector<8x36xf32>
    %c0_5 = arith.constant 0 : index
    %c0_6 = arith.constant 0 : index
    %5 = vector.load %arg2[%c0_5, %c0_6] : memref<8x768xbf16, #tpu.memory_space<vmem>>, vector<8x768xbf16>
    %c0_7 = arith.constant 0 : index
    %c0_8 = arith.constant 0 : index
    %6 = vector.load %arg6[%c0_7, %c0_8] : memref<768x36xbf16, #tpu.memory_space<vmem>>, vector<768x36xbf16>
    %cst_9 = arith.constant dense<0.000000e+00> : vector<8x36xf32>
    %7 = tpu.matmul %5, %6, %cst_9 {dimension_numbers = #tpu.dot_dimension_numbers<[1], [0], [0], [1], [0, 0, 1, 1], [], []>} : vector<8x768xbf16>, vector<768x36xbf16>, vector<8x36xf32> -> vector<8x36xf32>
    %8 = arith.addf %4, %7 : vector<8x36xf32>
    %c0_10 = arith.constant 0 : index
    %c0_11 = arith.constant 0 : index
    %9 = vector.load %arg3[%c0_10, %c0_11] : memref<8x768xbf16, #tpu.memory_space<vmem>>, vector<8x768xbf16>
    %c0_12 = arith.constant 0 : index
    %c0_13 = arith.constant 0 : index
    %10 = vector.load %arg7[%c0_12, %c0_13] : memref<768x36xbf16, #tpu.memory_space<vmem>>, vector<768x36xbf16>
    %cst_14 = arith.constant dense<0.000000e+00> : vector<8x36xf32>
    %11 = tpu.matmul %9, %10, %cst_14 {dimension_numbers = #tpu.dot_dimension_numbers<[1], [0], [0], [1], [0, 0, 1, 1], [], []>} : vector<8x768xbf16>, vector<768x36xbf16>, vector<8x36xf32> -> vector<8x36xf32>
    %12 = arith.addf %8, %11 : vector<8x36xf32>
    %c0_15 = arith.constant 0 : index
    %c0_16 = arith.constant 0 : index
    %13 = vector.load %arg8[%c0_15, %c0_16] : memref<8x36xf32, #tpu.memory_space<vmem>>, vector<8x36xf32>
    tpu.vector_store %arg8[%c0_15, %c0_16], %12 {strides = array<i32>} : memref<8x36xf32, #tpu.memory_space<vmem>>, vector<8x36xf32>,
    return
  }
  func.func @transform_0(%arg0: i32) -> (i32, i32) {
    %c0_i32 = arith.constant 0 : i32
    %c0_i32_0 = arith.constant 0 : i32
    return %arg0, %c0_i32 : i32, i32
  }
  func.func @transform_1(%arg0: i32) -> (i32, i32) {
    %c0_i32 = arith.constant 0 : i32
    %c0_i32_0 = arith.constant 0 : i32
    return %arg0, %c0_i32 : i32, i32
  }
  func.func @transform_2(%arg0: i32) -> (i32, i32) {
    %c0_i32 = arith.constant 0 : i32
    %c0_i32_0 = arith.constant 0 : i32
    return %arg0, %c0_i32 : i32, i32
  }
  func.func @transform_3(%arg0: i32) -> (i32, i32) {
    %c0_i32 = arith.constant 0 : i32
    %c0_i32_0 = arith.constant 0 : i32
    return %arg0, %c0_i32 : i32, i32
  }
  func.func @transform_4(%arg0: i32) -> (i32, i32) {
    %c0_i32 = arith.constant 0 : i32
    %c0_i32_0 = arith.constant 0 : i32
    %c0_i32_1 = arith.constant 0 : i32
    return %c0_i32, %c0_i32_0 : i32, i32
  }
  func.func @transform_5(%arg0: i32) -> (i32, i32) {
    %c0_i32 = arith.constant 0 : i32
    %c0_i32_0 = arith.constant 0 : i32
    %c0_i32_1 = arith.constant 0 : i32
    return %c0_i32, %c0_i32_0 : i32, i32
  }
  func.func @transform_6(%arg0: i32) -> (i32, i32) {
    %c0_i32 = arith.constant 0 : i32
    %c0_i32_0 = arith.constant 0 : i32
    %c0_i32_1 = arith.constant 0 : i32
    return %c0_i32, %c0_i32_0 : i32, i32
  }
  func.func @transform_7(%arg0: i32) -> (i32, i32) {
    %c0_i32 = arith.constant 0 : i32
    %c0_i32_0 = arith.constant 0 : i32
    return %arg0, %c0_i32 : i32, i32
  }
}

module attributes {stable_mosaic.version = 11 : i64} {
  func.func @_bn_lstm_kernel(%arg0: memref<8x36xf32, #tpu.memory_space<vmem>>, %arg1: memref<8x5xf32, #tpu.memory_space<vmem>>, %arg2: memref<1x36xf32, #tpu.memory_space<vmem>>, %arg3: memref<1x36xf32, #tpu.memory_space<vmem>>, %arg4: memref<5x512xf32, #tpu.memory_space<vmem>>, %arg5: memref<36x512xf32, #tpu.memory_space<vmem>>, %arg6: memref<128x512xf32, #tpu.memory_space<vmem>>, %arg7: memref<1x512xf32, #tpu.memory_space<vmem>>, %arg8: memref<128x1xf32, #tpu.memory_space<vmem>>, %arg9: memref<1x1xf32, #tpu.memory_space<vmem>>, %arg10: memref<8x1xf32, #tpu.memory_space<vmem>>, %arg11: memref<8x512xf32, #tpu.memory_space<vmem>>) attributes {dimension_semantics = [], scalar_prefetch = 0 : i64, scratch_operands = 1 : i64, tpu.core_type = #tpu.core_type<tc>} {
    %c0 = arith.constant 0 : index
    %c0_0 = arith.constant 0 : index
    %0 = vector.load %arg0[%c0, %c0_0] : memref<8x36xf32, #tpu.memory_space<vmem>>, vector<8x36xf32>
    %cst = arith.constant dense<0.000000e+00> : vector<36xf32>
    %1 = vector.multi_reduction <add>, %0, %cst [0] : vector<8x36xf32> to vector<36xf32>
    %2 = vector.shape_cast %1 : vector<36xf32> to vector<1x36xf32>
    %cst_1 = arith.constant 8.000000e+00 : f32
    %3 = vector.broadcast %cst_1 : f32 to vector<1x36xf32>
    %4 = arith.divf %2, %3 : vector<1x36xf32>
    %5 = vector.broadcast %4 : vector<1x36xf32> to vector<8x36xf32>
    %6 = arith.subf %0, %5 : vector<8x36xf32>
    %7 = arith.mulf %6, %6 : vector<8x36xf32>
    %cst_2 = arith.constant dense<0.000000e+00> : vector<36xf32>
    %8 = vector.multi_reduction <add>, %7, %cst_2 [0] : vector<8x36xf32> to vector<36xf32>
    %9 = vector.shape_cast %8 : vector<36xf32> to vector<1x36xf32>
    %cst_3 = arith.constant 8.000000e+00 : f32
    %10 = vector.broadcast %cst_3 : f32 to vector<1x36xf32>
    %11 = arith.divf %9, %10 : vector<1x36xf32>
    %12 = vector.broadcast %4 : vector<1x36xf32> to vector<8x36xf32>
    %13 = arith.subf %0, %12 : vector<8x36xf32>
    %cst_4 = arith.constant 9.99999974E-6 : f32
    %14 = vector.broadcast %cst_4 : f32 to vector<1x36xf32>
    %15 = arith.addf %11, %14 : vector<1x36xf32>
    %16 = math.rsqrt %15 : vector<1x36xf32>
    %17 = vector.broadcast %16 : vector<1x36xf32> to vector<8x36xf32>
    %18 = arith.mulf %13, %17 : vector<8x36xf32>
    %c0_5 = arith.constant 0 : index
    %c0_6 = arith.constant 0 : index
    %19 = vector.load %arg2[%c0_5, %c0_6] : memref<1x36xf32, #tpu.memory_space<vmem>>, vector<1x36xf32>
    %20 = vector.broadcast %19 : vector<1x36xf32> to vector<8x36xf32>
    %21 = arith.mulf %18, %20 : vector<8x36xf32>
    %c0_7 = arith.constant 0 : index
    %c0_8 = arith.constant 0 : index
    %22 = vector.load %arg3[%c0_7, %c0_8] : memref<1x36xf32, #tpu.memory_space<vmem>>, vector<1x36xf32>
    %23 = vector.broadcast %22 : vector<1x36xf32> to vector<8x36xf32>
    %24 = arith.addf %21, %23 : vector<8x36xf32>
    %c0_9 = arith.constant 0 : index
    %c0_10 = arith.constant 0 : index
    %25 = vector.load %arg1[%c0_9, %c0_10] : memref<8x5xf32, #tpu.memory_space<vmem>>, vector<8x5xf32>
    %c0_11 = arith.constant 0 : index
    %c0_12 = arith.constant 0 : index
    %26 = vector.load %arg4[%c0_11, %c0_12] : memref<5x512xf32, #tpu.memory_space<vmem>>, vector<5x512xf32>
    %cst_13 = arith.constant dense<0.000000e+00> : vector<8x512xf32>
    %27 = tpu.matmul %25, %26, %cst_13 {dimension_numbers = #tpu.dot_dimension_numbers<[1], [0], [0], [1], [0, 0, 1, 1], [], []>} : vector<8x5xf32>, vector<5x512xf32>, vector<8x512xf32> -> vector<8x512xf32>
    %c0_14 = arith.constant 0 : index
    %c0_15 = arith.constant 0 : index
    %28 = vector.load %arg5[%c0_14, %c0_15] : memref<36x512xf32, #tpu.memory_space<vmem>>, vector<36x512xf32>
    %cst_16 = arith.constant dense<0.000000e+00> : vector<8x512xf32>
    %29 = tpu.matmul %24, %28, %cst_16 {dimension_numbers = #tpu.dot_dimension_numbers<[1], [0], [0], [1], [0, 0, 1, 1], [], []>} : vector<8x36xf32>, vector<36x512xf32>, vector<8x512xf32> -> vector<8x512xf32>
    %30 = arith.addf %27, %29 : vector<8x512xf32>
    %c0_17 = arith.constant 0 : index
    %c0_18 = arith.constant 0 : index
    %31 = vector.load %arg7[%c0_17, %c0_18] : memref<1x512xf32, #tpu.memory_space<vmem>>, vector<1x512xf32>
    %32 = vector.broadcast %31 : vector<1x512xf32> to vector<8x512xf32>
    %33 = arith.addf %30, %32 : vector<8x512xf32>
    %c0_19 = arith.constant 0 : index
    %c0_20 = arith.constant 0 : index
    %34 = vector.load %arg11[%c0_19, %c0_20] : memref<8x512xf32, #tpu.memory_space<vmem>>, vector<8x512xf32>
    tpu.vector_store %arg11[%c0_19, %c0_20], %33 {strides = array<i32>} : memref<8x512xf32, #tpu.memory_space<vmem>>, vector<8x512xf32>,
    %c0_21 = arith.constant 0 : index
    %c0_22 = arith.constant 0 : index
    %35 = vector.load %arg6[%c0_21, %c0_22] : memref<128x512xf32, #tpu.memory_space<vmem>>, vector<128x512xf32>
    %cst_23 = arith.constant 0.000000e+00 : f32
    %36 = vector.broadcast %cst_23 : f32 to vector<1x128xf32>
    %cst_24 = arith.constant 0.000000e+00 : f32
    %37 = vector.broadcast %cst_24 : f32 to vector<1x128xf32>
    %c0_i32 = arith.constant 0 : i32
    %38 = arith.index_cast %c0_i32 : i32 to index
    %c0_25 = arith.constant 0 : index
    %39 = vector.load %arg11[%38, %c0_25] : memref<8x512xf32, #tpu.memory_space<vmem>>, vector<1x512xf32>
    %cst_26 = arith.constant dense<0.000000e+00> : vector<1x512xf32>
    %40 = tpu.matmul %36, %35, %cst_26 {dimension_numbers = #tpu.dot_dimension_numbers<[1], [0], [0], [1], [0, 0, 1, 1], [], []>} : vector<1x128xf32>, vector<128x512xf32>, vector<1x512xf32> -> vector<1x512xf32>
    %41 = arith.addf %39, %40 : vector<1x512xf32>
    %42 = vector.extract_strided_slice %41 {offsets = [0, 0], sizes = [1, 128], strides = [1, 1]} : vector<1x512xf32> to vector<1x128xf32>
    %43 = arith.negf %42 : vector<1x128xf32>
    %44 = math.exp %43 : vector<1x128xf32>
    %cst_27 = arith.constant 1.000000e+00 : f32
    %45 = vector.broadcast %cst_27 : f32 to vector<1x128xf32>
    %46 = arith.addf %45, %44 : vector<1x128xf32>
    %47 = arith.divf %45, %46 : vector<1x128xf32>
    %48 = vector.extract_strided_slice %41 {offsets = [0, 128], sizes = [1, 128], strides = [1, 1]} : vector<1x512xf32> to vector<1x128xf32>
    %49 = arith.negf %48 : vector<1x128xf32>
    %50 = math.exp %49 : vector<1x128xf32>
    %cst_28 = arith.constant 1.000000e+00 : f32
    %51 = vector.broadcast %cst_28 : f32 to vector<1x128xf32>
    %52 = arith.addf %51, %50 : vector<1x128xf32>
    %53 = arith.divf %51, %52 : vector<1x128xf32>
    %54 = vector.extract_strided_slice %41 {offsets = [0, 256], sizes = [1, 128], strides = [1, 1]} : vector<1x512xf32> to vector<1x128xf32>
    %55 = math.tanh %54 : vector<1x128xf32>
    %56 = vector.extract_strided_slice %41 {offsets = [0, 384], sizes = [1, 128], strides = [1, 1]} : vector<1x512xf32> to vector<1x128xf32>
    %57 = arith.negf %56 : vector<1x128xf32>
    %58 = math.exp %57 : vector<1x128xf32>
    %cst_29 = arith.constant 1.000000e+00 : f32
    %59 = vector.broadcast %cst_29 : f32 to vector<1x128xf32>
    %60 = arith.addf %59, %58 : vector<1x128xf32>
    %61 = arith.divf %59, %60 : vector<1x128xf32>
    %62 = arith.mulf %53, %37 : vector<1x128xf32>
    %63 = arith.mulf %47, %55 : vector<1x128xf32>
    %64 = arith.addf %62, %63 : vector<1x128xf32>
    %65 = math.tanh %64 : vector<1x128xf32>
    %66 = arith.mulf %61, %65 : vector<1x128xf32>
    %67 = arith.index_cast %c0_i32 : i32 to index
    %c0_30 = arith.constant 0 : index
    %68 = vector.load %arg11[%67, %c0_30] : memref<8x512xf32, #tpu.memory_space<vmem>>, vector<1x128xf32>
    tpu.vector_store %arg11[%67, %c0_30], %66 {strides = array<i32>} : memref<8x512xf32, #tpu.memory_space<vmem>>, vector<1x128xf32>,
    %c1_i32 = arith.constant 1 : i32
    %69 = arith.index_cast %c1_i32 : i32 to index
    %c0_31 = arith.constant 0 : index
    %70 = vector.load %arg11[%69, %c0_31] : memref<8x512xf32, #tpu.memory_space<vmem>>, vector<1x512xf32>
    %cst_32 = arith.constant dense<0.000000e+00> : vector<1x512xf32>
    %71 = tpu.matmul %66, %35, %cst_32 {dimension_numbers = #tpu.dot_dimension_numbers<[1], [0], [0], [1], [0, 0, 1, 1], [], []>} : vector<1x128xf32>, vector<128x512xf32>, vector<1x512xf32> -> vector<1x512xf32>
    %72 = arith.addf %70, %71 : vector<1x512xf32>
    %73 = vector.extract_strided_slice %72 {offsets = [0, 0], sizes = [1, 128], strides = [1, 1]} : vector<1x512xf32> to vector<1x128xf32>
    %74 = arith.negf %73 : vector<1x128xf32>
    %75 = math.exp %74 : vector<1x128xf32>
    %cst_33 = arith.constant 1.000000e+00 : f32
    %76 = vector.broadcast %cst_33 : f32 to vector<1x128xf32>
    %77 = arith.addf %76, %75 : vector<1x128xf32>
    %78 = arith.divf %76, %77 : vector<1x128xf32>
    %79 = vector.extract_strided_slice %72 {offsets = [0, 128], sizes = [1, 128], strides = [1, 1]} : vector<1x512xf32> to vector<1x128xf32>
    %80 = arith.negf %79 : vector<1x128xf32>
    %81 = math.exp %80 : vector<1x128xf32>
    %cst_34 = arith.constant 1.000000e+00 : f32
    %82 = vector.broadcast %cst_34 : f32 to vector<1x128xf32>
    %83 = arith.addf %82, %81 : vector<1x128xf32>
    %84 = arith.divf %82, %83 : vector<1x128xf32>
    %85 = vector.extract_strided_slice %72 {offsets = [0, 256], sizes = [1, 128], strides = [1, 1]} : vector<1x512xf32> to vector<1x128xf32>
    %86 = math.tanh %85 : vector<1x128xf32>
    %87 = vector.extract_strided_slice %72 {offsets = [0, 384], sizes = [1, 128], strides = [1, 1]} : vector<1x512xf32> to vector<1x128xf32>
    %88 = arith.negf %87 : vector<1x128xf32>
    %89 = math.exp %88 : vector<1x128xf32>
    %cst_35 = arith.constant 1.000000e+00 : f32
    %90 = vector.broadcast %cst_35 : f32 to vector<1x128xf32>
    %91 = arith.addf %90, %89 : vector<1x128xf32>
    %92 = arith.divf %90, %91 : vector<1x128xf32>
    %93 = arith.mulf %84, %64 : vector<1x128xf32>
    %94 = arith.mulf %78, %86 : vector<1x128xf32>
    %95 = arith.addf %93, %94 : vector<1x128xf32>
    %96 = math.tanh %95 : vector<1x128xf32>
    %97 = arith.mulf %92, %96 : vector<1x128xf32>
    %98 = arith.index_cast %c1_i32 : i32 to index
    %c0_36 = arith.constant 0 : index
    %99 = vector.load %arg11[%98, %c0_36] : memref<8x512xf32, #tpu.memory_space<vmem>>, vector<1x128xf32>
    tpu.vector_store %arg11[%98, %c0_36], %97 {strides = array<i32>} : memref<8x512xf32, #tpu.memory_space<vmem>>, vector<1x128xf32>,
    %c2_i32 = arith.constant 2 : i32
    %100 = arith.index_cast %c2_i32 : i32 to index
    %c0_37 = arith.constant 0 : index
    %101 = vector.load %arg11[%100, %c0_37] : memref<8x512xf32, #tpu.memory_space<vmem>>, vector<1x512xf32>
    %cst_38 = arith.constant dense<0.000000e+00> : vector<1x512xf32>
    %102 = tpu.matmul %97, %35, %cst_38 {dimension_numbers = #tpu.dot_dimension_numbers<[1], [0], [0], [1], [0, 0, 1, 1], [], []>} : vector<1x128xf32>, vector<128x512xf32>, vector<1x512xf32> -> vector<1x512xf32>
    %103 = arith.addf %101, %102 : vector<1x512xf32>
    %104 = vector.extract_strided_slice %103 {offsets = [0, 0], sizes = [1, 128], strides = [1, 1]} : vector<1x512xf32> to vector<1x128xf32>
    %105 = arith.negf %104 : vector<1x128xf32>
    %106 = math.exp %105 : vector<1x128xf32>
    %cst_39 = arith.constant 1.000000e+00 : f32
    %107 = vector.broadcast %cst_39 : f32 to vector<1x128xf32>
    %108 = arith.addf %107, %106 : vector<1x128xf32>
    %109 = arith.divf %107, %108 : vector<1x128xf32>
    %110 = vector.extract_strided_slice %103 {offsets = [0, 128], sizes = [1, 128], strides = [1, 1]} : vector<1x512xf32> to vector<1x128xf32>
    %111 = arith.negf %110 : vector<1x128xf32>
    %112 = math.exp %111 : vector<1x128xf32>
    %cst_40 = arith.constant 1.000000e+00 : f32
    %113 = vector.broadcast %cst_40 : f32 to vector<1x128xf32>
    %114 = arith.addf %113, %112 : vector<1x128xf32>
    %115 = arith.divf %113, %114 : vector<1x128xf32>
    %116 = vector.extract_strided_slice %103 {offsets = [0, 256], sizes = [1, 128], strides = [1, 1]} : vector<1x512xf32> to vector<1x128xf32>
    %117 = math.tanh %116 : vector<1x128xf32>
    %118 = vector.extract_strided_slice %103 {offsets = [0, 384], sizes = [1, 128], strides = [1, 1]} : vector<1x512xf32> to vector<1x128xf32>
    %119 = arith.negf %118 : vector<1x128xf32>
    %120 = math.exp %119 : vector<1x128xf32>
    %cst_41 = arith.constant 1.000000e+00 : f32
    %121 = vector.broadcast %cst_41 : f32 to vector<1x128xf32>
    %122 = arith.addf %121, %120 : vector<1x128xf32>
    %123 = arith.divf %121, %122 : vector<1x128xf32>
    %124 = arith.mulf %115, %95 : vector<1x128xf32>
    %125 = arith.mulf %109, %117 : vector<1x128xf32>
    %126 = arith.addf %124, %125 : vector<1x128xf32>
    %127 = math.tanh %126 : vector<1x128xf32>
    %128 = arith.mulf %123, %127 : vector<1x128xf32>
    %129 = arith.index_cast %c2_i32 : i32 to index
    %c0_42 = arith.constant 0 : index
    %130 = vector.load %arg11[%129, %c0_42] : memref<8x512xf32, #tpu.memory_space<vmem>>, vector<1x128xf32>
    tpu.vector_store %arg11[%129, %c0_42], %128 {strides = array<i32>} : memref<8x512xf32, #tpu.memory_space<vmem>>, vector<1x128xf32>,
    %c3_i32 = arith.constant 3 : i32
    %131 = arith.index_cast %c3_i32 : i32 to index
    %c0_43 = arith.constant 0 : index
    %132 = vector.load %arg11[%131, %c0_43] : memref<8x512xf32, #tpu.memory_space<vmem>>, vector<1x512xf32>
    %cst_44 = arith.constant dense<0.000000e+00> : vector<1x512xf32>
    %133 = tpu.matmul %128, %35, %cst_44 {dimension_numbers = #tpu.dot_dimension_numbers<[1], [0], [0], [1], [0, 0, 1, 1], [], []>} : vector<1x128xf32>, vector<128x512xf32>, vector<1x512xf32> -> vector<1x512xf32>
    %134 = arith.addf %132, %133 : vector<1x512xf32>
    %135 = vector.extract_strided_slice %134 {offsets = [0, 0], sizes = [1, 128], strides = [1, 1]} : vector<1x512xf32> to vector<1x128xf32>
    %136 = arith.negf %135 : vector<1x128xf32>
    %137 = math.exp %136 : vector<1x128xf32>
    %cst_45 = arith.constant 1.000000e+00 : f32
    %138 = vector.broadcast %cst_45 : f32 to vector<1x128xf32>
    %139 = arith.addf %138, %137 : vector<1x128xf32>
    %140 = arith.divf %138, %139 : vector<1x128xf32>
    %141 = vector.extract_strided_slice %134 {offsets = [0, 128], sizes = [1, 128], strides = [1, 1]} : vector<1x512xf32> to vector<1x128xf32>
    %142 = arith.negf %141 : vector<1x128xf32>
    %143 = math.exp %142 : vector<1x128xf32>
    %cst_46 = arith.constant 1.000000e+00 : f32
    %144 = vector.broadcast %cst_46 : f32 to vector<1x128xf32>
    %145 = arith.addf %144, %143 : vector<1x128xf32>
    %146 = arith.divf %144, %145 : vector<1x128xf32>
    %147 = vector.extract_strided_slice %134 {offsets = [0, 256], sizes = [1, 128], strides = [1, 1]} : vector<1x512xf32> to vector<1x128xf32>
    %148 = math.tanh %147 : vector<1x128xf32>
    %149 = vector.extract_strided_slice %134 {offsets = [0, 384], sizes = [1, 128], strides = [1, 1]} : vector<1x512xf32> to vector<1x128xf32>
    %150 = arith.negf %149 : vector<1x128xf32>
    %151 = math.exp %150 : vector<1x128xf32>
    %cst_47 = arith.constant 1.000000e+00 : f32
    %152 = vector.broadcast %cst_47 : f32 to vector<1x128xf32>
    %153 = arith.addf %152, %151 : vector<1x128xf32>
    %154 = arith.divf %152, %153 : vector<1x128xf32>
    %155 = arith.mulf %146, %126 : vector<1x128xf32>
    %156 = arith.mulf %140, %148 : vector<1x128xf32>
    %157 = arith.addf %155, %156 : vector<1x128xf32>
    %158 = math.tanh %157 : vector<1x128xf32>
    %159 = arith.mulf %154, %158 : vector<1x128xf32>
    %160 = arith.index_cast %c3_i32 : i32 to index
    %c0_48 = arith.constant 0 : index
    %161 = vector.load %arg11[%160, %c0_48] : memref<8x512xf32, #tpu.memory_space<vmem>>, vector<1x128xf32>
    tpu.vector_store %arg11[%160, %c0_48], %159 {strides = array<i32>} : memref<8x512xf32, #tpu.memory_space<vmem>>, vector<1x128xf32>,
    %c4_i32 = arith.constant 4 : i32
    %162 = arith.index_cast %c4_i32 : i32 to index
    %c0_49 = arith.constant 0 : index
    %163 = vector.load %arg11[%162, %c0_49] : memref<8x512xf32, #tpu.memory_space<vmem>>, vector<1x512xf32>
    %cst_50 = arith.constant dense<0.000000e+00> : vector<1x512xf32>
    %164 = tpu.matmul %159, %35, %cst_50 {dimension_numbers = #tpu.dot_dimension_numbers<[1], [0], [0], [1], [0, 0, 1, 1], [], []>} : vector<1x128xf32>, vector<128x512xf32>, vector<1x512xf32> -> vector<1x512xf32>
    %165 = arith.addf %163, %164 : vector<1x512xf32>
    %166 = vector.extract_strided_slice %165 {offsets = [0, 0], sizes = [1, 128], strides = [1, 1]} : vector<1x512xf32> to vector<1x128xf32>
    %167 = arith.negf %166 : vector<1x128xf32>
    %168 = math.exp %167 : vector<1x128xf32>
    %cst_51 = arith.constant 1.000000e+00 : f32
    %169 = vector.broadcast %cst_51 : f32 to vector<1x128xf32>
    %170 = arith.addf %169, %168 : vector<1x128xf32>
    %171 = arith.divf %169, %170 : vector<1x128xf32>
    %172 = vector.extract_strided_slice %165 {offsets = [0, 128], sizes = [1, 128], strides = [1, 1]} : vector<1x512xf32> to vector<1x128xf32>
    %173 = arith.negf %172 : vector<1x128xf32>
    %174 = math.exp %173 : vector<1x128xf32>
    %cst_52 = arith.constant 1.000000e+00 : f32
    %175 = vector.broadcast %cst_52 : f32 to vector<1x128xf32>
    %176 = arith.addf %175, %174 : vector<1x128xf32>
    %177 = arith.divf %175, %176 : vector<1x128xf32>
    %178 = vector.extract_strided_slice %165 {offsets = [0, 256], sizes = [1, 128], strides = [1, 1]} : vector<1x512xf32> to vector<1x128xf32>
    %179 = math.tanh %178 : vector<1x128xf32>
    %180 = vector.extract_strided_slice %165 {offsets = [0, 384], sizes = [1, 128], strides = [1, 1]} : vector<1x512xf32> to vector<1x128xf32>
    %181 = arith.negf %180 : vector<1x128xf32>
    %182 = math.exp %181 : vector<1x128xf32>
    %cst_53 = arith.constant 1.000000e+00 : f32
    %183 = vector.broadcast %cst_53 : f32 to vector<1x128xf32>
    %184 = arith.addf %183, %182 : vector<1x128xf32>
    %185 = arith.divf %183, %184 : vector<1x128xf32>
    %186 = arith.mulf %177, %157 : vector<1x128xf32>
    %187 = arith.mulf %171, %179 : vector<1x128xf32>
    %188 = arith.addf %186, %187 : vector<1x128xf32>
    %189 = math.tanh %188 : vector<1x128xf32>
    %190 = arith.mulf %185, %189 : vector<1x128xf32>
    %191 = arith.index_cast %c4_i32 : i32 to index
    %c0_54 = arith.constant 0 : index
    %192 = vector.load %arg11[%191, %c0_54] : memref<8x512xf32, #tpu.memory_space<vmem>>, vector<1x128xf32>
    tpu.vector_store %arg11[%191, %c0_54], %190 {strides = array<i32>} : memref<8x512xf32, #tpu.memory_space<vmem>>, vector<1x128xf32>,
    %c5_i32 = arith.constant 5 : i32
    %193 = arith.index_cast %c5_i32 : i32 to index
    %c0_55 = arith.constant 0 : index
    %194 = vector.load %arg11[%193, %c0_55] : memref<8x512xf32, #tpu.memory_space<vmem>>, vector<1x512xf32>
    %cst_56 = arith.constant dense<0.000000e+00> : vector<1x512xf32>
    %195 = tpu.matmul %190, %35, %cst_56 {dimension_numbers = #tpu.dot_dimension_numbers<[1], [0], [0], [1], [0, 0, 1, 1], [], []>} : vector<1x128xf32>, vector<128x512xf32>, vector<1x512xf32> -> vector<1x512xf32>
    %196 = arith.addf %194, %195 : vector<1x512xf32>
    %197 = vector.extract_strided_slice %196 {offsets = [0, 0], sizes = [1, 128], strides = [1, 1]} : vector<1x512xf32> to vector<1x128xf32>
    %198 = arith.negf %197 : vector<1x128xf32>
    %199 = math.exp %198 : vector<1x128xf32>
    %cst_57 = arith.constant 1.000000e+00 : f32
    %200 = vector.broadcast %cst_57 : f32 to vector<1x128xf32>
    %201 = arith.addf %200, %199 : vector<1x128xf32>
    %202 = arith.divf %200, %201 : vector<1x128xf32>
    %203 = vector.extract_strided_slice %196 {offsets = [0, 128], sizes = [1, 128], strides = [1, 1]} : vector<1x512xf32> to vector<1x128xf32>
    %204 = arith.negf %203 : vector<1x128xf32>
    %205 = math.exp %204 : vector<1x128xf32>
    %cst_58 = arith.constant 1.000000e+00 : f32
    %206 = vector.broadcast %cst_58 : f32 to vector<1x128xf32>
    %207 = arith.addf %206, %205 : vector<1x128xf32>
    %208 = arith.divf %206, %207 : vector<1x128xf32>
    %209 = vector.extract_strided_slice %196 {offsets = [0, 256], sizes = [1, 128], strides = [1, 1]} : vector<1x512xf32> to vector<1x128xf32>
    %210 = math.tanh %209 : vector<1x128xf32>
    %211 = vector.extract_strided_slice %196 {offsets = [0, 384], sizes = [1, 128], strides = [1, 1]} : vector<1x512xf32> to vector<1x128xf32>
    %212 = arith.negf %211 : vector<1x128xf32>
    %213 = math.exp %212 : vector<1x128xf32>
    %cst_59 = arith.constant 1.000000e+00 : f32
    %214 = vector.broadcast %cst_59 : f32 to vector<1x128xf32>
    %215 = arith.addf %214, %213 : vector<1x128xf32>
    %216 = arith.divf %214, %215 : vector<1x128xf32>
    %217 = arith.mulf %208, %188 : vector<1x128xf32>
    %218 = arith.mulf %202, %210 : vector<1x128xf32>
    %219 = arith.addf %217, %218 : vector<1x128xf32>
    %220 = math.tanh %219 : vector<1x128xf32>
    %221 = arith.mulf %216, %220 : vector<1x128xf32>
    %222 = arith.index_cast %c5_i32 : i32 to index
    %c0_60 = arith.constant 0 : index
    %223 = vector.load %arg11[%222, %c0_60] : memref<8x512xf32, #tpu.memory_space<vmem>>, vector<1x128xf32>
    tpu.vector_store %arg11[%222, %c0_60], %221 {strides = array<i32>} : memref<8x512xf32, #tpu.memory_space<vmem>>, vector<1x128xf32>,
    %c6_i32 = arith.constant 6 : i32
    %224 = arith.index_cast %c6_i32 : i32 to index
    %c0_61 = arith.constant 0 : index
    %225 = vector.load %arg11[%224, %c0_61] : memref<8x512xf32, #tpu.memory_space<vmem>>, vector<1x512xf32>
    %cst_62 = arith.constant dense<0.000000e+00> : vector<1x512xf32>
    %226 = tpu.matmul %221, %35, %cst_62 {dimension_numbers = #tpu.dot_dimension_numbers<[1], [0], [0], [1], [0, 0, 1, 1], [], []>} : vector<1x128xf32>, vector<128x512xf32>, vector<1x512xf32> -> vector<1x512xf32>
    %227 = arith.addf %225, %226 : vector<1x512xf32>
    %228 = vector.extract_strided_slice %227 {offsets = [0, 0], sizes = [1, 128], strides = [1, 1]} : vector<1x512xf32> to vector<1x128xf32>
    %229 = arith.negf %228 : vector<1x128xf32>
    %230 = math.exp %229 : vector<1x128xf32>
    %cst_63 = arith.constant 1.000000e+00 : f32
    %231 = vector.broadcast %cst_63 : f32 to vector<1x128xf32>
    %232 = arith.addf %231, %230 : vector<1x128xf32>
    %233 = arith.divf %231, %232 : vector<1x128xf32>
    %234 = vector.extract_strided_slice %227 {offsets = [0, 128], sizes = [1, 128], strides = [1, 1]} : vector<1x512xf32> to vector<1x128xf32>
    %235 = arith.negf %234 : vector<1x128xf32>
    %236 = math.exp %235 : vector<1x128xf32>
    %cst_64 = arith.constant 1.000000e+00 : f32
    %237 = vector.broadcast %cst_64 : f32 to vector<1x128xf32>
    %238 = arith.addf %237, %236 : vector<1x128xf32>
    %239 = arith.divf %237, %238 : vector<1x128xf32>
    %240 = vector.extract_strided_slice %227 {offsets = [0, 256], sizes = [1, 128], strides = [1, 1]} : vector<1x512xf32> to vector<1x128xf32>
    %241 = math.tanh %240 : vector<1x128xf32>
    %242 = vector.extract_strided_slice %227 {offsets = [0, 384], sizes = [1, 128], strides = [1, 1]} : vector<1x512xf32> to vector<1x128xf32>
    %243 = arith.negf %242 : vector<1x128xf32>
    %244 = math.exp %243 : vector<1x128xf32>
    %cst_65 = arith.constant 1.000000e+00 : f32
    %245 = vector.broadcast %cst_65 : f32 to vector<1x128xf32>
    %246 = arith.addf %245, %244 : vector<1x128xf32>
    %247 = arith.divf %245, %246 : vector<1x128xf32>
    %248 = arith.mulf %239, %219 : vector<1x128xf32>
    %249 = arith.mulf %233, %241 : vector<1x128xf32>
    %250 = arith.addf %248, %249 : vector<1x128xf32>
    %251 = math.tanh %250 : vector<1x128xf32>
    %252 = arith.mulf %247, %251 : vector<1x128xf32>
    %253 = arith.index_cast %c6_i32 : i32 to index
    %c0_66 = arith.constant 0 : index
    %254 = vector.load %arg11[%253, %c0_66] : memref<8x512xf32, #tpu.memory_space<vmem>>, vector<1x128xf32>
    tpu.vector_store %arg11[%253, %c0_66], %252 {strides = array<i32>} : memref<8x512xf32, #tpu.memory_space<vmem>>, vector<1x128xf32>,
    %c7_i32 = arith.constant 7 : i32
    %255 = arith.index_cast %c7_i32 : i32 to index
    %c0_67 = arith.constant 0 : index
    %256 = vector.load %arg11[%255, %c0_67] : memref<8x512xf32, #tpu.memory_space<vmem>>, vector<1x512xf32>
    %cst_68 = arith.constant dense<0.000000e+00> : vector<1x512xf32>
    %257 = tpu.matmul %252, %35, %cst_68 {dimension_numbers = #tpu.dot_dimension_numbers<[1], [0], [0], [1], [0, 0, 1, 1], [], []>} : vector<1x128xf32>, vector<128x512xf32>, vector<1x512xf32> -> vector<1x512xf32>
    %258 = arith.addf %256, %257 : vector<1x512xf32>
    %259 = vector.extract_strided_slice %258 {offsets = [0, 0], sizes = [1, 128], strides = [1, 1]} : vector<1x512xf32> to vector<1x128xf32>
    %260 = arith.negf %259 : vector<1x128xf32>
    %261 = math.exp %260 : vector<1x128xf32>
    %cst_69 = arith.constant 1.000000e+00 : f32
    %262 = vector.broadcast %cst_69 : f32 to vector<1x128xf32>
    %263 = arith.addf %262, %261 : vector<1x128xf32>
    %264 = arith.divf %262, %263 : vector<1x128xf32>
    %265 = vector.extract_strided_slice %258 {offsets = [0, 128], sizes = [1, 128], strides = [1, 1]} : vector<1x512xf32> to vector<1x128xf32>
    %266 = arith.negf %265 : vector<1x128xf32>
    %267 = math.exp %266 : vector<1x128xf32>
    %cst_70 = arith.constant 1.000000e+00 : f32
    %268 = vector.broadcast %cst_70 : f32 to vector<1x128xf32>
    %269 = arith.addf %268, %267 : vector<1x128xf32>
    %270 = arith.divf %268, %269 : vector<1x128xf32>
    %271 = vector.extract_strided_slice %258 {offsets = [0, 256], sizes = [1, 128], strides = [1, 1]} : vector<1x512xf32> to vector<1x128xf32>
    %272 = math.tanh %271 : vector<1x128xf32>
    %273 = vector.extract_strided_slice %258 {offsets = [0, 384], sizes = [1, 128], strides = [1, 1]} : vector<1x512xf32> to vector<1x128xf32>
    %274 = arith.negf %273 : vector<1x128xf32>
    %275 = math.exp %274 : vector<1x128xf32>
    %cst_71 = arith.constant 1.000000e+00 : f32
    %276 = vector.broadcast %cst_71 : f32 to vector<1x128xf32>
    %277 = arith.addf %276, %275 : vector<1x128xf32>
    %278 = arith.divf %276, %277 : vector<1x128xf32>
    %279 = arith.mulf %270, %250 : vector<1x128xf32>
    %280 = arith.mulf %264, %272 : vector<1x128xf32>
    %281 = arith.addf %279, %280 : vector<1x128xf32>
    %282 = math.tanh %281 : vector<1x128xf32>
    %283 = arith.mulf %278, %282 : vector<1x128xf32>
    %284 = arith.index_cast %c7_i32 : i32 to index
    %c0_72 = arith.constant 0 : index
    %285 = vector.load %arg11[%284, %c0_72] : memref<8x512xf32, #tpu.memory_space<vmem>>, vector<1x128xf32>
    tpu.vector_store %arg11[%284, %c0_72], %283 {strides = array<i32>} : memref<8x512xf32, #tpu.memory_space<vmem>>, vector<1x128xf32>,
    %c8_i32 = arith.constant 8 : i32
    %c0_73 = arith.constant 0 : index
    %c0_74 = arith.constant 0 : index
    %286 = vector.load %arg11[%c0_73, %c0_74] : memref<8x512xf32, #tpu.memory_space<vmem>>, vector<8x128xf32>
    %c0_75 = arith.constant 0 : index
    %c0_76 = arith.constant 0 : index
    %287 = vector.load %arg8[%c0_75, %c0_76] : memref<128x1xf32, #tpu.memory_space<vmem>>, vector<128x1xf32>
    %cst_77 = arith.constant dense<0.000000e+00> : vector<8x1xf32>
    %288 = tpu.matmul %286, %287, %cst_77 {dimension_numbers = #tpu.dot_dimension_numbers<[1], [0], [0], [1], [0, 0, 1, 1], [], []>} : vector<8x128xf32>, vector<128x1xf32>, vector<8x1xf32> -> vector<8x1xf32>
    %c0_78 = arith.constant 0 : index
    %c0_79 = arith.constant 0 : index
    %289 = vector.load %arg9[%c0_78, %c0_79] : memref<1x1xf32, #tpu.memory_space<vmem>>, vector<1x1xf32>
    %290 = vector.broadcast %289 : vector<1x1xf32> to vector<8x1xf32>
    %291 = arith.addf %288, %290 : vector<8x1xf32>
    %292 = arith.negf %291 : vector<8x1xf32>
    %293 = math.exp %292 : vector<8x1xf32>
    %cst_80 = arith.constant 1.000000e+00 : f32
    %294 = vector.broadcast %cst_80 : f32 to vector<8x1xf32>
    %295 = arith.addf %294, %293 : vector<8x1xf32>
    %296 = arith.divf %294, %295 : vector<8x1xf32>
    %c0_81 = arith.constant 0 : index
    %c0_82 = arith.constant 0 : index
    %297 = vector.load %arg10[%c0_81, %c0_82] : memref<8x1xf32, #tpu.memory_space<vmem>>, vector<8x1xf32>
    tpu.vector_store %arg10[%c0_81, %c0_82], %296 {strides = array<i32>} : memref<8x1xf32, #tpu.memory_space<vmem>>, vector<8x1xf32>,
    return
  }
}

</mosaic_0001>

<bundles_post_ra>
// kernel: forward.3
= control target key start
LH: loop header
LB: loop body
LE: loop exit
PB: predicated region body
PF: predicated region fallthrough
CT: control target
= control target key end

     0   :  { %vm105_vm0 = vcmask 1043456   ;;  %v4031_v3 = vmov 0.0   ;;  %vm38_vm1 = vcmask 293888   ;;  %vm264_vm2 = vcmask 1044480   ;;  %s4020_s5 = inlined_call_operand.vmem [shape: f32[36,512], index: 5, kind: input, shape index: {}]   ;;  %s4021_s0 = inlined_call_operand.vmem [shape: f32[8,36], index: 0, kind: input, shape index: {}]   ;;  %s4022_s6 = inlined_call_operand.vmem [shape: f32[128,512], index: 6, kind: input, shape index: {}]   ;;  %s4023_s2 = inlined_call_operand.vmem [shape: f32[1,36], index: 2, kind: input, shape index: {}]   ;;  %s4024_s3 = inlined_call_operand.vmem [shape: f32[1,36], index: 3, kind: input, shape index: {}]   ;;  %s4025_s4 = inlined_call_operand.vmem [shape: f32[5,512], index: 4, kind: input, shape index: {}]   ;;  %s4026_s1 = inlined_call_operand.vmem [shape: f32[8,5], index: 1, kind: input, shape index: {}]   ;;  %s4027_s7 = inlined_call_operand.vmem [shape: f32[1,512], index: 7, kind: input, shape index: {}]   ;;  %s4028_s8 = inlined_call_operand.vmem [shape: f32[128,1], index: 8, kind: input, shape index: {}]   ;;  %s4029_s9 = inlined_call_operand.<no memory space> [shape: f32[1,1], index: 9, kind: input, shape index: {}]   ;;  %s4030_s10 = inlined_call_operand.vmem [shape: f32[8,1], index: 10, kind: output, shape index: {}]  }
   0x1   :  { %v99_v0 = vld [vmem:[%s4020_s5 + $0x88] sm:$0xf]  ;;  %v98_v1 = vld [vmem:[%s4020_s5 + $0x80] sm:$0xf]  ;;  %182 = vmatprep.mubr.f32.mxu1 %v4031_v3  ;;  %578 = vmatprep.mubr.f32.mxu0 %v4031_v3  ;;  %v101_v15 = vld [vmem:[%s4020_s5 + $0x98] sm:$0xf] }
   0x2   :  { %v95_v2 = vld [vmem:[%s4020_s5 + $0x68] sm:$0xff]  ;;  %2268 = vmatprep.subr.msk.mxu1 %vm105_vm0, %v99_v0  ;;  %v94_v4 = vld [vmem:[%s4020_s5 + $0x60] sm:$0xff]  ;;  %vm260_vm3 = vcmask 39936   ;;  %vm2561_vm4 = vmmov 0   ;;  %vm2260_vm5 = vcmask 7168  }
   0x3   :  { %2269 = vmatpush1.msk.msra.mxu1 %vm105_vm0, %v98_v1  ;;  %v91_v5 = vld [vmem:[%s4020_s5 + $0x48] sm:$0xff]  ;;  %v90_v6 = vld [vmem:[%s4020_s5 + $0x40] sm:$0xff] }
   0x4   :  { %142 = vmatprep.subr.mxu1 %v95_v2  ;;  %v37_v7 = vld [vmem:[%s4021_s0] sm:$0xff]  ;;  %v87_v8 = vld [vmem:[%s4020_s5 + $0x28] sm:$0xff] }
   0x5   :  { %143 = vmatpush1.msra.mxu1 %v94_v4  ;;  %v39_v9 = vsel %vm38_vm1, %v37_v7, 0.0  ;;  %v86_v10 = vld [vmem:[%s4020_s5 + $0x20] sm:$0xff]  ;;  %v83_v12 = vld [vmem:[%s4020_s5 + $0x8] sm:$0xff] }
   0x6   :  { %144 = vmatprep.subr.mxu1 %v91_v5  ;;  %v40_v11 = vrot.slane %v39_v9, 4  ;;  %v82_v13 = vld [vmem:[%s4020_s5] sm:$0xff]  ;;  %v2661_v17 = vld [vmem:[%s4022_s6 + $0x1e8] sm:$0xff] }
   0x7   :  { %145 = vmatpush1.msra.mxu1 %v90_v6  ;;  %4135 = vst [vmem:[#allocation4_spill] sm:$0xff] %v2661_v17  ;;  %v2666_v18 = vld [vmem:[%s4022_s6 + $0x1e0] sm:$0xff]  ;;  %514 = vmatprep.subr.mxu0 %v2661_v17  ;;  %v2672_v19 = vld [vmem:[%s4022_s6 + $0x1c8] sm:$0xff] }
   0x8   :  { %146 = vmatprep.subr.mxu1 %v87_v8  ;;  %v41_v14 = vadd.f32 %v40_v11, %v39_v9  ;;  %515 = vmatpush1.msra.mxu0 %v2666_v18  ;;  %v2679_v21 = vld [vmem:[%s4022_s6 + $0x1c0] sm:$0xff]  ;;  %v2684_v22 = vld [vmem:[%s4022_s6 + $0x1a8] sm:$0xff]  ;;  %v97_v8 = vld [vmem:[%s4020_s5 + $0x78] sm:$0xff] }
   0x9   :  { %147 = vmatpush1.msra.mxu1 %v86_v10  ;;  %516 = vmatprep.subr.mxu0 %v2672_v19  ;;  %v2690_v23 = vld [vmem:[%s4022_s6 + $0x1a0] sm:$0xff]  ;;  %v2696_v25 = vld [vmem:[%s4022_s6 + $0x188] sm:$0xff]  ;;  %v96_v9 = vld [vmem:[%s4020_s5 + $0x70] sm:$0xff] }
   0xa   :  { %148 = vmatprep.subr.mxu1 %v83_v12  ;;  %v42_v16 = vrot.slane %v41_v14, 2  ;;  %517 = vmatpush1.msra.mxu0 %v2679_v21  ;;  %v2702_v26 = vld [vmem:[%s4022_s6 + $0x180] sm:$0xff]  ;;  %v2708_v28 = vld [vmem:[%s4022_s6 + $0x168] sm:$0xff]  ;;  %v93_v10 = vld [vmem:[%s4020_s5 + $0x58] sm:$0xff] }
   0xb   :  { %149 = vmatpush1.msra.mxu1 %v82_v13  ;;  %518 = vmatprep.subr.mxu0 %v2684_v22  ;;  %v2714_v29 = vld [vmem:[%s4022_s6 + $0x160] sm:$0xff]  ;;  %v2720_v31 = vld [vmem:[%s4022_s6 + $0x148] sm:$0xff]  ;;  %v92_v11 = vld [vmem:[%s4020_s5 + $0x50] sm:$0xff] }
   0xc   :  { %2271 = vmatprep.subr.msk.mxu1 %vm105_vm0, %v101_v15  ;;  %v43_v20 = vadd.f32 %v42_v16, %v41_v14  ;;  %519 = vmatpush1.msra.mxu0 %v2690_v23  ;;  %v2726_v32 = vld [vmem:[%s4022_s6 + $0x140] sm:$0xff]  ;;  %v2734_v34 = vld [vmem:[%s4022_s6 + $0x128] sm:$0xff]  ;;  %v89_v12 = vld [vmem:[%s4020_s5 + $0x38] sm:$0xff] }
   0xd   :  { %520 = vmatprep.subr.mxu0 %v2696_v25  ;;  %v2740_v35 = vld [vmem:[%s4022_s6 + $0x120] sm:$0xff]  ;;  %v2748_v37 = vld [vmem:[%s4022_s6 + $0x108] sm:$0xff]  ;;  %v88_v13 = vld [vmem:[%s4020_s5 + $0x30] sm:$0xff] }
   0xe   :  { %v44_v24 = vrot.slane %v43_v20, 1  ;;  %521 = vmatpush1.msra.mxu0 %v2702_v26  ;;  %v2754_v38 = vld [vmem:[%s4022_s6 + $0x100] sm:$0xff]  ;;  %v2761_v40 = vld [vmem:[%s4022_s6 + $0xe8] sm:$0xff]  ;;  %v85_v14 = vld [vmem:[%s4020_s5 + $0x18] sm:$0xff] }
   0xf   :  { %522 = vmatprep.subr.mxu0 %v2708_v28  ;;  %v2767_v42 = vld [vmem:[%s4022_s6 + $0xe0] sm:$0xff]  ;;  %v2773_v43 = vld [vmem:[%s4022_s6 + $0xc8] sm:$0xff]  ;;  %v84_v15 = vld [vmem:[%s4020_s5 + $0x10] sm:$0xff] }
  0x10   :  { %v45_v27 = vadd.f32 %v44_v24, %v43_v20  ;;  %523 = vmatpush1.msra.mxu0 %v2714_v29  ;;  %v2779_v45 = vld [vmem:[%s4022_s6 + $0xc0] sm:$0xff]  ;;  %v2785_v46 = vld [vmem:[%s4022_s6 + $0xa8] sm:$0xff]  ;;  %v81_v24 = vld [vmem:[%s4025_s4 + $0x18] sm:$0x1f] }
  0x11   :  { %524 = vmatprep.subr.mxu0 %v2720_v31  ;;  %4136 = vst [vmem:[#allocation5_spill] sm:$0xff] %v2785_v46  ;;  %v2791_v48 = vld [vmem:[%s4022_s6 + $0xa0] sm:$0xff]  ;;  %v2797_v49 = vld [vmem:[%s4022_s6 + $0x88] sm:$0xff] }
  0x12   :  { %v47_v30 = vmul.f32 0.125, %v45_v27  ;;  %525 = vmatpush1.msra.mxu0 %v2726_v32  ;;  %4137 = vst [vmem:[#allocation6_spill] sm:$0xff] %v2791_v48  ;;  %4138 = vst [vmem:[#allocation7_spill] sm:$0xff] %v2797_v49  ;;  %v2803_v51 = vld [vmem:[%s4022_s6 + $0x80] sm:$0xff]  ;;  %v2809_v52 = vld [vmem:[%s4022_s6 + $0x68] sm:$0xff] }
  0x13   :  { %526 = vmatprep.subr.mxu0 %v2734_v34  ;;  %4139 = vst [vmem:[#allocation8_spill] sm:$0xff] %v2803_v51  ;;  %4140 = vst [vmem:[#allocation9_spill] sm:$0xff] %v2809_v52  ;;  %v2815_v54 = vld [vmem:[%s4022_s6 + $0x60] sm:$0xff]  ;;  %v2821_v55 = vld [vmem:[%s4022_s6 + $0x48] sm:$0xff] }
  0x14   :  { %v2728_v33 = vsub.f32 %v37_v7, %v47_v30  ;;  %527 = vmatpush1.msra.mxu0 %v2740_v35  ;;  %4141 = vst [vmem:[#allocation10_spill] sm:$0xff] %v2815_v54  ;;  %4142 = vst [vmem:[#allocation11_spill] sm:$0xff] %v2821_v55  ;;  %v2827_v57 = vld [vmem:[%s4022_s6 + $0x40] sm:$0xff]  ;;  %v2833_v58 = vld [vmem:[%s4022_s6 + $0x28] sm:$0xff] }
  0x15   :  { %528 = vmatprep.subr.mxu0 %v2748_v37  ;;  %4143 = vst [vmem:[#allocation12_spill] sm:$0xff] %v2827_v57  ;;  %4144 = vst [vmem:[#allocation13_spill] sm:$0xff] %v2833_v58  ;;  %v2839_v60 = vld [vmem:[%s4022_s6 + $0x20] sm:$0xff]  ;;  %v2845_v61 = vld [vmem:[%s4022_s6 + $0x8] sm:$0xff] }
  0x16   :  { %v49_v36 = vmul.f32 %v2728_v33, %v2728_v33  ;;  %529 = vmatpush1.msra.mxu0 %v2754_v38  ;;  %4145 = vst [vmem:[#allocation14_spill] sm:$0xff] %v2839_v60  ;;  %4146 = vst [vmem:[#allocation15_spill] sm:$0xff] %v2845_v61  ;;  %v2851_v63 = vld [vmem:[%s4022_s6] sm:$0xff]  ;;  %v100_v7 = vld [vmem:[%s4020_s5 + $0x90] sm:$0xf] }
  0x17   :  { %530 = vmatprep.subr.mxu0 %v2761_v40  ;;  %4147 = vst [vmem:[#allocation16_spill] sm:$0xff] %v2851_v63  ;;  %v2266_v1 = vld [vmem:[%s4023_s2] ss:$0 sm:$0xff]  ;;  %v79_v16 = vld [vmem:[%s4025_s4 + $0x8] sm:$0x1f] }
  0x18   :  { %v50_v39 = vsel %vm38_vm1, %v49_v36, 0.0  ;;  %531 = vmatpush1.msra.mxu0 %v2767_v42  ;;  %v2267_v4 = vld [vmem:[%s4024_s3] ss:$0 sm:$0xff]  ;;  %v80_v30 = vld [vmem:[%s4025_s4 + $0x10] sm:$0x1f] }
  0x19   :  { %v51_v41 = vrot.slane %v50_v39, 4  ;;  %532 = vmatprep.subr.mxu0 %v2773_v43  ;;  %v78_v20 = vld [vmem:[%s4025_s4] sm:$0x1f]  ;;  %v2956_v36 = vld [vmem:[%s4022_s6 + $0x1f0] sm:$0xff] }
  0x1a   :  { %533 = vmatpush1.msra.mxu0 %v2779_v45  ;;  %v77_v27 = vld [vmem:[%s4026_s1] sm:$0xff] }
  0x1b   :  { %v52_v44 = vadd.f32 %v51_v41, %v50_v39  ;;  %534 = vmatprep.subr.mxu0 %v2785_v46  ;;  %v2962_v39 = vld [vmem:[%s4022_s6 + $0x1d8] sm:$0xff]  ;;  %v2968_v41 = vld [vmem:[%s4022_s6 + $0x1d0] sm:$0xff] }
  0x1c   :  { %535 = vmatpush1.msra.mxu0 %v2791_v48 }
  0x1d   :  { %v53_v47 = vrot.slane %v52_v44, 2  ;;  %536 = vmatprep.subr.mxu0 %v2797_v49 }
  0x1e   :  { %537 = vmatpush1.msra.mxu0 %v2803_v51 }
  0x1f   :  { %v54_v50 = vadd.f32 %v53_v47, %v52_v44  ;;  %538 = vmatprep.subr.mxu0 %v2809_v52  ;;  %v2975_v44 = vld [vmem:[%s4022_s6 + $0x1b8] sm:$0xff]  ;;  %v2982_v47 = vld [vmem:[%s4022_s6 + $0x1b0] sm:$0xff] }
  0x20   :  { %539 = vmatpush1.msra.mxu0 %v2815_v54 }
  0x21   :  { %v55_v53 = vrot.slane %v54_v50, 1  ;;  %540 = vmatprep.subr.mxu0 %v2821_v55 }
  0x22   :  { %541 = vmatpush1.msra.mxu0 %v2827_v57 }
  0x23   :  { %v56_v56 = vadd.f32 %v55_v53, %v54_v50  ;;  %542 = vmatprep.subr.mxu0 %v2833_v58  ;;  %v2988_v50 = vld [vmem:[%s4022_s6 + $0x198] sm:$0xff]  ;;  %v2994_v53 = vld [vmem:[%s4022_s6 + $0x190] sm:$0xff] }
  0x24   :  { %543 = vmatpush1.msra.mxu0 %v2839_v60 }
  0x25   :  { %v57_v59 = vmul.f32 0.125, %v56_v56  ;;  %544 = vmatprep.subr.mxu0 %v2845_v61  ;;  %v3000_v56 = vld [vmem:[%s4022_s6 + $0x178] sm:$0xff] }
  0x26   :  { %545 = vmatpush1.msra.mxu0 %v2851_v63 }
  0x27   :  { %v58_v62 = vadd.f32 1e-05, %v57_v59  ;;  %579 = vmatmul.mubr.f32.vlgmr.msra.gmra.mxu0 %v4031_v3  ;;  %720 = vmatprep.subr.mxu0 %v2661_v17  ;;  %v3006_v59 = vld [vmem:[%s4022_s6 + $0x170] sm:$0xff] }
  0x28   :  { %721 = vmatpush1.msra.mxu0 %v2666_v18  ;;  %784 = vmatprep.mubr.f32.mxu0 %v4031_v3 }
  0x29   :  { %2361 = vrsqrt.f32 %v58_v62  ;;  %722 = vmatprep.subr.mxu0 %v2672_v19  ;;  %v3012_v62 = vld [vmem:[%s4022_s6 + $0x158] sm:$0xff] }
  0x2a   :  { %723 = vmatpush1.msra.mxu0 %v2679_v21 }
  0x2b   :  { %724 = vmatprep.subr.mxu0 %v2684_v22 }
  0x2c   :  { %725 = vmatpush1.msra.mxu0 %v2690_v23 }
  0x2d   :  { %726 = vmatprep.subr.mxu0 %v2696_v25 }
  0x2e   :  { %727 = vmatpush1.msra.mxu0 %v2702_v26 }
  0x2f   :  { %728 = vmatprep.subr.mxu0 %v2708_v28 }
  0x30   :  { %729 = vmatpush1.msra.mxu0 %v2714_v29 }
  0x31   :  { %730 = vmatprep.subr.mxu0 %v2720_v31 }
  0x32   :  { %731 = vmatpush1.msra.mxu0 %v2726_v32 }
  0x33   :  { %732 = vmatprep.subr.mxu0 %v2734_v34 }
  0x34   :  { %733 = vmatpush1.msra.mxu0 %v2740_v35 }
  0x35   :  { %734 = vmatprep.subr.mxu0 %v2748_v37 }
  0x36   :  { %v2362_v0 = vpop.eup %2361  ;;  %735 = vmatpush1.msra.mxu0 %v2754_v38 }
  0x37   :  { %v60_v2 = vmul.f32 %v2362_v0, %v2728_v33  ;;  %736 = vmatprep.subr.mxu0 %v2761_v40  ;;  %v2946_v33 = vld [vmem:[%s4022_s6 + $0x1f8] sm:$0xff]  ;;  %v3018_v0 = vld [vmem:[%s4022_s6 + $0x150] sm:$0xff] }
  0x38   :  { %737 = vmatpush1.msra.mxu0 %v2767_v42  ;;  %4148 = vst [vmem:[#allocation17_spill] sm:$0xff] %v2946_v33 }
  0x39   :  { %v68_v5 = vmul.f32 %v2266_v1, %v60_v2  ;;  %738 = vmatprep.subr.mxu0 %v2773_v43  ;;  %v3024_v1 = vld [vmem:[%s4022_s6 + $0x138] sm:$0xff]  ;;  %v3030_v2 = vld [vmem:[%s4022_s6 + $0x130] sm:$0xff] }
  0x3a   :  { %739 = vmatpush1.msra.mxu0 %v2779_v45 }
  0x3b   :  { %v76_v6 = vadd.f32 %v2267_v4, %v68_v5  ;;  %740 = vmatprep.subr.mxu0 %v2785_v46  ;;  %v3036_v4 = vld [vmem:[%s4022_s6 + $0x118] sm:$0xff]  ;;  %v3042_v5 = vld [vmem:[%s4022_s6 + $0x110] sm:$0xff]  ;;  %v2560_v46 = vmov 1966171168  }
  0x3c   :  { %741 = vmatpush1.msra.mxu0 %v2791_v48 }
  0x3d   :  { %2270 = vmatmul.mubr.msk.f32.vlgmr.msra.gmra.mxu1 %vm38_vm1, %v76_v6  ;;  %742 = vmatprep.subr.mxu0 %v2797_v49 }
  0x3e   :  { %2272 = vmatpush1.msk.msra.mxu1 %vm105_vm0, %v100_v7  ;;  %253 = vmatprep.mubr.f32.mxu1 %v4031_v3  ;;  %v3054_v7 = vld [vmem:[%s4022_s6 + $0xf0] sm:$0xff] }
  0x3f   :  { %213 = vmatprep.subr.mxu1 %v97_v8  ;;  %743 = vmatpush1.msra.mxu0 %v2803_v51  ;;  %v3060_v8 = vld [vmem:[%s4022_s6 + $0xd8] sm:$0xff] }
  0x40   :  { %214 = vmatpush1.msra.mxu1 %v96_v9  ;;  %744 = vmatprep.subr.mxu0 %v2809_v52  ;;  %v3066_v9 = vld [vmem:[%s4022_s6 + $0xd0] sm:$0xff] }
  0x41   :  { %215 = vmatprep.subr.mxu1 %v93_v10  ;;  %745 = vmatpush1.msra.mxu0 %v2815_v54  ;;  %4149 = vst [vmem:[#allocation18_spill] sm:$0xff] %v3066_v9  ;;  %v3072_v10 = vld [vmem:[%s4022_s6 + $0xb8] sm:$0xff] }
  0x42   :  { %216 = vmatpush1.msra.mxu1 %v92_v11  ;;  %746 = vmatprep.subr.mxu0 %v2821_v55  ;;  %4150 = vst [vmem:[#allocation19_spill] sm:$0xff] %v3072_v10  ;;  %v3078_v11 = vld [vmem:[%s4022_s6 + $0xb0] sm:$0xff] }
  0x43   :  { %217 = vmatprep.subr.mxu1 %v89_v12  ;;  %747 = vmatpush1.msra.mxu0 %v2827_v57  ;;  %4151 = vst [vmem:[#allocation20_spill] sm:$0xff] %v3078_v11  ;;  %v3084_v12 = vld [vmem:[%s4022_s6 + $0x98] sm:$0xff] }
  0x44   :  { %218 = vmatpush1.msra.mxu1 %v88_v13  ;;  %748 = vmatprep.subr.mxu0 %v2833_v58  ;;  %4152 = vst [vmem:[#allocation21_spill] sm:$0xff] %v3084_v12  ;;  %v3090_v13 = vld [vmem:[%s4022_s6 + $0x90] sm:$0xff] }
  0x45   :  { %219 = vmatprep.subr.mxu1 %v85_v14  ;;  %749 = vmatpush1.msra.mxu0 %v2839_v60  ;;  %4153 = vst [vmem:[#allocation22_spill] sm:$0xff] %v3090_v13  ;;  %v3096_v14 = vld [vmem:[%s4022_s6 + $0x78] sm:$0xff] }
  0x46   :  { %220 = vmatpush1.msra.mxu1 %v84_v15  ;;  %750 = vmatprep.subr.mxu0 %v2845_v61  ;;  %4154 = vst [vmem:[#allocation23_spill] sm:$0xff] %v3096_v14  ;;  %v3102_v15 = vld [vmem:[%s4022_s6 + $0x70] sm:$0xff] }
  0x47   :  { %2273 = vmatmul.mubr.msk.f32.vlgmr.msra.gmra.mxu1 %vm38_vm1, %v76_v6  ;;  %2274 = vmatprep.subr.msk.mxu1 %vm264_vm2, %v79_v16  ;;  %v3048_v6 = vld [vmem:[%s4022_s6 + $0xf8] sm:$0xff]  ;;  %4155 = vst [vmem:[#allocation24_spill] sm:$0xff] %v3102_v15 }
  0x48   :  { %2275 = vmatpush1.msk.msra.mxu1 %vm264_vm2, %v78_v20  ;;  %341 = vmatprep.mubr.f32.mxu1 %v4031_v3  ;;  %v3108_v16 = vld [vmem:[%s4022_s6 + $0x58] sm:$0xff]  ;;  %v3114_v20 = vld [vmem:[%s4022_s6 + $0x50] sm:$0xff] }
  0x49   :  { %2277 = vmatprep.subr.msk.mxu1 %vm264_vm2, %v81_v24  ;;  %751 = vmatpush1.msra.mxu0 %v2851_v63  ;;  %4156 = vst [vmem:[#allocation25_spill] sm:$0xff] %v3108_v16  ;;  %4157 = vst [vmem:[#allocation26_spill] sm:$0xff] %v3114_v20  ;;  %v3120_v24 = vld [vmem:[%s4022_s6 + $0x38] sm:$0xff] }
  0x4a   :  { %926 = vmatprep.subr.mxu0 %v2661_v17  ;;  %4158 = vst [vmem:[#allocation27_spill] sm:$0xff] %v3120_v24  ;;  %v4162_v17 = vmov 0.0  }
  0x4b   :  { %2276 = vmatmul.mubr.msk.f32.vlgmr.msra.gmra.mxu1 %vm260_vm3, %v77_v27 }
  0x4c   :  { %2278 = vmatpush1.msk.msra.mxu1 %vm264_vm2, %v80_v30  ;;  %412 = vmatprep.mubr.f32.mxu1 %v4031_v3  ;;  %v3132_v30 = vld [vmem:[%s4022_s6 + $0x18] sm:$0xff] }
  0x4d   :  { %585 = vmatprep.subr.mxu1 %v2946_v33  ;;  %4160 = vst [vmem:[#allocation29_spill] sm:$0xff] %v3132_v30 }
  0x4f   :  { %2279 = vmatmul.mubr.msk.f32.vlgmr.msra.gmra.mxu1 %vm260_vm3, %v77_v27  ;;  %v3126_v27 = vld [vmem:[%s4022_s6 + $0x30] sm:$0xff] }
  0x50   :  { %586 = vmatpush1.msra.mxu1 %v2956_v36  ;;  %649 = vmatprep.mubr.f32.mxu1 %v4031_v3  ;;  %4159 = vst [vmem:[#allocation28_spill] sm:$0xff] %v3126_v27  ;;  %v3138_v3 = vld [vmem:[%s4022_s6 + $0x10] sm:$0xff] }
  0x51   :  { %587 = vmatprep.subr.mxu1 %v2962_v39  ;;  %4161 = vst [vmem:[#allocation30_spill] sm:$0xff] %v3138_v3 }
  0x52   :  { %588 = vmatpush1.msra.mxu1 %v2968_v41 }
  0x53   :  { %589 = vmatprep.subr.mxu1 %v2975_v44 }
  0x54   :  { %590 = vmatpush1.msra.mxu1 %v2982_v47 }
  0x55   :  { %591 = vmatprep.subr.mxu1 %v2988_v50 }
  0x56   :  { %592 = vmatpush1.msra.mxu1 %v2994_v53 }
  0x57   :  { %593 = vmatprep.subr.mxu1 %v3000_v56 }
  0x58   :  { %594 = vmatpush1.msra.mxu1 %v3006_v59 }
  0x59   :  { %595 = vmatprep.subr.mxu1 %v3012_v62 }
  0x5a   :  { %596 = vmatpush1.msra.mxu1 %v3018_v0 }
  0x5b   :  { %597 = vmatprep.subr.mxu1 %v3024_v1 }
  0x5c   :  { %598 = vmatpush1.msra.mxu1 %v3030_v2 }
  0x5d   :  { %599 = vmatprep.subr.mxu1 %v3036_v4 }
  0x5e   :  { %600 = vmatpush1.msra.mxu1 %v3042_v5 }
  0x5f   :  { %601 = vmatprep.subr.mxu1 %v3048_v6 }
  0x60   :  { %602 = vmatpush1.msra.mxu1 %v3054_v7 }
  0x61   :  { %603 = vmatprep.subr.mxu1 %v3060_v8 }
  0x62   :  { %604 = vmatpush1.msra.mxu1 %v3066_v9 }
  0x63   :  { %605 = vmatprep.subr.mxu1 %v3072_v10 }
  0x64   :  { %606 = vmatpush1.msra.mxu1 %v3078_v11 }
  0x65   :  { %607 = vmatprep.subr.mxu1 %v3084_v12 }
  0x66   :  { %608 = vmatpush1.msra.mxu1 %v3090_v13 }
  0x67   :  { %609 = vmatprep.subr.mxu1 %v3096_v14 }
  0x68   :  { %610 = vmatpush1.msra.mxu1 %v3102_v15 }
  0x69   :  { %611 = vmatprep.subr.mxu1 %v3108_v16 }
  0x6a   :  { %612 = vmatpush1.msra.mxu1 %v3114_v20 }
  0x6b   :  { %613 = vmatprep.subr.mxu1 %v3120_v24 }
  0x6c   :  { %614 = vmatpush1.msra.mxu1 %v3126_v27 }
  0x6d   :  { %615 = vmatprep.subr.mxu1 %v3132_v30 }
  0x6e   :  { %616 = vmatpush1.msra.mxu1 %v3138_v3 }
  0x6f   :  { %650 = vmatmul.mubr.f32.vlgmr.msra.gmra.mxu1 %v4162_v17  ;;  %791 = vmatprep.subr.mxu1 %v2946_v33 }
  0x70   :  { %792 = vmatpush1.msra.mxu1 %v2956_v36  ;;  %855 = vmatprep.mubr.f32.mxu1 %v4162_v17  ;;  %v421_v17 = vlaneseq }
  0x71   :  { %793 = vmatprep.subr.mxu1 %v2962_v39 }
  0x72   :  { %794 = vmatpush1.msra.mxu1 %v2968_v41  ;;  %v422_v61 = vshrl.u32 %v421_v17, 7 }
  0x73   :  { %795 = vmatprep.subr.mxu1 %v2975_v44 }
  0x74   :  { %796 = vmatpush1.msra.mxu1 %v2982_v47  ;;  %v423_v58 = vsub.s32 0, %v422_v61 }
  0x75   :  { %797 = vmatprep.subr.mxu1 %v2988_v50 }
  0x76   :  { %798 = vmatpush1.msra.mxu1 %v2994_v53 }
  0x77   :  { %799 = vmatprep.subr.mxu1 %v3000_v56 }
  0x78   :  { %800 = vmatpush1.msra.mxu1 %v3006_v59 }
  0x79   :  { %801 = vmatprep.subr.mxu1 %v3012_v62 }
  0x7a   :  { %802 = vmatpush1.msra.mxu1 %v3018_v0 }
  0x7b   :  { %803 = vmatprep.subr.mxu1 %v3024_v1 }
  0x7c   :  { %804 = vmatpush1.msra.mxu1 %v3030_v2 }
  0x7d   :  { %805 = vmatprep.subr.mxu1 %v3036_v4 }
  0x7e   :  { %806 = vmatpush1.msra.mxu1 %v3042_v5 }
  0x7f   :  { %807 = vmatprep.subr.mxu1 %v3048_v6 }
  0x80   :  { %808 = vmatpush1.msra.mxu1 %v3054_v7 }
  0x81   :  { %809 = vmatprep.subr.mxu1 %v3060_v8 }
  0x82   :  { %810 = vmatpush1.msra.mxu1 %v3066_v9 }
  0x83   :  { %811 = vmatprep.subr.mxu1 %v3072_v10 }
  0x84   :  { %812 = vmatpush1.msra.mxu1 %v3078_v11 }
  0x85   :  { %813 = vmatprep.subr.mxu1 %v3084_v12 }
  0x86   :  { %814 = vmatpush1.msra.mxu1 %v3090_v13 }
  0x87   :  { %815 = vmatprep.subr.mxu1 %v3096_v14 }
  0x88   :  { %816 = vmatpush1.msra.mxu1 %v3102_v15 }
  0x89   :  { %817 = vmatprep.subr.mxu1 %v3108_v16  ;;  %v427_v16 = vsub.s32 1, %v422_v61 }
  0x8a   :  { %818 = vmatpush1.msra.mxu1 %v3114_v20  ;;  %v419_v20 = vld [vmem:[%s4027_s7] sm:$0xf] }
  0x8b   :  { %819 = vmatprep.subr.mxu1 %v3120_v24  ;;  %v424_v55 = vrot.slane %v419_v20, %v423_v58  ;;  %v428_v54 = vrot.slane %v419_v20, %v427_v16 }
  0x8c   :  { %820 = vmatpush1.msra.mxu1 %v3126_v27  ;;  %v431_v27 = vsub.s32 2, %v422_v61 }
  0x8d   :  { %821 = vmatprep.subr.mxu1 %v3132_v30 }
  0x8e   :  { %822 = vmatpush1.msra.mxu1 %v3138_v3  ;;  %v435_v3 = vsub.s32 3, %v422_v61  ;;  %v432_v13 = vrot.slane %v419_v20, %v431_v27 }
  0x8f   :  { %997 = vmatprep.subr.mxu1 %v2946_v33 }
  0x90   :  { %v436_v49 = vrot.slane %v419_v20, %v435_v3 }
  0xfd   :  { %v184_v63 = vpop.f32.mrf.mxu1 }
  0xff   :  { %v186_v60 = vpop.f32.mrf.mxu1 }
 0x107   :  { %v255_v57 = vpop.f32.mrf.mxu1 }
 0x109   :  { %v257_v24 = vpop.f32.mrf.mxu1 }
 0x10b   :  { %v343_v15 = vpop.f32.mrf.mxu1 }
 0x10c   :  { %v344_v30 = vadd.f32 %v343_v15, %v184_v63  ;;  %v663_v63 = vunpack.c.l.s4 %v2560_v46  ;;  %v580_v15 = vpop.f32.mrf.mxu0 }
 0x10d   :  { %v345_v14 = vpop.f32.mrf.mxu1 }
 0x10e   :  { %v441_v33 = vadd.f32 %v424_v55, %v344_v30  ;;  %v346_v52 = vadd.f32 %v345_v14, %v186_v60  ;;  %v664_v16 = vunpack.c.0.s8 %v663_v63  ;;  %v582_v9 = vpop.f32.mrf.mxu0 }
 0x10f   :  { %v414_v17 = vpop.f32.mrf.mxu1  ;;  %v660_v14 = vcombine.low %v580_v15, %v582_v9 }
 0x110   :  { %445 = vst [vmem:[#allocation2] sm:$0xff] %v441_v33  ;;  %v442_v51 = vadd.f32 %v428_v54, %v346_v52  ;;  %v415_v12 = vadd.f32 %v414_v17, %v255_v57  ;;  %v3181_v60 = vsub.s32 %v664_v16, %v422_v61 }
 0x111   :  { %v416_v11 = vpop.f32.mrf.mxu1 }
 0x112   :  { %446 = vst [vmem:[#allocation2 + $0x8] sm:$0xff] %v442_v51  ;;  %v443_v48 = vadd.f32 %v432_v13, %v415_v12  ;;  %v417_v10 = vadd.f32 %v416_v11, %v257_v24  ;;  %v668_v3 = vrot.slane %v660_v14, %v3181_v60 }
 0x114   :  { %447 = vst [vmem:[#allocation2 + $0x10] sm:$0xff] %v443_v48  ;;  %v444_v58 = vadd.f32 %v436_v49, %v417_v10 }
 0x116   :  { %448 = vst [vmem:[#allocation2 + $0x18] sm:$0xff] %v444_v58 }
 0x11d   :  { %v513_v49 = vld [vmem:[#allocation2] ss:$8 sm:$0xf] }
 0x12f   :  { %v651_v55 = vpop.f32.mrf.mxu1 }
 0x131   :  { %v653_v33 = vpop.f32.mrf.mxu1 }
 0x132   :  { %v661_v52 = vcombine.low %v651_v55, %v653_v33 }
 0x134   :  { %v675_v51 = vrot.slane %v661_v52, %v3181_v60 }
 0x136   :  { %v676_v54 = vcombine.low %v668_v3, %v675_v51  ;;  %v4163_v51 = vld [vmem:[#allocation18_spill] sm:$0xff] }
 0x138   :  { %v683_v48 = vrot.slane %v676_v54, %v3181_v60  ;;  %v4164_v54 = vld [vmem:[#allocation5_spill] sm:$0xff] }
 0x13a   :  { %v685_v57 = vadd.f32 %v683_v48, %v513_v49  ;;  %v4165_v48 = vld [vmem:[#allocation19_spill] sm:$0xff]  ;;  %v4166_v49 = vld [vmem:[#allocation6_spill] sm:$0xff] }
 0x13c   :  { %v2280_v10 = vmul.f32 -1.442695, %v685_v57  ;;  %v693_v46 = vrot.slane %v685_v57, 1  ;;  %v704_v12 = vrot.slane %v685_v57, 3  ;;  %v701_v9 = vrot.slane %v685_v57, 2  ;;  %v4167_v57 = vld [vmem:[#allocation20_spill] sm:$0xff] }
 0x13e   :  { %2363 = vpow2.f32 %v2280_v10  ;;  %v2281_v11 = vmul.f32 -1.442695, %v693_v46  ;;  %v2282_v61 = vmul.f32 -1.442695, %v704_v12  ;;  %v4168_v10 = vld [vmem:[#allocation7_spill] sm:$0xff]  ;;  %v4169_v46 = vld [vmem:[#allocation21_spill] sm:$0xff] }
 0x13f   :  { %v4171_v12 = vld [vmem:[#allocation22_spill] sm:$0xff] }
 0x140   :  { %2365 = vpow2.f32 %v2281_v11  ;;  %v4170_v11 = vld [vmem:[#allocation8_spill] sm:$0xff] }
 0x141   :  { %2367 = vpow2.f32 %v2282_v61  ;;  %v4172_v61 = vld [vmem:[#allocation9_spill] sm:$0xff] }
 0x14b   :  { %v2364_v13 = vpop.eup %2363 }
 0x14c   :  { %v689_v20 = vadd.f32 1.0, %v2364_v13  ;;  %v4173_v13 = vld [vmem:[#allocation23_spill] sm:$0xff] }
 0x14d   :  { %v2366_v24 = vpop.eup %2365 }
 0x14e   :  { %2369 = vrcp.f32 %v689_v20  ;;  %v698_v27 = vadd.f32 1.0, %v2366_v24  ;;  %v2368_v30 = vpop.eup %2367  ;;  %v4175_v20 = vld [vmem:[#allocation24_spill] sm:$0xff]  ;;  %v4176_v24 = vld [vmem:[#allocation11_spill] sm:$0xff] }
 0x14f   :  { %2371 = vtanh.f32 %v701_v9  ;;  %v709_v15 = vadd.f32 1.0, %v2368_v30  ;;  %v4174_v9 = vld [vmem:[#allocation10_spill] sm:$0xff]  ;;  %v4178_v30 = vld [vmem:[#allocation12_spill] sm:$0xff] }
 0x150   :  { %2373 = vrcp.f32 %v698_v27  ;;  %v4177_v27 = vld [vmem:[#allocation25_spill] sm:$0xff] }
 0x151   :  { %2375 = vrcp.f32 %v709_v15  ;;  %v4182_v15 = vld [vmem:[#allocation14_spill] sm:$0xff] }
 0x15b   :  { %v2370_v17 = vpop.eup %2369 }
 0x15c   :  { %v2372_v58 = vpop.eup %2371 }
 0x15d   :  { %v2374_v63 = vpop.eup %2373  ;;  %v713_v55 = vmul.f32 %v2372_v58, %v2370_v17  ;;  %v4179_v17 = vld [vmem:[#allocation26_spill] sm:$0xff]  ;;  %v4180_v58 = vld [vmem:[#allocation13_spill] sm:$0xff] }
 0x15e   :  { %v712_v16 = vmul.f32 0.0, %v2374_v63  ;;  %v2376_v33 = vpop.eup %2375  ;;  %v4181_v63 = vld [vmem:[#allocation27_spill] sm:$0xff] }
 0x160   :  { %v3186_v14 = vadd.f32 %v713_v55, %v712_v16  ;;  %v4183_v16 = vld [vmem:[#allocation28_spill] sm:$0xff]  ;;  %v4184_v55 = vld [vmem:[#allocation15_spill] sm:$0xff] }
 0x162   :  { %2377 = vtanh.f32 %v3186_v14 }
 0x16f   :  { %v2378_v52 = vpop.eup %2377 }
 0x170   :  { %v716_v3 = vmul.f32 %v2378_v52, %v2376_v33  ;;  %v4185_v33 = vld [vmem:[#allocation29_spill] sm:$0xff]  ;;  %v4186_v52 = vld [vmem:[#allocation16_spill] sm:$0xff] }
 0x172   :  { %717 = vst [vmem:[#allocation2] sm:$0x1] %v716_v3  ;;  %785 = vmatmul.mubr.f32.vlgmr.msra.gmra.mxu0 %v716_v3  ;;  %856 = vmatmul.mubr.f32.vlgmr.msra.gmra.mxu1 %v716_v3  ;;  %v4187_v3 = vmov 0.0  }
 0x173   :  { %927 = vmatpush1.msra.mxu0 %v2666_v18  ;;  %998 = vmatpush1.msra.mxu1 %v2956_v36 }
 0x174   :  { %928 = vmatprep.subr.mxu0 %v2672_v19  ;;  %999 = vmatprep.subr.mxu1 %v2962_v39 }
 0x175   :  { %929 = vmatpush1.msra.mxu0 %v2679_v21  ;;  %1000 = vmatpush1.msra.mxu1 %v2968_v41 }
 0x176   :  { %930 = vmatprep.subr.mxu0 %v2684_v22  ;;  %1001 = vmatprep.subr.mxu1 %v2975_v44 }
 0x177   :  { %931 = vmatpush1.msra.mxu0 %v2690_v23  ;;  %1002 = vmatpush1.msra.mxu1 %v2982_v47 }
 0x178   :  { %932 = vmatprep.subr.mxu0 %v2696_v25  ;;  %1003 = vmatprep.subr.mxu1 %v2988_v50 }
 0x179   :  { %933 = vmatpush1.msra.mxu0 %v2702_v26  ;;  %1004 = vmatpush1.msra.mxu1 %v2994_v53 }
 0x17a   :  { %934 = vmatprep.subr.mxu0 %v2708_v28  ;;  %1005 = vmatprep.subr.mxu1 %v3000_v56 }
 0x17b   :  { %935 = vmatpush1.msra.mxu0 %v2714_v29  ;;  %1006 = vmatpush1.msra.mxu1 %v3006_v59 }
 0x17c   :  { %936 = vmatprep.subr.mxu0 %v2720_v31  ;;  %1007 = vmatprep.subr.mxu1 %v3012_v62 }
 0x17d   :  { %937 = vmatpush1.msra.mxu0 %v2726_v32  ;;  %1008 = vmatpush1.msra.mxu1 %v3018_v0 }
 0x17e   :  { %938 = vmatprep.subr.mxu0 %v2734_v34  ;;  %1009 = vmatprep.subr.mxu1 %v3024_v1 }
 0x17f   :  { %939 = vmatpush1.msra.mxu0 %v2740_v35  ;;  %1010 = vmatpush1.msra.mxu1 %v3030_v2 }
 0x180   :  { %940 = vmatprep.subr.mxu0 %v2748_v37  ;;  %1011 = vmatprep.subr.mxu1 %v3036_v4 }
 0x181   :  { %941 = vmatpush1.msra.mxu0 %v2754_v38  ;;  %1012 = vmatpush1.msra.mxu1 %v3042_v5 }
 0x182   :  { %942 = vmatprep.subr.mxu0 %v2761_v40  ;;  %1013 = vmatprep.subr.mxu1 %v3048_v6 }
 0x183   :  { %943 = vmatpush1.msra.mxu0 %v2767_v42  ;;  %1014 = vmatpush1.msra.mxu1 %v3054_v7 }
 0x184   :  { %944 = vmatprep.subr.mxu0 %v2773_v43  ;;  %1015 = vmatprep.subr.mxu1 %v3060_v8 }
 0x185   :  { %945 = vmatpush1.msra.mxu0 %v2779_v45  ;;  %1016 = vmatpush1.msra.mxu1 %v4163_v51 }
 0x186   :  { %946 = vmatprep.subr.mxu0 %v4164_v54  ;;  %1017 = vmatprep.subr.mxu1 %v4165_v48 }
 0x187   :  { %947 = vmatpush1.msra.mxu0 %v4166_v49  ;;  %1018 = vmatpush1.msra.mxu1 %v4167_v57 }
 0x188   :  { %948 = vmatprep.subr.mxu0 %v4168_v10  ;;  %1019 = vmatprep.subr.mxu1 %v4169_v46 }
 0x189   :  { %949 = vmatpush1.msra.mxu0 %v4170_v11  ;;  %1020 = vmatpush1.msra.mxu1 %v4171_v12 }
 0x18a   :  { %950 = vmatprep.subr.mxu0 %v4172_v61  ;;  %1021 = vmatprep.subr.mxu1 %v4173_v13 }
 0x18b   :  { %951 = vmatpush1.msra.mxu0 %v4174_v9  ;;  %1022 = vmatpush1.msra.mxu1 %v4175_v20 }
 0x18c   :  { %952 = vmatprep.subr.mxu0 %v4176_v24  ;;  %1023 = vmatprep.subr.mxu1 %v4177_v27  ;;  %v4188_v27 = vld [vmem:[#allocation30_spill] sm:$0xff] }
 0x18d   :  { %953 = vmatpush1.msra.mxu0 %v4178_v30  ;;  %1024 = vmatpush1.msra.mxu1 %v4179_v17  ;;  %v4189_v17 = vld [vmem:[#allocation4_spill] sm:$0xff] }
 0x18e   :  { %954 = vmatprep.subr.mxu0 %v4180_v58  ;;  %1025 = vmatprep.subr.mxu1 %v4181_v63  ;;  %v4190_v58 = vld [vmem:[#allocation17_spill] sm:$0xff] }
 0x18f   :  { %955 = vmatpush1.msra.mxu0 %v4182_v15  ;;  %1026 = vmatpush1.msra.mxu1 %v4183_v16 }
 0x190   :  { %956 = vmatprep.subr.mxu0 %v4184_v55  ;;  %1027 = vmatprep.subr.mxu1 %v4185_v33 }
 0x191   :  { %957 = vmatpush1.msra.mxu0 %v4186_v52  ;;  %990 = vmatprep.mubr.f32.mxu0 %v4187_v3 }
 0x192   :  { %1028 = vmatpush1.msra.mxu1 %v4188_v27  ;;  %1061 = vmatprep.mubr.f32.mxu1 %v4187_v3  ;;  %v719_v27 = vld [vmem:[#allocation2 + $0x1] ss:$8 sm:$0xf] }
 0x193   :  { %1132 = vmatprep.subr.mxu0 %v4189_v17  ;;  %1203 = vmatprep.subr.mxu1 %v4190_v58 }
 0x232   :  { %v786_v63 = vpop.f32.mrf.mxu0  ;;  %v857_v15 = vpop.f32.mrf.mxu1 }
 0x234   :  { %v788_v30 = vpop.f32.mrf.mxu0  ;;  %v859_v16 = vpop.f32.mrf.mxu1 }
 0x235   :  { %v866_v24 = vcombine.low %v786_v63, %v788_v30  ;;  %v867_v55 = vcombine.low %v857_v15, %v859_v16 }
 0x237   :  { %v874_v33 = vrot.slane %v866_v24, %v3181_v60  ;;  %v881_v52 = vrot.slane %v867_v55, %v3181_v60 }
 0x239   :  { %v882_v20 = vcombine.low %v874_v33, %v881_v52 }
 0x23b   :  { %v889_v9 = vrot.slane %v882_v20, %v3181_v60 }
 0x23d   :  { %v891_v13 = vadd.f32 %v889_v9, %v719_v27 }
 0x23f   :  { %v2283_v3 = vmul.f32 -1.442695, %v891_v13  ;;  %v899_v61 = vrot.slane %v891_v13, 1  ;;  %v910_v58 = vrot.slane %v891_v13, 3  ;;  %v907_v46 = vrot.slane %v891_v13, 2 }
 0x241   :  { %2379 = vpow2.f32 %v2283_v3  ;;  %v2284_v17 = vmul.f32 -1.442695, %v899_v61  ;;  %v2285_v12 = vmul.f32 -1.442695, %v910_v58 }
 0x243   :  { %2381 = vpow2.f32 %v2284_v17 }
 0x244   :  { %2383 = vpow2.f32 %v2285_v12 }
 0x24e   :  { %v2380_v11 = vpop.eup %2379 }
 0x24f   :  { %v895_v30 = vadd.f32 1.0, %v2380_v11 }
 0x250   :  { %v2382_v63 = vpop.eup %2381 }
 0x251   :  { %2385 = vrcp.f32 %v895_v30  ;;  %v904_v24 = vadd.f32 1.0, %v2382_v63  ;;  %v2384_v15 = vpop.eup %2383 }
 0x252   :  { %2387 = vtanh.f32 %v907_v46  ;;  %v915_v27 = vadd.f32 1.0, %v2384_v15 }
 0x253   :  { %2389 = vrcp.f32 %v904_v24 }
 0x254   :  { %2391 = vrcp.f32 %v915_v27 }
 0x25e   :  { %v2386_v20 = vpop.eup %2385 }
 0x25f   :  { %v2388_v16 = vpop.eup %2387 }
 0x260   :  { %v2390_v9 = vpop.eup %2389  ;;  %v919_v61 = vmul.f32 %v2388_v16, %v2386_v20  ;;  %v925_v20 = vld [vmem:[#allocation2 + $0x2] ss:$8 sm:$0xf] }
 0x261   :  { %v918_v55 = vmul.f32 %v2390_v9, %v3186_v14  ;;  %v2392_v11 = vpop.eup %2391  ;;  %v4210_v14 = vld [vmem:[#allocation30_spill] sm:$0xff] }
 0x263   :  { %v3259_v33 = vadd.f32 %v919_v61, %v918_v55 }
 0x265   :  { %2393 = vtanh.f32 %v3259_v33 }
 0x272   :  { %v2394_v13 = vpop.eup %2393 }
 0x273   :  { %v922_v12 = vmul.f32 %v2394_v13, %v2392_v11 }
 0x275   :  { %923 = vst [vmem:[#allocation2 + $0x1] sm:$0x1] %v922_v12  ;;  %991 = vmatmul.mubr.f32.vlgmr.msra.gmra.mxu0 %v922_v12  ;;  %1062 = vmatmul.mubr.f32.vlgmr.msra.gmra.mxu1 %v922_v12 }
 0x276   :  { %1133 = vmatpush1.msra.mxu0 %v2666_v18  ;;  %1204 = vmatpush1.msra.mxu1 %v2956_v36  ;;  %v4191_v18 = vld [vmem:[#allocation21_spill] sm:$0xff] }
 0x277   :  { %1134 = vmatprep.subr.mxu0 %v2672_v19  ;;  %1205 = vmatprep.subr.mxu1 %v2962_v39  ;;  %v4192_v19 = vld [vmem:[#allocation8_spill] sm:$0xff] }
 0x278   :  { %1135 = vmatpush1.msra.mxu0 %v2679_v21  ;;  %1206 = vmatpush1.msra.mxu1 %v2968_v41  ;;  %v4193_v21 = vld [vmem:[#allocation22_spill] sm:$0xff] }
 0x279   :  { %1136 = vmatprep.subr.mxu0 %v2684_v22  ;;  %1207 = vmatprep.subr.mxu1 %v2975_v44  ;;  %v4194_v22 = vld [vmem:[#allocation9_spill] sm:$0xff] }
 0x27a   :  { %1137 = vmatpush1.msra.mxu0 %v2690_v23  ;;  %1208 = vmatpush1.msra.mxu1 %v2982_v47  ;;  %v4195_v23 = vld [vmem:[#allocation23_spill] sm:$0xff] }
 0x27b   :  { %1138 = vmatprep.subr.mxu0 %v2696_v25  ;;  %1209 = vmatprep.subr.mxu1 %v2988_v50  ;;  %v4196_v25 = vld [vmem:[#allocation10_spill] sm:$0xff] }
 0x27c   :  { %1139 = vmatpush1.msra.mxu0 %v2702_v26  ;;  %1210 = vmatpush1.msra.mxu1 %v2994_v53  ;;  %v4197_v26 = vld [vmem:[#allocation24_spill] sm:$0xff] }
 0x27d   :  { %1140 = vmatprep.subr.mxu0 %v2708_v28  ;;  %1211 = vmatprep.subr.mxu1 %v3000_v56  ;;  %v4198_v28 = vld [vmem:[#allocation11_spill] sm:$0xff] }
 0x27e   :  { %1141 = vmatpush1.msra.mxu0 %v2714_v29  ;;  %1212 = vmatpush1.msra.mxu1 %v3006_v59  ;;  %v4199_v29 = vld [vmem:[#allocation25_spill] sm:$0xff] }
 0x27f   :  { %1142 = vmatprep.subr.mxu0 %v2720_v31  ;;  %1213 = vmatprep.subr.mxu1 %v3012_v62  ;;  %v4200_v31 = vld [vmem:[#allocation12_spill] sm:$0xff] }
 0x280   :  { %1143 = vmatpush1.msra.mxu0 %v2726_v32  ;;  %1214 = vmatpush1.msra.mxu1 %v3018_v0  ;;  %v4201_v32 = vld [vmem:[#allocation26_spill] sm:$0xff] }
 0x281   :  { %1144 = vmatprep.subr.mxu0 %v2734_v34  ;;  %1215 = vmatprep.subr.mxu1 %v3024_v1  ;;  %v4202_v34 = vld [vmem:[#allocation13_spill] sm:$0xff] }
 0x282   :  { %1145 = vmatpush1.msra.mxu0 %v2740_v35  ;;  %1216 = vmatpush1.msra.mxu1 %v3030_v2  ;;  %v4203_v35 = vld [vmem:[#allocation27_spill] sm:$0xff] }
 0x283   :  { %1146 = vmatprep.subr.mxu0 %v2748_v37  ;;  %1217 = vmatprep.subr.mxu1 %v3036_v4  ;;  %v4204_v37 = vld [vmem:[#allocation14_spill] sm:$0xff] }
 0x284   :  { %1147 = vmatpush1.msra.mxu0 %v2754_v38  ;;  %1218 = vmatpush1.msra.mxu1 %v3042_v5  ;;  %v4205_v38 = vld [vmem:[#allocation28_spill] sm:$0xff] }
 0x285   :  { %1148 = vmatprep.subr.mxu0 %v2761_v40  ;;  %1219 = vmatprep.subr.mxu1 %v3048_v6  ;;  %v4206_v40 = vld [vmem:[#allocation15_spill] sm:$0xff] }
 0x286   :  { %1149 = vmatpush1.msra.mxu0 %v2767_v42  ;;  %1220 = vmatpush1.msra.mxu1 %v3054_v7  ;;  %v4207_v42 = vld [vmem:[#allocation29_spill] sm:$0xff] }
 0x287   :  { %1150 = vmatprep.subr.mxu0 %v2773_v43  ;;  %1221 = vmatprep.subr.mxu1 %v3060_v8  ;;  %v4208_v43 = vld [vmem:[#allocation16_spill] sm:$0xff] }
 0x288   :  { %1151 = vmatpush1.msra.mxu0 %v2779_v45  ;;  %1222 = vmatpush1.msra.mxu1 %v4163_v51  ;;  %v4209_v45 = vmov 0.0  }
 0x289   :  { %1152 = vmatprep.subr.mxu0 %v4164_v54  ;;  %1223 = vmatprep.subr.mxu1 %v4165_v48  ;;  %v3329_v54 = vld [vmem:[%s4022_s6 + $0x1e8] sm:$0xff] }
 0x28a   :  { %1153 = vmatpush1.msra.mxu0 %v4166_v49  ;;  %1224 = vmatpush1.msra.mxu1 %v4167_v57  ;;  %4211 = vst [vmem:[#allocation18_spill] sm:$0xff] %v3329_v54  ;;  %v4212_v49 = vld [vmem:[#allocation17_spill] sm:$0xff] }
 0x28b   :  { %1154 = vmatprep.subr.mxu0 %v4168_v10  ;;  %1225 = vmatprep.subr.mxu1 %v4191_v18 }
 0x28c   :  { %1155 = vmatpush1.msra.mxu0 %v4192_v19  ;;  %1226 = vmatpush1.msra.mxu1 %v4193_v21 }
 0x28d   :  { %1156 = vmatprep.subr.mxu0 %v4194_v22  ;;  %1227 = vmatprep.subr.mxu1 %v4195_v23 }
 0x28e   :  { %1157 = vmatpush1.msra.mxu0 %v4196_v25  ;;  %1228 = vmatpush1.msra.mxu1 %v4197_v26 }
 0x28f   :  { %1158 = vmatprep.subr.mxu0 %v4198_v28  ;;  %1229 = vmatprep.subr.mxu1 %v4199_v29 }
 0x290   :  { %1159 = vmatpush1.msra.mxu0 %v4200_v31  ;;  %1230 = vmatpush1.msra.mxu1 %v4201_v32 }
 0x291   :  { %1160 = vmatprep.subr.mxu0 %v4202_v34  ;;  %1231 = vmatprep.subr.mxu1 %v4203_v35 }
 0x292   :  { %1161 = vmatpush1.msra.mxu0 %v4204_v37  ;;  %1232 = vmatpush1.msra.mxu1 %v4205_v38 }
 0x293   :  { %1162 = vmatprep.subr.mxu0 %v4206_v40  ;;  %1233 = vmatprep.subr.mxu1 %v4207_v42 }
 0x294   :  { %1163 = vmatpush1.msra.mxu0 %v4208_v43  ;;  %1196 = vmatprep.mubr.f32.mxu0 %v4209_v45 }
 0x295   :  { %1234 = vmatpush1.msra.mxu1 %v4210_v14  ;;  %1267 = vmatprep.mubr.f32.mxu1 %v4209_v45 }
 0x296   :  { %1338 = vmatprep.subr.mxu0 %v3329_v54  ;;  %1409 = vmatprep.subr.mxu1 %v4212_v49 }
 0x335   :  { %v992_v10 = vpop.f32.mrf.mxu0  ;;  %v1063_v46 = vpop.f32.mrf.mxu1 }
 0x337   :  { %v994_v58 = vpop.f32.mrf.mxu0  ;;  %v1065_v52 = vpop.f32.mrf.mxu1 }
 0x338   :  { %v1072_v3 = vcombine.low %v992_v10, %v994_v58  ;;  %v1073_v17 = vcombine.low %v1063_v46, %v1065_v52 }
 0x33a   :  { %v1080_v30 = vrot.slane %v1072_v3, %v3181_v60  ;;  %v1087_v63 = vrot.slane %v1073_v17, %v3181_v60  ;;  %v3343_v17 = vld [vmem:[%s4022_s6 + $0x1e0] sm:$0xff] }
 0x33c   :  { %v1088_v24 = vcombine.low %v1080_v30, %v1087_v63  ;;  %v3357_v30 = vld [vmem:[%s4022_s6 + $0x1c0] sm:$0xff] }
 0x33d   :  { %v3385_v63 = vld [vmem:[%s4022_s6 + $0x180] sm:$0xff] }
 0x33e   :  { %v1095_v15 = vrot.slane %v1088_v24, %v3181_v60  ;;  %v3392_v24 = vld [vmem:[%s4022_s6 + $0x168] sm:$0xff] }
 0x340   :  { %v1097_v16 = vadd.f32 %v1095_v15, %v925_v20  ;;  %v3399_v15 = vld [vmem:[%s4022_s6 + $0x160] sm:$0xff]  ;;  %v3406_v20 = vld [vmem:[%s4022_s6 + $0x148] sm:$0xff] }
 0x342   :  { %v2286_v9 = vmul.f32 -1.442695, %v1097_v16  ;;  %v1105_v27 = vrot.slane %v1097_v16, 1  ;;  %v1116_v61 = vrot.slane %v1097_v16, 3  ;;  %v1113_v12 = vrot.slane %v1097_v16, 2  ;;  %v3413_v16 = vld [vmem:[%s4022_s6 + $0x140] sm:$0xff] }
 0x344   :  { %2395 = vpow2.f32 %v2286_v9  ;;  %v2287_v55 = vmul.f32 -1.442695, %v1105_v27  ;;  %v2288_v11 = vmul.f32 -1.442695, %v1116_v61  ;;  %v3420_v9 = vld [vmem:[%s4022_s6 + $0x128] sm:$0xff]  ;;  %v3427_v27 = vld [vmem:[%s4022_s6 + $0x120] sm:$0xff] }
 0x345   :  { %v3441_v61 = vld [vmem:[%s4022_s6 + $0x100] sm:$0xff] }
 0x346   :  { %2397 = vpow2.f32 %v2287_v55  ;;  %v3434_v55 = vld [vmem:[%s4022_s6 + $0x108] sm:$0xff] }
 0x347   :  { %2399 = vpow2.f32 %v2288_v11  ;;  %v3448_v11 = vld [vmem:[%s4022_s6 + $0xe8] sm:$0xff] }
 0x351   :  { %v2396_v13 = vpop.eup %2395 }
 0x352   :  { %v1101_v19 = vadd.f32 1.0, %v2396_v13  ;;  %v3455_v13 = vld [vmem:[%s4022_s6 + $0xe0] sm:$0xff] }
 0x353   :  { %v2398_v22 = vpop.eup %2397 }
 0x354   :  { %2401 = vrcp.f32 %v1101_v19  ;;  %v1110_v25 = vadd.f32 1.0, %v2398_v22  ;;  %v2400_v28 = vpop.eup %2399  ;;  %v3469_v19 = vld [vmem:[%s4022_s6 + $0xc0] sm:$0xff]  ;;  %v3476_v22 = vld [vmem:[%s4022_s6 + $0xa8] sm:$0xff] }
 0x355   :  { %2403 = vtanh.f32 %v1113_v12  ;;  %v1121_v40 = vadd.f32 1.0, %v2400_v28  ;;  %v3462_v12 = vld [vmem:[%s4022_s6 + $0xc8] sm:$0xff] }
 0x356   :  { %2405 = vrcp.f32 %v1110_v25  ;;  %v3483_v25 = vld [vmem:[%s4022_s6 + $0xa0] sm:$0xff]  ;;  %v3490_v28 = vld [vmem:[%s4022_s6 + $0x88] sm:$0xff] }
 0x357   :  { %2407 = vrcp.f32 %v1121_v40  ;;  %v3518_v40 = vld [vmem:[%s4022_s6 + $0x48] sm:$0xff] }
 0x358   :  { %4216 = vst [vmem:[#allocation20_spill] sm:$0xff] %v3518_v40 }
 0x361   :  { %v2402_v31 = vpop.eup %2401 }
 0x362   :  { %v2404_v34 = vpop.eup %2403 }
 0x363   :  { %v2406_v37 = vpop.eup %2405  ;;  %v1125_v10 = vmul.f32 %v2404_v34, %v2402_v31  ;;  %v3497_v31 = vld [vmem:[%s4022_s6 + $0x80] sm:$0xff]  ;;  %v3504_v34 = vld [vmem:[%s4022_s6 + $0x68] sm:$0xff] }
 0x364   :  { %v1124_v43 = vmul.f32 %v2406_v37, %v3259_v33  ;;  %v2408_v58 = vpop.eup %2407  ;;  %v3350_v33 = vld [vmem:[%s4022_s6 + $0x1c8] sm:$0xff]  ;;  %4213 = vst [vmem:[#allocation5_spill] sm:$0xff] %v3497_v31  ;;  %4214 = vst [vmem:[#allocation19_spill] sm:$0xff] %v3504_v34  ;;  %v3511_v37 = vld [vmem:[%s4022_s6 + $0x60] sm:$0xff] }
 0x365   :  { %4215 = vst [vmem:[#allocation6_spill] sm:$0xff] %v3511_v37 }
 0x366   :  { %v3337_v46 = vadd.f32 %v1125_v10, %v1124_v43  ;;  %v3525_v43 = vld [vmem:[%s4022_s6 + $0x40] sm:$0xff]  ;;  %v3532_v10 = vld [vmem:[%s4022_s6 + $0x28] sm:$0xff] }
 0x367   :  { %4217 = vst [vmem:[#allocation7_spill] sm:$0xff] %v3525_v43  ;;  %4218 = vst [vmem:[#allocation4_spill] sm:$0xff] %v3532_v10 }
 0x368   :  { %2409 = vtanh.f32 %v3337_v46 }
 0x375   :  { %v2410_v52 = vpop.eup %2409 }
 0x376   :  { %v1128_v3 = vmul.f32 %v2410_v52, %v2408_v58  ;;  %v3539_v58 = vld [vmem:[%s4022_s6 + $0x20] sm:$0xff]  ;;  %v3546_v52 = vld [vmem:[%s4022_s6 + $0x8] sm:$0xff] }
 0x377   :  { %4219 = vst [vmem:[#allocation21_spill] sm:$0xff] %v3539_v58  ;;  %4220 = vst [vmem:[#allocation8_spill] sm:$0xff] %v3546_v52 }
 0x378   :  { %1129 = vst [vmem:[#allocation2 + $0x2] sm:$0x1] %v1128_v3  ;;  %1197 = vmatmul.mubr.f32.vlgmr.msra.gmra.mxu0 %v1128_v3  ;;  %1268 = vmatmul.mubr.f32.vlgmr.msra.gmra.mxu1 %v1128_v3  ;;  %v3553_v3 = vld [vmem:[%s4022_s6] sm:$0xff] }
 0x379   :  { %1339 = vmatpush1.msra.mxu0 %v3343_v17  ;;  %1410 = vmatpush1.msra.mxu1 %v2956_v36  ;;  %v3364_v36 = vld [vmem:[%s4022_s6 + $0x1a8] sm:$0xff]  ;;  %4221 = vst [vmem:[#allocation22_spill] sm:$0xff] %v3553_v3 }
 0x37a   :  { %1340 = vmatprep.subr.mxu0 %v3350_v33  ;;  %1411 = vmatprep.subr.mxu1 %v2962_v39  ;;  %v3371_v39 = vld [vmem:[%s4022_s6 + $0x1a0] sm:$0xff] }
 0x37b   :  { %1341 = vmatpush1.msra.mxu0 %v3357_v30  ;;  %1412 = vmatpush1.msra.mxu1 %v2968_v41  ;;  %v3378_v41 = vld [vmem:[%s4022_s6 + $0x188] sm:$0xff] }
 0x37c   :  { %1342 = vmatprep.subr.mxu0 %v3364_v36  ;;  %1413 = vmatprep.subr.mxu1 %v2975_v44 }
 0x37d   :  { %1343 = vmatpush1.msra.mxu0 %v3371_v39  ;;  %1414 = vmatpush1.msra.mxu1 %v2982_v47 }
 0x37e   :  { %1344 = vmatprep.subr.mxu0 %v3378_v41  ;;  %1415 = vmatprep.subr.mxu1 %v2988_v50 }
 0x37f   :  { %1345 = vmatpush1.msra.mxu0 %v3385_v63  ;;  %1416 = vmatpush1.msra.mxu1 %v2994_v53 }
 0x380   :  { %1346 = vmatprep.subr.mxu0 %v3392_v24  ;;  %1417 = vmatprep.subr.mxu1 %v3000_v56 }
 0x381   :  { %1347 = vmatpush1.msra.mxu0 %v3399_v15  ;;  %1418 = vmatpush1.msra.mxu1 %v3006_v59 }
 0x382   :  { %1348 = vmatprep.subr.mxu0 %v3406_v20  ;;  %1419 = vmatprep.subr.mxu1 %v3012_v62 }
 0x383   :  { %1349 = vmatpush1.msra.mxu0 %v3413_v16  ;;  %1420 = vmatpush1.msra.mxu1 %v3018_v0 }
 0x384   :  { %1350 = vmatprep.subr.mxu0 %v3420_v9  ;;  %1421 = vmatprep.subr.mxu1 %v3024_v1 }
 0x385   :  { %1351 = vmatpush1.msra.mxu0 %v3427_v27  ;;  %1422 = vmatpush1.msra.mxu1 %v3030_v2 }
 0x386   :  { %1352 = vmatprep.subr.mxu0 %v3434_v55  ;;  %1423 = vmatprep.subr.mxu1 %v3036_v4 }
 0x387   :  { %1353 = vmatpush1.msra.mxu0 %v3441_v61  ;;  %1424 = vmatpush1.msra.mxu1 %v3042_v5 }
 0x388   :  { %1354 = vmatprep.subr.mxu0 %v3448_v11  ;;  %1425 = vmatprep.subr.mxu1 %v3048_v6 }
 0x389   :  { %1355 = vmatpush1.msra.mxu0 %v3455_v13  ;;  %1426 = vmatpush1.msra.mxu1 %v3054_v7 }
 0x38a   :  { %1356 = vmatprep.subr.mxu0 %v3462_v12  ;;  %1427 = vmatprep.subr.mxu1 %v3060_v8 }
 0x38b   :  { %1357 = vmatpush1.msra.mxu0 %v3469_v19  ;;  %1428 = vmatpush1.msra.mxu1 %v4163_v51 }
 0x38c   :  { %1358 = vmatprep.subr.mxu0 %v3476_v22  ;;  %1429 = vmatprep.subr.mxu1 %v4165_v48 }
 0x38d   :  { %1359 = vmatpush1.msra.mxu0 %v3483_v25  ;;  %1430 = vmatpush1.msra.mxu1 %v4167_v57 }
 0x38e   :  { %1360 = vmatprep.subr.mxu0 %v3490_v28  ;;  %1431 = vmatprep.subr.mxu1 %v4191_v18 }
 0x38f   :  { %1361 = vmatpush1.msra.mxu0 %v3497_v31  ;;  %1432 = vmatpush1.msra.mxu1 %v4193_v21 }
 0x390   :  { %1362 = vmatprep.subr.mxu0 %v3504_v34  ;;  %1433 = vmatprep.subr.mxu1 %v4195_v23 }
 0x391   :  { %1363 = vmatpush1.msra.mxu0 %v3511_v37  ;;  %1434 = vmatpush1.msra.mxu1 %v4197_v26 }
 0x392   :  { %1364 = vmatprep.subr.mxu0 %v3518_v40  ;;  %1435 = vmatprep.subr.mxu1 %v4199_v29 }
 0x393   :  { %1365 = vmatpush1.msra.mxu0 %v3525_v43  ;;  %1436 = vmatpush1.msra.mxu1 %v4201_v32 }
 0x394   :  { %1366 = vmatprep.subr.mxu0 %v3532_v10  ;;  %1437 = vmatprep.subr.mxu1 %v4203_v35 }
 0x395   :  { %1367 = vmatpush1.msra.mxu0 %v3539_v58  ;;  %1438 = vmatpush1.msra.mxu1 %v4205_v38 }
 0x396   :  { %1368 = vmatprep.subr.mxu0 %v3546_v52  ;;  %1439 = vmatprep.subr.mxu1 %v4207_v42 }
 0x397   :  { %1369 = vmatpush1.msra.mxu0 %v3553_v3  ;;  %1402 = vmatprep.mubr.f32.mxu0 %v4209_v45 }
 0x398   :  { %1440 = vmatpush1.msra.mxu1 %v4210_v14  ;;  %1473 = vmatprep.mubr.f32.mxu1 %v4209_v45  ;;  %v1131_v14 = vld [vmem:[#allocation2 + $0x3] ss:$8 sm:$0xf] }
 0x399   :  { %1544 = vmatprep.subr.mxu0 %v3329_v54  ;;  %1615 = vmatprep.subr.mxu1 %v4212_v49 }
 0x438   :  { %v1198_v52 = vpop.f32.mrf.mxu0  ;;  %v1269_v38 = vpop.f32.mrf.mxu1 }
 0x43a   :  { %v1200_v42 = vpop.f32.mrf.mxu0  ;;  %v1271_v58 = vpop.f32.mrf.mxu1 }
 0x43b   :  { %v1278_v35 = vcombine.low %v1198_v52, %v1200_v42  ;;  %v1279_v10 = vcombine.low %v1269_v38, %v1271_v58  ;;  %v3586_v58 = vld [vmem:[%s4022_s6 + $0x1d0] sm:$0xff] }
 0x43d   :  { %v1286_v32 = vrot.slane %v1278_v35, %v3181_v60  ;;  %v1293_v3 = vrot.slane %v1279_v10, %v3181_v60 }
 0x43f   :  { %v1294_v43 = vcombine.low %v1286_v32, %v1293_v3 }
 0x441   :  { %v1301_v29 = vrot.slane %v1294_v43, %v3181_v60 }
 0x443   :  { %v1303_v40 = vadd.f32 %v1301_v29, %v1131_v14 }
 0x445   :  { %v2289_v45 = vmul.f32 -1.442695, %v1303_v40  ;;  %v1311_v26 = vrot.slane %v1303_v40, 1  ;;  %v1322_v49 = vrot.slane %v1303_v40, 3  ;;  %v1319_v34 = vrot.slane %v1303_v40, 2 }
 0x447   :  { %2411 = vpow2.f32 %v2289_v45  ;;  %v2290_v54 = vmul.f32 -1.442695, %v1311_v26  ;;  %v2291_v37 = vmul.f32 -1.442695, %v1322_v49 }
 0x449   :  { %2413 = vpow2.f32 %v2290_v54 }
 0x44a   :  { %2415 = vpow2.f32 %v2291_v37 }
 0x454   :  { %v2412_v23 = vpop.eup %2411 }
 0x455   :  { %v1307_v42 = vadd.f32 1.0, %v2412_v23 }
 0x456   :  { %v2414_v38 = vpop.eup %2413 }
 0x457   :  { %2417 = vrcp.f32 %v1307_v42  ;;  %v1316_v35 = vadd.f32 1.0, %v2414_v38  ;;  %v2416_v32 = vpop.eup %2415 }
 0x458   :  { %2419 = vtanh.f32 %v1319_v34  ;;  %v1327_v14 = vadd.f32 1.0, %v2416_v32  ;;  %v3572_v34 = vld [vmem:[%s4022_s6 + $0x1f0] sm:$0xff] }
 0x459   :  { %2421 = vrcp.f32 %v1316_v35 }
 0x45a   :  { %2423 = vrcp.f32 %v1327_v14 }
 0x464   :  { %v2418_v43 = vpop.eup %2417 }
 0x465   :  { %v2420_v10 = vpop.eup %2419 }
 0x466   :  { %v2422_v29 = vpop.eup %2421  ;;  %v1331_v26 = vmul.f32 %v2420_v10, %v2418_v43 }
 0x467   :  { %v1330_v45 = vmul.f32 %v2422_v29, %v3337_v46  ;;  %v2424_v23 = vpop.eup %2423  ;;  %v3579_v46 = vld [vmem:[%s4022_s6 + $0x1d8] sm:$0xff] }
 0x468   :  { %v1337_v29 = vld [vmem:[#allocation2 + $0x4] ss:$8 sm:$0xf] }
 0x469   :  { %v3565_v54 = vadd.f32 %v1331_v26, %v1330_v45 }
 0x46b   :  { %2425 = vtanh.f32 %v3565_v54 }
 0x478   :  { %v2426_v40 = vpop.eup %2425 }
 0x479   :  { %v1334_v37 = vmul.f32 %v2426_v40, %v2424_v23 }
 0x47b   :  { %1335 = vst [vmem:[#allocation2 + $0x3] sm:$0x1] %v1334_v37  ;;  %1403 = vmatmul.mubr.f32.vlgmr.msra.gmra.mxu0 %v1334_v37  ;;  %1474 = vmatmul.mubr.f32.vlgmr.msra.gmra.mxu1 %v1334_v37 }
 0x47c   :  { %1545 = vmatpush1.msra.mxu0 %v3343_v17  ;;  %1616 = vmatpush1.msra.mxu1 %v3572_v34 }
 0x47d   :  { %1546 = vmatprep.subr.mxu0 %v3350_v33  ;;  %1617 = vmatprep.subr.mxu1 %v3579_v46 }
 0x47e   :  { %1547 = vmatpush1.msra.mxu0 %v3357_v30  ;;  %1618 = vmatpush1.msra.mxu1 %v3586_v58 }
 0x47f   :  { %1548 = vmatprep.subr.mxu0 %v3364_v36  ;;  %1619 = vmatprep.subr.mxu1 %v2975_v44  ;;  %v4222_v44 = vld [vmem:[#allocation19_spill] sm:$0xff] }
 0x480   :  { %1549 = vmatpush1.msra.mxu0 %v3371_v39  ;;  %1620 = vmatpush1.msra.mxu1 %v2982_v47  ;;  %v4223_v47 = vld [vmem:[#allocation23_spill] sm:$0xff] }
 0x481   :  { %1550 = vmatprep.subr.mxu0 %v3378_v41  ;;  %1621 = vmatprep.subr.mxu1 %v2988_v50  ;;  %v4224_v50 = vld [vmem:[#allocation6_spill] sm:$0xff] }
 0x482   :  { %1551 = vmatpush1.msra.mxu0 %v3385_v63  ;;  %1622 = vmatpush1.msra.mxu1 %v2994_v53  ;;  %v4225_v53 = vld [vmem:[#allocation24_spill] sm:$0xff] }
 0x483   :  { %1552 = vmatprep.subr.mxu0 %v3392_v24  ;;  %1623 = vmatprep.subr.mxu1 %v3000_v56  ;;  %v4226_v56 = vld [vmem:[#allocation20_spill] sm:$0xff] }
 0x484   :  { %1553 = vmatpush1.msra.mxu0 %v3399_v15  ;;  %1624 = vmatpush1.msra.mxu1 %v3006_v59  ;;  %v4227_v59 = vld [vmem:[#allocation25_spill] sm:$0xff] }
 0x485   :  { %1554 = vmatprep.subr.mxu0 %v3406_v20  ;;  %1625 = vmatprep.subr.mxu1 %v3012_v62  ;;  %v4228_v62 = vld [vmem:[#allocation7_spill] sm:$0xff] }
 0x486   :  { %1555 = vmatpush1.msra.mxu0 %v3413_v16  ;;  %1626 = vmatpush1.msra.mxu1 %v3018_v0  ;;  %v4229_v0 = vld [vmem:[#allocation26_spill] sm:$0xff] }
 0x487   :  { %1556 = vmatprep.subr.mxu0 %v3420_v9  ;;  %1627 = vmatprep.subr.mxu1 %v3024_v1  ;;  %v4230_v1 = vld [vmem:[#allocation4_spill] sm:$0xff] }
 0x488   :  { %1557 = vmatpush1.msra.mxu0 %v3427_v27  ;;  %1628 = vmatpush1.msra.mxu1 %v3030_v2  ;;  %v4231_v2 = vld [vmem:[#allocation27_spill] sm:$0xff] }
 0x489   :  { %1558 = vmatprep.subr.mxu0 %v3434_v55  ;;  %1629 = vmatprep.subr.mxu1 %v3036_v4  ;;  %v4232_v4 = vld [vmem:[#allocation21_spill] sm:$0xff] }
 0x48a   :  { %1559 = vmatpush1.msra.mxu0 %v3441_v61  ;;  %1630 = vmatpush1.msra.mxu1 %v3042_v5  ;;  %v4233_v5 = vld [vmem:[#allocation28_spill] sm:$0xff] }
 0x48b   :  { %1560 = vmatprep.subr.mxu0 %v3448_v11  ;;  %1631 = vmatprep.subr.mxu1 %v3048_v6  ;;  %v4234_v6 = vld [vmem:[#allocation8_spill] sm:$0xff] }
 0x48c   :  { %1561 = vmatpush1.msra.mxu0 %v3455_v13  ;;  %1632 = vmatpush1.msra.mxu1 %v3054_v7  ;;  %v4235_v7 = vld [vmem:[#allocation29_spill] sm:$0xff] }
 0x48d   :  { %1562 = vmatprep.subr.mxu0 %v3462_v12  ;;  %1633 = vmatprep.subr.mxu1 %v3060_v8  ;;  %v4236_v8 = vld [vmem:[#allocation22_spill] sm:$0xff] }
 0x48e   :  { %1563 = vmatpush1.msra.mxu0 %v3469_v19  ;;  %1634 = vmatpush1.msra.mxu1 %v4163_v51  ;;  %v4237_v51 = vmov 0.0  }
 0x48f   :  { %1564 = vmatprep.subr.mxu0 %v3476_v22  ;;  %1635 = vmatprep.subr.mxu1 %v4165_v48  ;;  %v4238_v48 = vld [vmem:[#allocation30_spill] sm:$0xff] }
 0x490   :  { %1565 = vmatpush1.msra.mxu0 %v3483_v25  ;;  %1636 = vmatpush1.msra.mxu1 %v4167_v57  ;;  %v4239_v57 = vld [vmem:[#allocation18_spill] sm:$0xff] }
 0x491   :  { %1566 = vmatprep.subr.mxu0 %v3490_v28  ;;  %1637 = vmatprep.subr.mxu1 %v4191_v18  ;;  %v3651_v18 = vld [vmem:[%s4022_s6 + $0x1f8] sm:$0xff] }
 0x492   :  { %1567 = vmatpush1.msra.mxu0 %v3497_v31  ;;  %1638 = vmatpush1.msra.mxu1 %v4193_v21 }
 0x493   :  { %1568 = vmatprep.subr.mxu0 %v4222_v44  ;;  %1639 = vmatprep.subr.mxu1 %v4223_v47 }
 0x494   :  { %1569 = vmatpush1.msra.mxu0 %v4224_v50  ;;  %1640 = vmatpush1.msra.mxu1 %v4225_v53 }
 0x495   :  { %1570 = vmatprep.subr.mxu0 %v4226_v56  ;;  %1641 = vmatprep.subr.mxu1 %v4227_v59 }
 0x496   :  { %1571 = vmatpush1.msra.mxu0 %v4228_v62  ;;  %1642 = vmatpush1.msra.mxu1 %v4229_v0 }
 0x497   :  { %1572 = vmatprep.subr.mxu0 %v4230_v1  ;;  %1643 = vmatprep.subr.mxu1 %v4231_v2 }
 0x498   :  { %1573 = vmatpush1.msra.mxu0 %v4232_v4  ;;  %1644 = vmatpush1.msra.mxu1 %v4233_v5 }
 0x499   :  { %1574 = vmatprep.subr.mxu0 %v4234_v6  ;;  %1645 = vmatprep.subr.mxu1 %v4235_v7 }
 0x49a   :  { %1575 = vmatpush1.msra.mxu0 %v4236_v8  ;;  %1608 = vmatprep.mubr.f32.mxu0 %v4237_v51 }
 0x49b   :  { %1646 = vmatpush1.msra.mxu1 %v4238_v48  ;;  %1679 = vmatprep.mubr.f32.mxu1 %v4237_v51 }
 0x49c   :  { %1750 = vmatprep.subr.mxu0 %v4239_v57  ;;  %1821 = vmatprep.subr.mxu1 %v3651_v18 }
 0x53b   :  { %v1404_v21 = vpop.f32.mrf.mxu0  ;;  %v1475_v52 = vpop.f32.mrf.mxu1 }
 0x53d   :  { %v1406_v3 = vpop.f32.mrf.mxu0  ;;  %v1477_v49 = vpop.f32.mrf.mxu1 }
 0x53e   :  { %v1484_v42 = vcombine.low %v1404_v21, %v1406_v3  ;;  %v1485_v38 = vcombine.low %v1475_v52, %v1477_v49 }
 0x540   :  { %v1492_v35 = vrot.slane %v1484_v42, %v3181_v60  ;;  %v1499_v32 = vrot.slane %v1485_v38, %v3181_v60 }
 0x542   :  { %v1500_v43 = vcombine.low %v1492_v35, %v1499_v32 }
 0x544   :  { %v1507_v10 = vrot.slane %v1500_v43, %v3181_v60  ;;  %v3678_v43 = vld [vmem:[%s4022_s6 + $0x1b0] sm:$0xff] }
 0x546   :  { %v1509_v14 = vadd.f32 %v1507_v10, %v1337_v29  ;;  %v3685_v10 = vld [vmem:[%s4022_s6 + $0x198] sm:$0xff]  ;;  %v3692_v29 = vld [vmem:[%s4022_s6 + $0x190] sm:$0xff] }
 0x548   :  { %v2292_v45 = vmul.f32 -1.442695, %v1509_v14  ;;  %v1517_v26 = vrot.slane %v1509_v14, 1  ;;  %v1528_v40 = vrot.slane %v1509_v14, 3  ;;  %v1525_v53 = vrot.slane %v1509_v14, 2  ;;  %v3699_v14 = vld [vmem:[%s4022_s6 + $0x178] sm:$0xff] }
 0x54a   :  { %2427 = vpow2.f32 %v2292_v45  ;;  %v2293_v23 = vmul.f32 -1.442695, %v1517_v26  ;;  %v2294_v37 = vmul.f32 -1.442695, %v1528_v40  ;;  %v3706_v45 = vld [vmem:[%s4022_s6 + $0x170] sm:$0xff]  ;;  %v3713_v26 = vld [vmem:[%s4022_s6 + $0x158] sm:$0xff] }
 0x54b   :  { %v3727_v40 = vld [vmem:[%s4022_s6 + $0x138] sm:$0xff] }
 0x54c   :  { %2429 = vpow2.f32 %v2293_v23  ;;  %v3720_v23 = vld [vmem:[%s4022_s6 + $0x150] sm:$0xff] }
 0x54d   :  { %2431 = vpow2.f32 %v2294_v37  ;;  %v3734_v37 = vld [vmem:[%s4022_s6 + $0x130] sm:$0xff] }
 0x557   :  { %v2428_v47 = vpop.eup %2427 }
 0x558   :  { %v1513_v59 = vadd.f32 1.0, %v2428_v47  ;;  %v3741_v47 = vld [vmem:[%s4022_s6 + $0x118] sm:$0xff] }
 0x559   :  { %v2430_v0 = vpop.eup %2429 }
 0x55a   :  { %2433 = vrcp.f32 %v1513_v59  ;;  %v1522_v2 = vadd.f32 1.0, %v2430_v0  ;;  %v2432_v5 = vpop.eup %2431  ;;  %v3755_v59 = vld [vmem:[%s4022_s6 + $0xf8] sm:$0xff]  ;;  %v3762_v0 = vld [vmem:[%s4022_s6 + $0xf0] sm:$0xff] }
 0x55b   :  { %2435 = vtanh.f32 %v1525_v53  ;;  %v1533_v52 = vadd.f32 1.0, %v2432_v5  ;;  %v3748_v53 = vld [vmem:[%s4022_s6 + $0x110] sm:$0xff] }
 0x55c   :  { %2437 = vrcp.f32 %v1522_v2  ;;  %v3769_v2 = vld [vmem:[%s4022_s6 + $0xd8] sm:$0xff]  ;;  %v3776_v5 = vld [vmem:[%s4022_s6 + $0xd0] sm:$0xff] }
 0x55d   :  { %2439 = vrcp.f32 %v1533_v52  ;;  %v3804_v52 = vld [vmem:[%s4022_s6 + $0x90] sm:$0xff] }
 0x55e   :  { %4241 = vst [vmem:[#allocation10_spill] sm:$0xff] %v3804_v52 }
 0x567   :  { %v2434_v7 = vpop.eup %2433 }
 0x568   :  { %v2436_v48 = vpop.eup %2435 }
 0x569   :  { %v2438_v21 = vpop.eup %2437  ;;  %v1537_v49 = vmul.f32 %v2436_v48, %v2434_v7  ;;  %v3783_v7 = vld [vmem:[%s4022_s6 + $0xb8] sm:$0xff]  ;;  %v3790_v48 = vld [vmem:[%s4022_s6 + $0xb0] sm:$0xff] }
 0x56a   :  { %v1536_v3 = vmul.f32 %v2438_v21, %v3565_v54  ;;  %v2440_v38 = vpop.eup %2439  ;;  %v3671_v54 = vld [vmem:[%s4022_s6 + $0x1b8] sm:$0xff] }
 0x56b   :  { %v3797_v21 = vld [vmem:[%s4022_s6 + $0x98] sm:$0xff] }
 0x56c   :  { %v3658_v42 = vadd.f32 %v1537_v49, %v1536_v3  ;;  %4240 = vst [vmem:[#allocation9_spill] sm:$0xff] %v3797_v21  ;;  %v3811_v3 = vld [vmem:[%s4022_s6 + $0x78] sm:$0xff]  ;;  %v3818_v49 = vld [vmem:[%s4022_s6 + $0x70] sm:$0xff] }
 0x56d   :  { %4242 = vst [vmem:[#allocation11_spill] sm:$0xff] %v3811_v3  ;;  %4243 = vst [vmem:[#allocation12_spill] sm:$0xff] %v3818_v49 }
 0x56e   :  { %2441 = vtanh.f32 %v3658_v42 }
 0x57b   :  { %v2442_v35 = vpop.eup %2441 }
 0x57c   :  { %v1540_v32 = vmul.f32 %v2442_v35, %v2440_v38  ;;  %v3825_v38 = vld [vmem:[%s4022_s6 + $0x58] sm:$0xff]  ;;  %v3832_v35 = vld [vmem:[%s4022_s6 + $0x50] sm:$0xff] }
 0x57d   :  { %4244 = vst [vmem:[#allocation13_spill] sm:$0xff] %v3825_v38  ;;  %4245 = vst [vmem:[#allocation14_spill] sm:$0xff] %v3832_v35 }
 0x57e   :  { %1541 = vst [vmem:[#allocation2 + $0x4] sm:$0x1] %v1540_v32  ;;  %1609 = vmatmul.mubr.f32.vlgmr.msra.gmra.mxu0 %v1540_v32  ;;  %1680 = vmatmul.mubr.f32.vlgmr.msra.gmra.mxu1 %v1540_v32  ;;  %v3839_v32 = vld [vmem:[%s4022_s6 + $0x38] sm:$0xff] }
 0x57f   :  { %1751 = vmatpush1.msra.mxu0 %v3343_v17  ;;  %1822 = vmatpush1.msra.mxu1 %v3572_v34  ;;  %4246 = vst [vmem:[#allocation15_spill] sm:$0xff] %v3839_v32 }
 0x580   :  { %1752 = vmatprep.subr.mxu0 %v3350_v33  ;;  %1823 = vmatprep.subr.mxu1 %v3579_v46 }
 0x581   :  { %1753 = vmatpush1.msra.mxu0 %v3357_v30  ;;  %1824 = vmatpush1.msra.mxu1 %v3586_v58 }
 0x582   :  { %1754 = vmatprep.subr.mxu0 %v3364_v36  ;;  %1825 = vmatprep.subr.mxu1 %v3671_v54 }
 0x583   :  { %1755 = vmatpush1.msra.mxu0 %v3371_v39  ;;  %1826 = vmatpush1.msra.mxu1 %v3678_v43 }
 0x584   :  { %1756 = vmatprep.subr.mxu0 %v3378_v41  ;;  %1827 = vmatprep.subr.mxu1 %v3685_v10 }
 0x585   :  { %1757 = vmatpush1.msra.mxu0 %v3385_v63  ;;  %1828 = vmatpush1.msra.mxu1 %v3692_v29 }
 0x586   :  { %1758 = vmatprep.subr.mxu0 %v3392_v24  ;;  %1829 = vmatprep.subr.mxu1 %v3699_v14 }
 0x587   :  { %1759 = vmatpush1.msra.mxu0 %v3399_v15  ;;  %1830 = vmatpush1.msra.mxu1 %v3706_v45 }
 0x588   :  { %1760 = vmatprep.subr.mxu0 %v3406_v20  ;;  %1831 = vmatprep.subr.mxu1 %v3713_v26 }
 0x589   :  { %1761 = vmatpush1.msra.mxu0 %v3413_v16  ;;  %1832 = vmatpush1.msra.mxu1 %v3720_v23 }
 0x58a   :  { %1762 = vmatprep.subr.mxu0 %v3420_v9  ;;  %1833 = vmatprep.subr.mxu1 %v3727_v40 }
 0x58b   :  { %1763 = vmatpush1.msra.mxu0 %v3427_v27  ;;  %1834 = vmatpush1.msra.mxu1 %v3734_v37 }
 0x58c   :  { %1764 = vmatprep.subr.mxu0 %v3434_v55  ;;  %1835 = vmatprep.subr.mxu1 %v3741_v47 }
 0x58d   :  { %1765 = vmatpush1.msra.mxu0 %v3441_v61  ;;  %1836 = vmatpush1.msra.mxu1 %v3748_v53 }
 0x58e   :  { %1766 = vmatprep.subr.mxu0 %v3448_v11  ;;  %1837 = vmatprep.subr.mxu1 %v3755_v59 }
 0x58f   :  { %1767 = vmatpush1.msra.mxu0 %v3455_v13  ;;  %1838 = vmatpush1.msra.mxu1 %v3762_v0 }
 0x590   :  { %1768 = vmatprep.subr.mxu0 %v3462_v12  ;;  %1839 = vmatprep.subr.mxu1 %v3769_v2 }
 0x591   :  { %1769 = vmatpush1.msra.mxu0 %v3469_v19  ;;  %1840 = vmatpush1.msra.mxu1 %v3776_v5 }
 0x592   :  { %1770 = vmatprep.subr.mxu0 %v3476_v22  ;;  %1841 = vmatprep.subr.mxu1 %v3783_v7 }
 0x593   :  { %1771 = vmatpush1.msra.mxu0 %v3483_v25  ;;  %1842 = vmatpush1.msra.mxu1 %v3790_v48 }
 0x594   :  { %1772 = vmatprep.subr.mxu0 %v3490_v28  ;;  %1843 = vmatprep.subr.mxu1 %v3797_v21 }
 0x595   :  { %1773 = vmatpush1.msra.mxu0 %v3497_v31  ;;  %1844 = vmatpush1.msra.mxu1 %v3804_v52 }
 0x596   :  { %1774 = vmatprep.subr.mxu0 %v4222_v44  ;;  %1845 = vmatprep.subr.mxu1 %v3811_v3 }
 0x597   :  { %1775 = vmatpush1.msra.mxu0 %v4224_v50  ;;  %1846 = vmatpush1.msra.mxu1 %v3818_v49 }
 0x598   :  { %1776 = vmatprep.subr.mxu0 %v4226_v56  ;;  %1847 = vmatprep.subr.mxu1 %v3825_v38 }
 0x599   :  { %1777 = vmatpush1.msra.mxu0 %v4228_v62  ;;  %1848 = vmatpush1.msra.mxu1 %v3832_v35  ;;  %v3846_v62 = vld [vmem:[%s4022_s6 + $0x30] sm:$0xff] }
 0x59a   :  { %1778 = vmatprep.subr.mxu0 %v4230_v1  ;;  %1849 = vmatprep.subr.mxu1 %v3839_v32  ;;  %4247 = vst [vmem:[#allocation16_spill] sm:$0xff] %v3846_v62  ;;  %v3853_v1 = vld [vmem:[%s4022_s6 + $0x18] sm:$0xff] }
 0x59b   :  { %1779 = vmatpush1.msra.mxu0 %v4232_v4  ;;  %1850 = vmatpush1.msra.mxu1 %v3846_v62  ;;  %4248 = vst [vmem:[#allocation17_spill] sm:$0xff] %v3853_v1  ;;  %v3861_v4 = vld [vmem:[%s4022_s6 + $0x10] sm:$0xff] }
 0x59c   :  { %1780 = vmatprep.subr.mxu0 %v4234_v6  ;;  %1851 = vmatprep.subr.mxu1 %v3853_v1  ;;  %4249 = vst [vmem:[#allocation23_spill] sm:$0xff] %v3861_v4 }
 0x59d   :  { %1781 = vmatpush1.msra.mxu0 %v4236_v8  ;;  %1814 = vmatprep.mubr.f32.mxu0 %v4237_v51 }
 0x59e   :  { %1852 = vmatpush1.msra.mxu1 %v3861_v4  ;;  %1885 = vmatprep.mubr.f32.mxu1 %v4237_v51  ;;  %v1543_v4 = vld [vmem:[#allocation2 + $0x5] ss:$8 sm:$0xf] }
 0x59f   :  { %1956 = vmatprep.subr.mxu0 %v4239_v57  ;;  %2027 = vmatprep.subr.mxu1 %v3651_v18 }
 0x63e   :  { %v1610_v6 = vpop.f32.mrf.mxu0  ;;  %v1681_v62 = vpop.f32.mrf.mxu1 }
 0x640   :  { %v1612_v1 = vpop.f32.mrf.mxu0  ;;  %v1683_v32 = vpop.f32.mrf.mxu1 }
 0x641   :  { %v1690_v8 = vcombine.low %v1610_v6, %v1612_v1  ;;  %v1691_v35 = vcombine.low %v1681_v62, %v1683_v32 }
 0x643   :  { %v1698_v38 = vrot.slane %v1690_v8, %v3181_v60  ;;  %v1705_v56 = vrot.slane %v1691_v35, %v3181_v60 }
 0x645   :  { %v1706_v49 = vcombine.low %v1698_v38, %v1705_v56 }
 0x647   :  { %v1713_v50 = vrot.slane %v1706_v49, %v3181_v60 }
 0x649   :  { %v1715_v3 = vadd.f32 %v1713_v50, %v1543_v4 }
 0x64b   :  { %v2295_v51 = vmul.f32 -1.442695, %v1715_v3  ;;  %v1723_v44 = vrot.slane %v1715_v3, 1  ;;  %v1734_v18 = vrot.slane %v1715_v3, 3  ;;  %v1731_v21 = vrot.slane %v1715_v3, 2 }
 0x64d   :  { %2443 = vpow2.f32 %v2295_v51  ;;  %v2296_v57 = vmul.f32 -1.442695, %v1723_v44  ;;  %v2297_v52 = vmul.f32 -1.442695, %v1734_v18 }
 0x64f   :  { %2445 = vpow2.f32 %v2296_v57 }
 0x650   :  { %2447 = vpow2.f32 %v2297_v52 }
 0x65a   :  { %v2444_v31 = vpop.eup %2443 }
 0x65b   :  { %v1719_v1 = vadd.f32 1.0, %v2444_v31 }
 0x65c   :  { %v2446_v62 = vpop.eup %2445 }
 0x65d   :  { %2449 = vrcp.f32 %v1719_v1  ;;  %v1728_v6 = vadd.f32 1.0, %v2446_v62  ;;  %v2448_v56 = vpop.eup %2447 }
 0x65e   :  { %2451 = vtanh.f32 %v1731_v21  ;;  %v1739_v4 = vadd.f32 1.0, %v2448_v56 }
 0x65f   :  { %2453 = vrcp.f32 %v1728_v6 }
 0x660   :  { %2455 = vrcp.f32 %v1739_v4  ;;  %v2173_v4 = vld [vmem:[%s4028_s8 + $0x60] sm:$0xff] }
 0x66a   :  { %v2450_v8 = vpop.eup %2449 }
 0x66b   :  { %v2452_v49 = vpop.eup %2451 }
 0x66c   :  { %v2454_v50 = vpop.eup %2453  ;;  %v1743_v44 = vmul.f32 %v2452_v49, %v2450_v8  ;;  %v2176_v8 = vld [vmem:[%s4028_s8 + $0x78] sm:$0xff]  ;;  %v2175_v49 = vld [vmem:[%s4028_s8 + $0x70] sm:$0xff] }
 0x66d   :  { %v1742_v51 = vmul.f32 %v2454_v50, %v3658_v42  ;;  %v2456_v31 = vpop.eup %2455  ;;  %v2174_v50 = vld [vmem:[%s4028_s8 + $0x68] sm:$0xff] }
 0x66f   :  { %v3871_v38 = vadd.f32 %v1743_v44, %v1742_v51  ;;  %v2172_v51 = vld [vmem:[%s4028_s8 + $0x58] sm:$0xff]  ;;  %v2171_v44 = vld [vmem:[%s4028_s8 + $0x50] sm:$0xff] }
 0x671   :  { %2457 = vtanh.f32 %v3871_v38 }
 0x67e   :  { %v2458_v3 = vpop.eup %2457 }
 0x67f   :  { %v1746_v52 = vmul.f32 %v2458_v3, %v2456_v31  ;;  %v2169_v31 = vld [vmem:[%s4028_s8 + $0x40] sm:$0xff]  ;;  %v2168_v3 = vld [vmem:[%s4028_s8 + $0x38] sm:$0xff] }
 0x681   :  { %1747 = vst [vmem:[#allocation2 + $0x5] sm:$0x1] %v1746_v52  ;;  %1815 = vmatmul.mubr.f32.vlgmr.msra.gmra.mxu0 %v1746_v52  ;;  %1886 = vmatmul.mubr.f32.vlgmr.msra.gmra.mxu1 %v1746_v52  ;;  %v2167_v52 = vld [vmem:[%s4028_s8 + $0x30] sm:$0xff] }
 0x682   :  { %1957 = vmatpush1.msra.mxu0 %v3343_v17  ;;  %2028 = vmatpush1.msra.mxu1 %v3572_v34  ;;  %v4250_v17 = vld [vmem:[#allocation9_spill] sm:$0xff] }
 0x683   :  { %1958 = vmatprep.subr.mxu0 %v3350_v33  ;;  %2029 = vmatprep.subr.mxu1 %v3579_v46  ;;  %v4251_v33 = vld [vmem:[#allocation5_spill] sm:$0xff] }
 0x684   :  { %1959 = vmatpush1.msra.mxu0 %v3357_v30  ;;  %2030 = vmatpush1.msra.mxu1 %v3586_v58  ;;  %v4252_v30 = vld [vmem:[#allocation10_spill] sm:$0xff] }
 0x685   :  { %1960 = vmatprep.subr.mxu0 %v3364_v36  ;;  %2031 = vmatprep.subr.mxu1 %v3671_v54  ;;  %v4253_v36 = vld [vmem:[#allocation19_spill] sm:$0xff] }
 0x686   :  { %1961 = vmatpush1.msra.mxu0 %v3371_v39  ;;  %2032 = vmatpush1.msra.mxu1 %v3678_v43  ;;  %v4254_v39 = vld [vmem:[#allocation11_spill] sm:$0xff] }
 0x687   :  { %1962 = vmatprep.subr.mxu0 %v3378_v41  ;;  %2033 = vmatprep.subr.mxu1 %v3685_v10  ;;  %v4255_v41 = vld [vmem:[#allocation6_spill] sm:$0xff] }
 0x688   :  { %1963 = vmatpush1.msra.mxu0 %v3385_v63  ;;  %2034 = vmatpush1.msra.mxu1 %v3692_v29  ;;  %v4256_v63 = vld [vmem:[#allocation12_spill] sm:$0xff] }
 0x689   :  { %1964 = vmatprep.subr.mxu0 %v3392_v24  ;;  %2035 = vmatprep.subr.mxu1 %v3699_v14  ;;  %v4257_v24 = vld [vmem:[#allocation20_spill] sm:$0xff] }
 0x68a   :  { %1965 = vmatpush1.msra.mxu0 %v3399_v15  ;;  %2036 = vmatpush1.msra.mxu1 %v3706_v45  ;;  %v4258_v15 = vld [vmem:[#allocation13_spill] sm:$0xff] }
 0x68b   :  { %1966 = vmatprep.subr.mxu0 %v3406_v20  ;;  %2037 = vmatprep.subr.mxu1 %v3713_v26  ;;  %v4259_v20 = vld [vmem:[#allocation7_spill] sm:$0xff] }
 0x68c   :  { %1967 = vmatpush1.msra.mxu0 %v3413_v16  ;;  %2038 = vmatpush1.msra.mxu1 %v3720_v23  ;;  %v4260_v16 = vld [vmem:[#allocation14_spill] sm:$0xff] }
 0x68d   :  { %1968 = vmatprep.subr.mxu0 %v3420_v9  ;;  %2039 = vmatprep.subr.mxu1 %v3727_v40  ;;  %v4261_v9 = vld [vmem:[#allocation4_spill] sm:$0xff] }
 0x68e   :  { %1969 = vmatpush1.msra.mxu0 %v3427_v27  ;;  %2040 = vmatpush1.msra.mxu1 %v3734_v37  ;;  %v4262_v27 = vld [vmem:[#allocation15_spill] sm:$0xff] }
 0x68f   :  { %1970 = vmatprep.subr.mxu0 %v3434_v55  ;;  %2041 = vmatprep.subr.mxu1 %v3741_v47  ;;  %v4263_v55 = vld [vmem:[#allocation21_spill] sm:$0xff] }
 0x690   :  { %1971 = vmatpush1.msra.mxu0 %v3441_v61  ;;  %2042 = vmatpush1.msra.mxu1 %v3748_v53  ;;  %v4264_v61 = vld [vmem:[#allocation16_spill] sm:$0xff] }
 0x691   :  { %1972 = vmatprep.subr.mxu0 %v3448_v11  ;;  %2043 = vmatprep.subr.mxu1 %v3755_v59  ;;  %v4265_v11 = vld [vmem:[#allocation8_spill] sm:$0xff] }
 0x692   :  { %1973 = vmatpush1.msra.mxu0 %v3455_v13  ;;  %2044 = vmatpush1.msra.mxu1 %v3762_v0  ;;  %v4266_v13 = vld [vmem:[#allocation17_spill] sm:$0xff] }
 0x693   :  { %1974 = vmatprep.subr.mxu0 %v3462_v12  ;;  %2045 = vmatprep.subr.mxu1 %v3769_v2  ;;  %v4267_v12 = vld [vmem:[#allocation22_spill] sm:$0xff] }
 0x694   :  { %1975 = vmatpush1.msra.mxu0 %v3469_v19  ;;  %2046 = vmatpush1.msra.mxu1 %v3776_v5  ;;  %v4268_v19 = vmov 0.0   ;;  %v1749_v14 = vld [vmem:[#allocation2 + $0x6] ss:$8 sm:$0xf] }
 0x695   :  { %1976 = vmatprep.subr.mxu0 %v3476_v22  ;;  %2047 = vmatprep.subr.mxu1 %v3783_v7  ;;  %v4269_v22 = vld [vmem:[#allocation23_spill] sm:$0xff] }
 0x696   :  { %1977 = vmatpush1.msra.mxu0 %v3483_v25  ;;  %2048 = vmatpush1.msra.mxu1 %v3790_v48 }
 0x697   :  { %1978 = vmatprep.subr.mxu0 %v3490_v28  ;;  %2049 = vmatprep.subr.mxu1 %v4250_v17  ;;  %v2166_v17 = vld [vmem:[%s4028_s8 + $0x28] sm:$0xff] }
 0x698   :  { %1979 = vmatpush1.msra.mxu0 %v4251_v33  ;;  %2050 = vmatpush1.msra.mxu1 %v4252_v30  ;;  %v2165_v33 = vld [vmem:[%s4028_s8 + $0x20] sm:$0xff]  ;;  %v2164_v30 = vld [vmem:[%s4028_s8 + $0x18] sm:$0xff] }
 0x699   :  { %1980 = vmatprep.subr.mxu0 %v4253_v36  ;;  %2051 = vmatprep.subr.mxu1 %v4254_v39  ;;  %v2163_v36 = vld [vmem:[%s4028_s8 + $0x10] sm:$0xff]  ;;  %v2162_v39 = vld [vmem:[%s4028_s8 + $0x8] sm:$0xff] }
 0x69a   :  { %1981 = vmatpush1.msra.mxu0 %v4255_v41  ;;  %2052 = vmatpush1.msra.mxu1 %v4256_v63  ;;  %v2161_v41 = vld [vmem:[%s4028_s8] sm:$0xff]  ;;  %v15_v63 = vstv %s4029_s9 }
 0x69b   :  { %1982 = vmatprep.subr.mxu0 %v4257_v24  ;;  %2053 = vmatprep.subr.mxu1 %v4258_v15  ;;  %16 = vst [vmem:[#allocation3] sm:$0x1] %v15_v63 }
 0x69c   :  { %1983 = vmatpush1.msra.mxu0 %v4259_v20  ;;  %2054 = vmatpush1.msra.mxu1 %v4260_v16 }
 0x69d   :  { %1984 = vmatprep.subr.mxu0 %v4261_v9  ;;  %2055 = vmatprep.subr.mxu1 %v4262_v27 }
 0x69e   :  { %1985 = vmatpush1.msra.mxu0 %v4263_v55  ;;  %2056 = vmatpush1.msra.mxu1 %v4264_v61 }
 0x69f   :  { %1986 = vmatprep.subr.mxu0 %v4265_v11  ;;  %2057 = vmatprep.subr.mxu1 %v4266_v13 }
 0x6a0   :  { %1987 = vmatpush1.msra.mxu0 %v4267_v12  ;;  %2020 = vmatprep.mubr.f32.mxu0 %v4268_v19  ;;  %v1955_v12 = vld [vmem:[#allocation2 + $0x7] ss:$8 sm:$0xf] }
 0x6a1   :  { %2058 = vmatpush1.msra.mxu1 %v4269_v22  ;;  %2091 = vmatprep.mubr.f32.mxu1 %v4268_v19 }
 0x6a2   :  { %2323 = vmatprep.subr.mxu0 %v4268_v19 }
 0x741   :  { %v1816_v25 = vpop.f32.mrf.mxu0  ;;  %v1887_v28 = vpop.f32.mrf.mxu1 }
 0x743   :  { %v1818_v34 = vpop.f32.mrf.mxu0  ;;  %v1889_v46 = vpop.f32.mrf.mxu1 }
 0x744   :  { %v1896_v58 = vcombine.low %v1816_v25, %v1818_v34  ;;  %v1897_v42 = vcombine.low %v1887_v28, %v1889_v46 }
 0x746   :  { %v1904_v54 = vrot.slane %v1896_v58, %v3181_v60  ;;  %v1911_v43 = vrot.slane %v1897_v42, %v3181_v60 }
 0x748   :  { %v1912_v10 = vcombine.low %v1904_v54, %v1911_v43 }
 0x74a   :  { %v1919_v29 = vrot.slane %v1912_v10, %v3181_v60 }
 0x74c   :  { %v1921_v45 = vadd.f32 %v1919_v29, %v1749_v14 }
 0x74e   :  { %v2298_v26 = vmul.f32 -1.442695, %v1921_v45  ;;  %v1929_v23 = vrot.slane %v1921_v45, 1  ;;  %v1940_v37 = vrot.slane %v1921_v45, 3  ;;  %v1937_v59 = vrot.slane %v1921_v45, 2 }
 0x750   :  { %2459 = vpow2.f32 %v2298_v26  ;;  %v2299_v40 = vmul.f32 -1.442695, %v1929_v23  ;;  %v2300_v47 = vmul.f32 -1.442695, %v1940_v37 }
 0x752   :  { %2461 = vpow2.f32 %v2299_v40 }
 0x753   :  { %2463 = vpow2.f32 %v2300_v47 }
 0x75d   :  { %v2460_v53 = vpop.eup %2459 }
 0x75e   :  { %v1925_v0 = vadd.f32 1.0, %v2460_v53 }
 0x75f   :  { %v2462_v2 = vpop.eup %2461 }
 0x760   :  { %2465 = vrcp.f32 %v1925_v0  ;;  %v1934_v5 = vadd.f32 1.0, %v2462_v2  ;;  %v2464_v7 = vpop.eup %2463  ;;  %v2304_v2 = vld [vmem:[#allocation3] ss:$0 sm:$0xff] }
 0x761   :  { %2467 = vtanh.f32 %v1937_v59  ;;  %v1945_v32 = vadd.f32 1.0, %v2464_v7 }
 0x762   :  { %2469 = vrcp.f32 %v1934_v5 }
 0x763   :  { %2471 = vrcp.f32 %v1945_v32 }
 0x76d   :  { %v2466_v48 = vpop.eup %2465 }
 0x76e   :  { %v2468_v21 = vpop.eup %2467 }
 0x76f   :  { %v2470_v35 = vpop.eup %2469  ;;  %v1949_v18 = vmul.f32 %v2468_v21, %v2466_v48 }
 0x770   :  { %v1948_v57 = vmul.f32 %v2470_v35, %v3871_v38  ;;  %v2472_v62 = vpop.eup %2471  ;;  %v2170_v38 = vld [vmem:[%s4028_s8 + $0x48] sm:$0xff] }
 0x772   :  { %v3943_v1 = vadd.f32 %v1949_v18, %v1948_v57 }
 0x774   :  { %2473 = vtanh.f32 %v3943_v1 }
 0x781   :  { %v2474_v6 = vpop.eup %2473 }
 0x782   :  { %v1952_v56 = vmul.f32 %v2474_v6, %v2472_v62 }
 0x784   :  { %1953 = vst [vmem:[#allocation2 + $0x6] sm:$0x1] %v1952_v56  ;;  %2021 = vmatmul.mubr.f32.vlgmr.msra.gmra.mxu0 %v1952_v56  ;;  %2092 = vmatmul.mubr.f32.vlgmr.msra.gmra.mxu1 %v1952_v56 }
 0x785   :  { %2324 = vmatpush3.msra.mxu0 %v2176_v8  ;;  %2355 = vmatprep.mubr.msk.f32.mxu0 %vm2561_vm4, %v4268_v19 }
 0x786   :  { %2325 = vmatprep.subr.mxu0 %v4268_v19 }
 0x787   :  { %2326 = vmatpush3.msra.mxu0 %v2175_v49 }
 0x788   :  { %2327 = vmatprep.subr.mxu0 %v4268_v19 }
 0x789   :  { %2328 = vmatpush3.msra.mxu0 %v2174_v50 }
 0x78a   :  { %2329 = vmatprep.subr.mxu0 %v4268_v19 }
 0x78b   :  { %2330 = vmatpush3.msra.mxu0 %v2173_v4 }
 0x78c   :  { %2331 = vmatprep.subr.mxu0 %v4268_v19 }
 0x78d   :  { %2332 = vmatpush3.msra.mxu0 %v2172_v51 }
 0x78e   :  { %2333 = vmatprep.subr.mxu0 %v4268_v19 }
 0x78f   :  { %2334 = vmatpush3.msra.mxu0 %v2171_v44 }
 0x790   :  { %2335 = vmatprep.subr.mxu0 %v4268_v19 }
 0x791   :  { %2336 = vmatpush3.msra.mxu0 %v2170_v38 }
 0x792   :  { %2337 = vmatprep.subr.mxu0 %v4268_v19 }
 0x793   :  { %2338 = vmatpush3.msra.mxu0 %v2169_v31 }
 0x794   :  { %2339 = vmatprep.subr.mxu0 %v4268_v19 }
 0x795   :  { %2340 = vmatpush3.msra.mxu0 %v2168_v3 }
 0x796   :  { %2341 = vmatprep.subr.mxu0 %v4268_v19 }
 0x797   :  { %2342 = vmatpush3.msra.mxu0 %v2167_v52 }
 0x798   :  { %2343 = vmatprep.subr.mxu0 %v4268_v19 }
 0x799   :  { %2344 = vmatpush3.msra.mxu0 %v2166_v17 }
 0x79a   :  { %2345 = vmatprep.subr.mxu0 %v4268_v19 }
 0x79b   :  { %2346 = vmatpush3.msra.mxu0 %v2165_v33 }
 0x79c   :  { %2347 = vmatprep.subr.mxu0 %v4268_v19 }
 0x79d   :  { %2348 = vmatpush3.msra.mxu0 %v2164_v30 }
 0x79e   :  { %2349 = vmatprep.subr.mxu0 %v4268_v19 }
 0x79f   :  { %2350 = vmatpush3.msra.mxu0 %v2163_v36 }
 0x7a0   :  { %2351 = vmatprep.subr.mxu0 %v4268_v19 }
 0x7a1   :  { %2352 = vmatpush3.msra.mxu0 %v2162_v39 }
 0x7a2   :  { %2353 = vmatprep.subr.mxu0 %v4268_v19 }
 0x7a3   :  { %2354 = vmatpush3.msra.mxu0 %v2161_v41 }
 0x844   :  { %v2022_v24 = vpop.f32.mrf.mxu0  ;;  %v2093_v15 = vpop.f32.mrf.mxu1 }
 0x846   :  { %v2024_v20 = vpop.f32.mrf.mxu0  ;;  %v2095_v16 = vpop.f32.mrf.mxu1 }
 0x847   :  { %v2102_v9 = vcombine.low %v2022_v24, %v2024_v20  ;;  %v2103_v27 = vcombine.low %v2093_v15, %v2095_v16 }
 0x849   :  { %v2110_v55 = vrot.slane %v2102_v9, %v3181_v60  ;;  %v2117_v61 = vrot.slane %v2103_v27, %v3181_v60 }
 0x84b   :  { %v2118_v11 = vcombine.low %v2110_v55, %v2117_v61 }
 0x84d   :  { %v2125_v13 = vrot.slane %v2118_v11, %v3181_v60 }
 0x84f   :  { %v2127_v19 = vadd.f32 %v2125_v13, %v1955_v12 }
 0x851   :  { %v2301_v22 = vmul.f32 -1.442695, %v2127_v19  ;;  %v2135_v25 = vrot.slane %v2127_v19, 1  ;;  %v2146_v34 = vrot.slane %v2127_v19, 3  ;;  %v2143_v42 = vrot.slane %v2127_v19, 2 }
 0x853   :  { %2475 = vpow2.f32 %v2301_v22  ;;  %v2302_v28 = vmul.f32 -1.442695, %v2135_v25  ;;  %v2303_v46 = vmul.f32 -1.442695, %v2146_v34 }
 0x855   :  { %2477 = vpow2.f32 %v2302_v28 }
 0x856   :  { %2479 = vpow2.f32 %v2303_v46 }
 0x860   :  { %v2476_v58 = vpop.eup %2475 }
 0x861   :  { %v2131_v54 = vadd.f32 1.0, %v2476_v58 }
 0x862   :  { %v2478_v43 = vpop.eup %2477 }
 0x863   :  { %2481 = vrcp.f32 %v2131_v54  ;;  %v2140_v10 = vadd.f32 1.0, %v2478_v43  ;;  %v2480_v29 = vpop.eup %2479 }
 0x864   :  { %2483 = vtanh.f32 %v2143_v42  ;;  %v2151_v26 = vadd.f32 1.0, %v2480_v29 }
 0x865   :  { %2485 = vrcp.f32 %v2140_v10 }
 0x866   :  { %2487 = vrcp.f32 %v2151_v26 }
 0x870   :  { %v2482_v60 = vpop.eup %2481 }
 0x871   :  { %v2484_v14 = vpop.eup %2483 }
 0x872   :  { %v2486_v45 = vpop.eup %2485  ;;  %v2155_v40 = vmul.f32 %v2484_v14, %v2482_v60 }
 0x873   :  { %v2154_v23 = vmul.f32 %v2486_v45, %v3943_v1  ;;  %v2488_v47 = vpop.eup %2487 }
 0x875   :  { %v2156_v37 = vadd.f32 %v2155_v40, %v2154_v23 }
 0x877   :  { %2489 = vtanh.f32 %v2156_v37 }
 0x884   :  { %v2490_v53 = vpop.eup %2489 }
 0x885   :  { %v2158_v59 = vmul.f32 %v2490_v53, %v2488_v47 }
 0x887   :  { %2159 = vst [vmem:[#allocation2 + $0x7] sm:$0x1] %v2158_v59 }
 0x88e   :  { %v2160_v0 = vld [vmem:[#allocation2] sm:$0xff] }
 0x88f   :  { %2356 = vmatmul.mubr.f32.vlgmr.msra.gmra.mxu0 %v2160_v0 }
 0x94f   :  { %v2250_v5 = vpop.f32.mrf.mxu0 }
 0x950   :  { %v2251_v7 = vadd.f32 %v2304_v2, %v2250_v5 }
 0x951   :  { %v2357_v48 = vpop.f32.mrf.mxu0 }
 0x952   :  { %v2305_v21 = vmul.f32 -1.442695, %v2251_v7 }
 0x954   :  { %2491 = vpow2.f32 %v2305_v21 }
 0x961   :  { %v2492_v35 = vpop.eup %2491 }
 0x962   :  { %v2257_v32 = vadd.f32 1.0, %v2492_v35 }
 0x964   :  { %2493 = vrcp.f32 %v2257_v32 }
 0x971   :  { %v2494_v57 = vpop.eup %2493 }
 0x972   :  { %2261 = vst.msk [vmem:[%s4030_s10] sm:$0xff] %vm2260_vm5, %v2494_v57 }

// kernel: forward.2
= control target key start
LH: loop header
LB: loop body
LE: loop exit
PB: predicated region body
PF: predicated region fallthrough
CT: control target
= control target key end

     0   :  { %vm1615_vm0 = vcmask 293888   ;;  %s2648_s4 = inlined_call_operand.vmem [shape: bf16[768,36], index: 4, kind: input, shape index: {}]   ;;  %s2649_s0 = inlined_call_operand.vmem [shape: bf16[8,768], index: 0, kind: input, shape index: {}]   ;;  %s2650_s5 = inlined_call_operand.vmem [shape: bf16[768,36], index: 5, kind: input, shape index: {}]   ;;  %s2651_s1 = inlined_call_operand.vmem [shape: bf16[8,768], index: 1, kind: input, shape index: {}]   ;;  %s2652_s6 = inlined_call_operand.vmem [shape: bf16[768,36], index: 6, kind: input, shape index: {}]   ;;  %s2653_s2 = inlined_call_operand.vmem [shape: bf16[8,768], index: 2, kind: input, shape index: {}]   ;;  %s2654_s3 = inlined_call_operand.vmem [shape: f32[8,36], index: 3, kind: input, shape index: {}]   ;;  %s2655_s7 = inlined_call_operand.vmem [shape: f32[8,36], index: 7, kind: output, shape index: {}]  }
   0x1   :  { %v1981_v0 = vld [vmem:[%s2648_s4 + $0x78] sm:$0xff]   ;;  %v1985_v4 = vld [vmem:[%s2648_s4 + $0x70] sm:$0xff]   ;;  %v1989_v8 = vld [vmem:[%s2648_s4 + $0x68] sm:$0xff]  }
   0x2   :  { %v1982_v1 = vld [vmem:[%s2648_s4 + $0xf8] sm:$0xff]   ;;  %1783 = vmatprep.subr.bf16.mxu0 %v1981_v0  ;;  %v1986_v5 = vld [vmem:[%s2648_s4 + $0xf0] sm:$0xff]   ;;  %v1990_v9 = vld [vmem:[%s2648_s4 + $0xe8] sm:$0xff]  }
   0x3   :  { %v1983_v2 = vld [vmem:[%s2648_s4 + $0x38] sm:$0xff]   ;;  %1805 = vmatprep.subr.bf16.mxu1 %v1982_v1  ;;  %v1987_v6 = vld [vmem:[%s2648_s4 + $0x30] sm:$0xff]   ;;  %v1991_v10 = vld [vmem:[%s2648_s4 + $0x28] sm:$0xff]  }
   0x4   :  { %v1984_v3 = vld [vmem:[%s2648_s4 + $0xb8] sm:$0xff]   ;;  %1784 = vmatpush3.bf16.msra.mxu0 %v1983_v2  ;;  %v1988_v7 = vld [vmem:[%s2648_s4 + $0xb0] sm:$0xff]   ;;  %v1992_v11 = vld [vmem:[%s2648_s4 + $0xa8] sm:$0xff]  }
   0x5   :  { %1806 = vmatpush3.bf16.msra.mxu1 %v1984_v3  ;;  %1785 = vmatprep.subr.bf16.mxu0 %v1985_v4  ;;  %v1993_v12 = vld [vmem:[%s2648_s4 + $0x60] sm:$0xff]   ;;  %v1997_v16 = vld [vmem:[%s2648_s4 + $0x58] sm:$0xff]   ;;  %v2001_v20 = vld [vmem:[%s2648_s4 + $0x50] sm:$0xff]  }
   0x6   :  { %1807 = vmatprep.subr.bf16.mxu1 %v1986_v5  ;;  %v1994_v13 = vld [vmem:[%s2648_s4 + $0xe0] sm:$0xff]   ;;  %v1998_v17 = vld [vmem:[%s2648_s4 + $0xd8] sm:$0xff]   ;;  %v2002_v21 = vld [vmem:[%s2648_s4 + $0xd0] sm:$0xff]  }
   0x7   :  { %v1995_v14 = vld [vmem:[%s2648_s4 + $0x20] sm:$0xff]   ;;  %v1999_v18 = vld [vmem:[%s2648_s4 + $0x18] sm:$0xff]   ;;  %v2003_v22 = vld [vmem:[%s2648_s4 + $0x10] sm:$0xff]  }
   0x8   :  { %1786 = vmatpush3.bf16.msra.mxu0 %v1987_v6  ;;  %v1996_v15 = vld [vmem:[%s2648_s4 + $0xa0] sm:$0xff]   ;;  %v2000_v19 = vld [vmem:[%s2648_s4 + $0x98] sm:$0xff]   ;;  %v2004_v23 = vld [vmem:[%s2648_s4 + $0x90] sm:$0xff]  }
   0x9   :  { %1808 = vmatpush3.bf16.msra.mxu1 %v1988_v7  ;;  %1787 = vmatprep.subr.bf16.mxu0 %v1989_v8  ;;  %v2005_v24 = vld [vmem:[%s2648_s4 + $0x48] sm:$0xff]   ;;  %v2009_v28 = vld [vmem:[%s2648_s4 + $0x40] sm:$0xff]   ;;  %v2017_v38 = vld [vmem:[%s2648_s4 + $0x178] sm:$0xff]  }
   0xa   :  { %1809 = vmatprep.subr.bf16.mxu1 %v1990_v9  ;;  %v2006_v25 = vld [vmem:[%s2648_s4 + $0xc8] sm:$0xff]   ;;  %v2010_v29 = vld [vmem:[%s2648_s4 + $0xc0] sm:$0xff]   ;;  %v2018_v39 = vld [vmem:[%s2650_s5 + $0x78] sm:$0xff]  }
   0xb   :  { %v2007_v26 = vld [vmem:[%s2648_s4 + $0x8] sm:$0xff]   ;;  %v2011_v30 = vld [vmem:[%s2648_s4] sm:$0xff]   ;;  %v2019_v40 = vld [vmem:[%s2648_s4 + $0x138] sm:$0xff]  }
   0xc   :  { %1788 = vmatpush3.bf16.msra.mxu0 %v1991_v10  ;;  %v2008_v27 = vld [vmem:[%s2648_s4 + $0x88] sm:$0xff]   ;;  %v2012_v31 = vld [vmem:[%s2648_s4 + $0x80] sm:$0xff]   ;;  %v2020_v41 = vld [vmem:[%s2650_s5 + $0x38] sm:$0xff]  }
   0xd   :  { %1810 = vmatpush3.bf16.msra.mxu1 %v1992_v11  ;;  %1789 = vmatprep.subr.bf16.mxu0 %v1993_v12  ;;  %v28_v32 = vld [vmem:[%s2649_s0] sm:$0xff]  ;;  %v29_v33 = vld [vmem:[%s2649_s0 + $0x8] sm:$0xff]  ;;  %v2021_v42 = vld [vmem:[%s2648_s4 + $0x170] sm:$0xff]  }
   0xe   :  { %1811 = vmatprep.subr.bf16.mxu1 %v1994_v13  ;;  %v1621_v34 = vcombine.low %v28_v32, %v28_v32  ;;  %v1622_v35 = vcombine.high %v28_v32, %v28_v32  ;;  %v1623_v36 = vcombine.low %v29_v33, %v29_v33  ;;  %v1624_v37 = vcombine.high %v29_v33, %v29_v33  ;;  %v2022_v43 = vld [vmem:[%s2650_s5 + $0x70] sm:$0xff]   ;;  %v2025_v46 = vld [vmem:[%s2648_s4 + $0x168] sm:$0xff]   ;;  %v2029_v50 = vld [vmem:[%s2648_s4 + $0x160] sm:$0xff]  }
   0xf   :  { %v2023_v44 = vld [vmem:[%s2648_s4 + $0x130] sm:$0xff]   ;;  %v2026_v47 = vld [vmem:[%s2650_s5 + $0x68] sm:$0xff]   ;;  %v2030_v51 = vld [vmem:[%s2650_s5 + $0x60] sm:$0xff]  }
  0x10   :  { %1790 = vmatpush3.bf16.msra.mxu0 %v1995_v14  ;;  %468 = vmatprep.mubr.bf16.mxu0 %v1622_v35  ;;  %v2024_v45 = vld [vmem:[%s2650_s5 + $0x30] sm:$0xff]   ;;  %v2027_v48 = vld [vmem:[%s2648_s4 + $0x128] sm:$0xff]   ;;  %v2031_v52 = vld [vmem:[%s2648_s4 + $0x120] sm:$0xff]  }
  0x11   :  { %1812 = vmatpush3.bf16.msra.mxu1 %v1996_v15  ;;  %1791 = vmatprep.subr.bf16.mxu0 %v1997_v16  ;;  %v2028_v49 = vld [vmem:[%s2650_s5 + $0x28] sm:$0xff]   ;;  %v2032_v53 = vld [vmem:[%s2650_s5 + $0x20] sm:$0xff]   ;;  %v2033_v54 = vld [vmem:[%s2648_s4 + $0x158] sm:$0xff]  }
  0x12   :  { %1813 = vmatprep.subr.bf16.mxu1 %v1998_v17  ;;  %508 = vmatprep.mubr.bf16.mxu1 %v1624_v37  ;;  %v2034_v55 = vld [vmem:[%s2650_s5 + $0x58] sm:$0xff]   ;;  %v2037_v58 = vld [vmem:[%s2648_s4 + $0x150] sm:$0xff]   ;;  %v2041_v62 = vld [vmem:[%s2648_s4 + $0x148] sm:$0xff]  }
  0x13   :  { %v2035_v56 = vld [vmem:[%s2648_s4 + $0x118] sm:$0xff]   ;;  %v2038_v59 = vld [vmem:[%s2650_s5 + $0x50] sm:$0xff]   ;;  %v2042_v63 = vld [vmem:[%s2650_s5 + $0x48] sm:$0xff]  }
  0x14   :  { %1792 = vmatpush3.bf16.msra.mxu0 %v1999_v18  ;;  %v2036_v57 = vld [vmem:[%s2650_s5 + $0x18] sm:$0xff]   ;;  %v2039_v60 = vld [vmem:[%s2648_s4 + $0x110] sm:$0xff]   ;;  %v2043_v0 = vld [vmem:[%s2648_s4 + $0x108] sm:$0xff]  }
  0x15   :  { %1814 = vmatpush3.bf16.msra.mxu1 %v2000_v19  ;;  %1793 = vmatprep.subr.bf16.mxu0 %v2001_v20  ;;  %v2040_v61 = vld [vmem:[%s2650_s5 + $0x10] sm:$0xff]   ;;  %v2044_v1 = vld [vmem:[%s2650_s5 + $0x8] sm:$0xff]   ;;  %v2045_v2 = vld [vmem:[%s2648_s4 + $0x140] sm:$0xff]  }
  0x16   :  { %1815 = vmatprep.subr.bf16.mxu1 %v2002_v21  ;;  %v2046_v3 = vld [vmem:[%s2650_s5 + $0x40] sm:$0xff]   ;;  %v30_v6 = vld [vmem:[%s2649_s0 + $0x10] sm:$0xff]  ;;  %v2053_v12 = vld [vmem:[%s2650_s5 + $0xf8] sm:$0xff]  }
  0x17   :  { %v2047_v4 = vld [vmem:[%s2648_s4 + $0x100] sm:$0xff]   ;;  %v1625_v7 = vcombine.low %v30_v6, %v30_v6  ;;  %v1626_v8 = vcombine.high %v30_v6, %v30_v6  ;;  %v2054_v13 = vld [vmem:[%s2650_s5 + $0x178] sm:$0xff]   ;;  %v2057_v16 = vld [vmem:[%s2650_s5 + $0xf0] sm:$0xff]  }
  0x18   :  { %1794 = vmatpush3.bf16.msra.mxu0 %v2003_v22  ;;  %v2048_v5 = vld [vmem:[%s2650_s5] sm:$0xff]   ;;  %v2055_v14 = vld [vmem:[%s2650_s5 + $0xb8] sm:$0xff]   ;;  %v2058_v17 = vld [vmem:[%s2650_s5 + $0x170] sm:$0xff]  }
  0x19   :  { %1816 = vmatpush3.bf16.msra.mxu1 %v2004_v23  ;;  %1795 = vmatprep.subr.bf16.mxu0 %v2005_v24  ;;  %v557_v9 = vld [vmem:[%s2651_s1] sm:$0xff]  ;;  %v2056_v15 = vld [vmem:[%s2650_s5 + $0x138] sm:$0xff]   ;;  %v2059_v18 = vld [vmem:[%s2650_s5 + $0xb0] sm:$0xff]  }
  0x1a   :  { %1817 = vmatprep.subr.bf16.mxu1 %v2006_v25  ;;  %v1675_v10 = vcombine.low %v557_v9, %v557_v9  ;;  %v1676_v11 = vcombine.high %v557_v9, %v557_v9  ;;  %v2060_v19 = vld [vmem:[%s2650_s5 + $0x130] sm:$0xff]   ;;  %v2061_v20 = vld [vmem:[%s2650_s5 + $0xe8] sm:$0xff]   ;;  %v2065_v24 = vld [vmem:[%s2650_s5 + $0xe0] sm:$0xff]  }
  0x1b   :  { %v2062_v21 = vld [vmem:[%s2650_s5 + $0x168] sm:$0xff]   ;;  %v2066_v25 = vld [vmem:[%s2650_s5 + $0x160] sm:$0xff]   ;;  %v2073_v32 = vld [vmem:[%s2650_s5 + $0xd0] sm:$0xff]  }
  0x1c   :  { %1796 = vmatpush3.bf16.msra.mxu0 %v2007_v26  ;;  %v2063_v22 = vld [vmem:[%s2650_s5 + $0xa8] sm:$0xff]   ;;  %v2067_v26 = vld [vmem:[%s2650_s5 + $0xa0] sm:$0xff]   ;;  %v2074_v33 = vld [vmem:[%s2650_s5 + $0x150] sm:$0xff]  }
  0x1d   :  { %1818 = vmatpush3.bf16.msra.mxu1 %v2008_v27  ;;  %1797 = vmatprep.subr.bf16.mxu0 %v2009_v28  ;;  %v2064_v23 = vld [vmem:[%s2650_s5 + $0x128] sm:$0xff]   ;;  %v2068_v27 = vld [vmem:[%s2650_s5 + $0x120] sm:$0xff]   ;;  %v2069_v28 = vld [vmem:[%s2650_s5 + $0xd8] sm:$0xff]  }
  0x1e   :  { %1819 = vmatprep.subr.bf16.mxu1 %v2010_v29  ;;  %v2070_v29 = vld [vmem:[%s2650_s5 + $0x158] sm:$0xff]   ;;  %v2076_v35 = vld [vmem:[%s2650_s5 + $0x110] sm:$0xff]   ;;  %v2078_v37 = vld [vmem:[%s2650_s5 + $0x148] sm:$0xff]  }
  0x1f   :  { %v2109_v6 = vld [vmem:[%s2652_s6 + $0x50] sm:$0xff]  }
  0x20   :  { %1798 = vmatpush3.bf16.msra.mxu0 %v2011_v30  ;;  %v2071_v30 = vld [vmem:[%s2650_s5 + $0x98] sm:$0xff]   ;;  %v2112_v9 = vld [vmem:[%s2652_s6 + $0x90] sm:$0xff]  }
  0x21   :  { %1820 = vmatpush3.bf16.msra.mxu1 %v2012_v31  ;;  %1827 = vmatprep.subr.bf16.mxu0 %v2017_v38  ;;  %v2072_v31 = vld [vmem:[%s2650_s5 + $0x118] sm:$0xff]   ;;  %v2079_v38 = vld [vmem:[%s2650_s5 + $0x88] sm:$0xff]  }
  0x22   :  { %1849 = vmatprep.subr.bf16.mxu1 %v2018_v39  ;;  %v2080_v39 = vld [vmem:[%s2650_s5 + $0x108] sm:$0xff]  }
  0x23   :  { %469 = vmatmul.mubr.bf16.vlgmr.msra.gmra.mxu0 %v1621_v34  ;;  %v2075_v34 = vld [vmem:[%s2650_s5 + $0x90] sm:$0xff]  }
  0x24   :  { %509 = vmatmul.mubr.bf16.vlgmr.msra.gmra.mxu1 %v1623_v36  ;;  %1828 = vmatpush3.bf16.msra.mxu0 %v2019_v40  ;;  %v2077_v36 = vld [vmem:[%s2650_s5 + $0xc8] sm:$0xff]   ;;  %v2081_v40 = vld [vmem:[%s2650_s5 + $0xc0] sm:$0xff]  }
  0x25   :  { %1850 = vmatpush3.bf16.msra.mxu1 %v2020_v41  ;;  %1829 = vmatprep.subr.bf16.mxu0 %v2021_v42  ;;  %v2082_v41 = vld [vmem:[%s2650_s5 + $0x140] sm:$0xff]  }
  0x26   :  { %1851 = vmatprep.subr.bf16.mxu1 %v2022_v43  ;;  %548 = vmatprep.mubr.bf16.mxu0 %v1626_v8  ;;  %v2083_v42 = vld [vmem:[%s2650_s5 + $0x80] sm:$0xff]   ;;  %v2111_v8 = vld [vmem:[%s2652_s6 + $0x10] sm:$0xff]  }
  0x27   :  { %997 = vmatprep.mubr.bf16.mxu1 %v1676_v11  ;;  %v2084_v43 = vld [vmem:[%s2650_s5 + $0x100] sm:$0xff]   ;;  %v2114_v11 = vld [vmem:[%s2652_s6 + $0xc8] sm:$0xff]  }
  0x28   :  { %1830 = vmatpush3.bf16.msra.mxu0 %v2023_v44  ;;  %v558_v44 = vld [vmem:[%s2651_s1 + $0x8] sm:$0xff] }
  0x29   :  { %1852 = vmatpush3.bf16.msra.mxu1 %v2024_v45  ;;  %1831 = vmatprep.subr.bf16.mxu0 %v2025_v46  ;;  %v559_v45 = vld [vmem:[%s2651_s1 + $0x10] sm:$0xff]  ;;  %v1677_v46 = vcombine.low %v558_v44, %v558_v44 }
  0x2a   :  { %1853 = vmatprep.subr.bf16.mxu1 %v2026_v47  ;;  %v1678_v47 = vcombine.high %v558_v44, %v558_v44 }
  0x2c   :  { %1832 = vmatpush3.bf16.msra.mxu0 %v2027_v48  ;;  %v1679_v48 = vcombine.low %v559_v45, %v559_v45 }
  0x2d   :  { %1854 = vmatpush3.bf16.msra.mxu1 %v2028_v49  ;;  %1833 = vmatprep.subr.bf16.mxu0 %v2029_v50  ;;  %v1680_v49 = vcombine.high %v559_v45, %v559_v45  ;;  %v2089_v50 = vld [vmem:[%s2652_s6 + $0x78] sm:$0xff]  }
  0x2e   :  { %1855 = vmatprep.subr.bf16.mxu1 %v2030_v51  ;;  %v2090_v51 = vld [vmem:[%s2652_s6 + $0xf8] sm:$0xff]  }
  0x30   :  { %1834 = vmatpush3.bf16.msra.mxu0 %v2031_v52  ;;  %v2091_v52 = vld [vmem:[%s2652_s6 + $0x38] sm:$0xff]  }
  0x31   :  { %1856 = vmatpush3.bf16.msra.mxu1 %v2032_v53  ;;  %1835 = vmatprep.subr.bf16.mxu0 %v2033_v54  ;;  %v2092_v53 = vld [vmem:[%s2652_s6 + $0xb8] sm:$0xff]   ;;  %v2093_v54 = vld [vmem:[%s2652_s6 + $0x70] sm:$0xff]  }
  0x32   :  { %1857 = vmatprep.subr.bf16.mxu1 %v2034_v55  ;;  %v2094_v55 = vld [vmem:[%s2652_s6 + $0xf0] sm:$0xff]  }
  0x34   :  { %1836 = vmatpush3.bf16.msra.mxu0 %v2035_v56  ;;  %v2095_v56 = vld [vmem:[%s2652_s6 + $0x30] sm:$0xff]  }
  0x35   :  { %1858 = vmatpush3.bf16.msra.mxu1 %v2036_v57  ;;  %1837 = vmatprep.subr.bf16.mxu0 %v2037_v58  ;;  %v2096_v57 = vld [vmem:[%s2652_s6 + $0xb0] sm:$0xff]   ;;  %v2097_v58 = vld [vmem:[%s2652_s6 + $0x68] sm:$0xff]  }
  0x36   :  { %1859 = vmatprep.subr.bf16.mxu1 %v2038_v59  ;;  %v2098_v59 = vld [vmem:[%s2652_s6 + $0xe8] sm:$0xff]  }
  0x38   :  { %1838 = vmatpush3.bf16.msra.mxu0 %v2039_v60  ;;  %v2099_v60 = vld [vmem:[%s2652_s6 + $0x28] sm:$0xff]  }
  0x39   :  { %1860 = vmatpush3.bf16.msra.mxu1 %v2040_v61  ;;  %1839 = vmatprep.subr.bf16.mxu0 %v2041_v62  ;;  %v2100_v61 = vld [vmem:[%s2652_s6 + $0xa8] sm:$0xff]   ;;  %v2101_v62 = vld [vmem:[%s2652_s6 + $0x60] sm:$0xff]  }
  0x3a   :  { %1861 = vmatprep.subr.bf16.mxu1 %v2042_v63  ;;  %v2102_v63 = vld [vmem:[%s2652_s6 + $0xe0] sm:$0xff]  }
  0x3c   :  { %1840 = vmatpush3.bf16.msra.mxu0 %v2043_v0  ;;  %v2103_v0 = vld [vmem:[%s2652_s6 + $0x20] sm:$0xff]  }
  0x3d   :  { %1862 = vmatpush3.bf16.msra.mxu1 %v2044_v1  ;;  %1841 = vmatprep.subr.bf16.mxu0 %v2045_v2  ;;  %v2104_v1 = vld [vmem:[%s2652_s6 + $0xa0] sm:$0xff]   ;;  %v2105_v2 = vld [vmem:[%s2652_s6 + $0x58] sm:$0xff]  }
  0x3e   :  { %1863 = vmatprep.subr.bf16.mxu1 %v2046_v3  ;;  %v2106_v3 = vld [vmem:[%s2652_s6 + $0xd8] sm:$0xff]  }
  0x40   :  { %1842 = vmatpush3.bf16.msra.mxu0 %v2047_v4  ;;  %v2107_v4 = vld [vmem:[%s2652_s6 + $0x18] sm:$0xff]  }
  0x41   :  { %1864 = vmatpush3.bf16.msra.mxu1 %v2048_v5  ;;  %1871 = vmatprep.subr.bf16.mxu0 %v2053_v12  ;;  %v2108_v5 = vld [vmem:[%s2652_s6 + $0x98] sm:$0xff]   ;;  %v2115_v12 = vld [vmem:[%s2652_s6 + $0x8] sm:$0xff]  }
  0x42   :  { %1893 = vmatprep.subr.bf16.mxu1 %v2054_v13  ;;  %v2116_v13 = vld [vmem:[%s2652_s6 + $0x88] sm:$0xff]  }
  0x43   :  { %549 = vmatmul.mubr.bf16.vlgmr.msra.gmra.mxu0 %v1625_v7  ;;  %v2110_v7 = vld [vmem:[%s2652_s6 + $0xd0] sm:$0xff]  }
  0x44   :  { %998 = vmatmul.mubr.bf16.vlgmr.msra.gmra.mxu1 %v1675_v10  ;;  %1872 = vmatpush3.bf16.msra.mxu0 %v2055_v14  ;;  %v2113_v10 = vld [vmem:[%s2652_s6 + $0x48] sm:$0xff]   ;;  %v2117_v14 = vld [vmem:[%s2652_s6 + $0x40] sm:$0xff]  }
  0x45   :  { %1894 = vmatpush3.bf16.msra.mxu1 %v2056_v15  ;;  %1873 = vmatprep.subr.bf16.mxu0 %v2057_v16  ;;  %v2118_v15 = vld [vmem:[%s2652_s6 + $0xc0] sm:$0xff]  }
  0x46   :  { %1895 = vmatprep.subr.bf16.mxu1 %v2058_v17  ;;  %1037 = vmatprep.mubr.bf16.mxu0 %v1678_v47  ;;  %v2119_v16 = vld [vmem:[%s2652_s6] sm:$0xff]  }
  0x47   :  { %1077 = vmatprep.mubr.bf16.mxu1 %v1680_v49  ;;  %v2120_v17 = vld [vmem:[%s2652_s6 + $0x80] sm:$0xff]  }
  0x48   :  { %1874 = vmatpush3.bf16.msra.mxu0 %v2059_v18  ;;  %v1086_v18 = vld [vmem:[%s2653_s2] sm:$0xff] }
  0x49   :  { %1896 = vmatpush3.bf16.msra.mxu1 %v2060_v19  ;;  %1875 = vmatprep.subr.bf16.mxu0 %v2061_v20  ;;  %v1087_v19 = vld [vmem:[%s2653_s2 + $0x8] sm:$0xff]  ;;  %v1729_v20 = vcombine.low %v1086_v18, %v1086_v18 }
  0x4a   :  { %1897 = vmatprep.subr.bf16.mxu1 %v2062_v21  ;;  %v1730_v21 = vcombine.high %v1086_v18, %v1086_v18 }
  0x4c   :  { %1876 = vmatpush3.bf16.msra.mxu0 %v2063_v22  ;;  %v1731_v22 = vcombine.low %v1087_v19, %v1087_v19 }
  0x4d   :  { %1898 = vmatpush3.bf16.msra.mxu1 %v2064_v23  ;;  %1877 = vmatprep.subr.bf16.mxu0 %v2065_v24  ;;  %v2125_v23 = vld [vmem:[%s2652_s6 + $0x178] sm:$0xff]   ;;  %v1732_v24 = vcombine.high %v1087_v19, %v1087_v19 }
  0x4e   :  { %1899 = vmatprep.subr.bf16.mxu1 %v2066_v25  ;;  %v2126_v25 = vld [vmem:[%s2652_s6 + $0x138] sm:$0xff]  }
  0x50   :  { %1878 = vmatpush3.bf16.msra.mxu0 %v2067_v26  ;;  %v2127_v26 = vld [vmem:[%s2652_s6 + $0x170] sm:$0xff]  }
  0x51   :  { %1900 = vmatpush3.bf16.msra.mxu1 %v2068_v27  ;;  %1879 = vmatprep.subr.bf16.mxu0 %v2069_v28  ;;  %v2128_v27 = vld [vmem:[%s2652_s6 + $0x130] sm:$0xff]   ;;  %v2129_v28 = vld [vmem:[%s2652_s6 + $0x168] sm:$0xff]  }
  0x52   :  { %1901 = vmatprep.subr.bf16.mxu1 %v2070_v29  ;;  %v2130_v29 = vld [vmem:[%s2652_s6 + $0x128] sm:$0xff]  }
  0x54   :  { %1880 = vmatpush3.bf16.msra.mxu0 %v2071_v30  ;;  %v2131_v30 = vld [vmem:[%s2652_s6 + $0x160] sm:$0xff]  }
  0x55   :  { %1902 = vmatpush3.bf16.msra.mxu1 %v2072_v31  ;;  %1881 = vmatprep.subr.bf16.mxu0 %v2073_v32  ;;  %v2132_v31 = vld [vmem:[%s2652_s6 + $0x120] sm:$0xff]   ;;  %v2133_v32 = vld [vmem:[%s2652_s6 + $0x158] sm:$0xff]  }
  0x56   :  { %1903 = vmatprep.subr.bf16.mxu1 %v2074_v33  ;;  %v1088_v33 = vld [vmem:[%s2653_s2 + $0x10] sm:$0xff] }
  0x58   :  { %1882 = vmatpush3.bf16.msra.mxu0 %v2075_v34  ;;  %v2134_v34 = vld [vmem:[%s2652_s6 + $0x118] sm:$0xff]  }
  0x59   :  { %1904 = vmatpush3.bf16.msra.mxu1 %v2076_v35  ;;  %1883 = vmatprep.subr.bf16.mxu0 %v2077_v36  ;;  %v1734_v35 = vcombine.high %v1088_v33, %v1088_v33  ;;  %v2135_v36 = vld [vmem:[%s2652_s6 + $0x150] sm:$0xff]  }
  0x5a   :  { %1905 = vmatprep.subr.bf16.mxu1 %v2078_v37  ;;  %v2136_v37 = vld [vmem:[%s2652_s6 + $0x110] sm:$0xff]  }
  0x5c   :  { %1884 = vmatpush3.bf16.msra.mxu0 %v2079_v38  ;;  %v2137_v38 = vld [vmem:[%s2652_s6 + $0x148] sm:$0xff]  }
  0x5d   :  { %1906 = vmatpush3.bf16.msra.mxu1 %v2080_v39  ;;  %1885 = vmatprep.subr.bf16.mxu0 %v2081_v40  ;;  %v2138_v39 = vld [vmem:[%s2652_s6 + $0x108] sm:$0xff]   ;;  %v2139_v40 = vld [vmem:[%s2652_s6 + $0x140] sm:$0xff]  }
  0x5e   :  { %1907 = vmatprep.subr.bf16.mxu1 %v2082_v41  ;;  %v2140_v41 = vld [vmem:[%s2652_s6 + $0x100] sm:$0xff]  }
  0x60   :  { %1886 = vmatpush3.bf16.msra.mxu0 %v2083_v42  ;;  %v1733_v42 = vcombine.low %v1088_v33, %v1088_v33 }
  0x61   :  { %1908 = vmatpush3.bf16.msra.mxu1 %v2084_v43  ;;  %1915 = vmatprep.subr.bf16.mxu0 %v2089_v50 }
  0x62   :  { %1937 = vmatprep.subr.bf16.mxu1 %v2090_v51 }
  0x63   :  { %1038 = vmatmul.mubr.bf16.vlgmr.msra.gmra.mxu0 %v1677_v46 }
  0x64   :  { %1078 = vmatmul.mubr.bf16.vlgmr.msra.gmra.mxu1 %v1679_v48  ;;  %1916 = vmatpush3.bf16.msra.mxu0 %v2091_v52 }
  0x65   :  { %1938 = vmatpush3.bf16.msra.mxu1 %v2092_v53  ;;  %1917 = vmatprep.subr.bf16.mxu0 %v2093_v54 }
  0x66   :  { %1939 = vmatprep.subr.bf16.mxu1 %v2094_v55  ;;  %1526 = vmatprep.mubr.bf16.mxu0 %v1730_v21 }
  0x67   :  { %1566 = vmatprep.mubr.bf16.mxu1 %v1732_v24 }
  0x68   :  { %1918 = vmatpush3.bf16.msra.mxu0 %v2095_v56 }
  0x69   :  { %1940 = vmatpush3.bf16.msra.mxu1 %v2096_v57  ;;  %1919 = vmatprep.subr.bf16.mxu0 %v2097_v58 }
  0x6a   :  { %1941 = vmatprep.subr.bf16.mxu1 %v2098_v59 }
  0x6c   :  { %1920 = vmatpush3.bf16.msra.mxu0 %v2099_v60 }
  0x6d   :  { %1942 = vmatpush3.bf16.msra.mxu1 %v2100_v61  ;;  %1921 = vmatprep.subr.bf16.mxu0 %v2101_v62 }
  0x6e   :  { %1943 = vmatprep.subr.bf16.mxu1 %v2102_v63 }
  0x70   :  { %1922 = vmatpush3.bf16.msra.mxu0 %v2103_v0 }
  0x71   :  { %1944 = vmatpush3.bf16.msra.mxu1 %v2104_v1  ;;  %1923 = vmatprep.subr.bf16.mxu0 %v2105_v2 }
  0x72   :  { %1945 = vmatprep.subr.bf16.mxu1 %v2106_v3 }
  0x74   :  { %1924 = vmatpush3.bf16.msra.mxu0 %v2107_v4 }
  0x75   :  { %1946 = vmatpush3.bf16.msra.mxu1 %v2108_v5  ;;  %1925 = vmatprep.subr.bf16.mxu0 %v2109_v6  ;;  %v27_v6 = vld [vmem:[%s2654_s3] sm:$0xff] }
  0x76   :  { %1947 = vmatprep.subr.bf16.mxu1 %v2110_v7 }
  0x78   :  { %1926 = vmatpush3.bf16.msra.mxu0 %v2111_v8 }
  0x79   :  { %1948 = vmatpush3.bf16.msra.mxu1 %v2112_v9  ;;  %1927 = vmatprep.subr.bf16.mxu0 %v2113_v10 }
  0x7a   :  { %1949 = vmatprep.subr.bf16.mxu1 %v2114_v11 }
  0x7c   :  { %1928 = vmatpush3.bf16.msra.mxu0 %v2115_v12 }
  0x7d   :  { %1950 = vmatpush3.bf16.msra.mxu1 %v2116_v13  ;;  %1929 = vmatprep.subr.bf16.mxu0 %v2117_v14 }
  0x7e   :  { %1951 = vmatprep.subr.bf16.mxu1 %v2118_v15 }
  0x80   :  { %1930 = vmatpush3.bf16.msra.mxu0 %v2119_v16 }
  0x81   :  { %1952 = vmatpush3.bf16.msra.mxu1 %v2120_v17  ;;  %1959 = vmatprep.subr.bf16.mxu0 %v2125_v23 }
  0x83   :  { %1527 = vmatmul.mubr.bf16.vlgmr.msra.gmra.mxu0 %v1729_v20 }
  0x84   :  { %1567 = vmatmul.mubr.bf16.vlgmr.msra.gmra.mxu1 %v1731_v22  ;;  %1960 = vmatpush3.bf16.msra.mxu0 %v2126_v25 }
  0x85   :  { %1961 = vmatprep.subr.bf16.mxu0 %v2127_v26  ;;  %1606 = vmatprep.mubr.bf16.mxu0 %v1734_v35 }
  0x88   :  { %1962 = vmatpush3.bf16.msra.mxu0 %v2128_v27 }
  0x89   :  { %1963 = vmatprep.subr.bf16.mxu0 %v2129_v28 }
  0x8c   :  { %1964 = vmatpush3.bf16.msra.mxu0 %v2130_v29 }
  0x8d   :  { %1965 = vmatprep.subr.bf16.mxu0 %v2131_v30 }
  0x90   :  { %1966 = vmatpush3.bf16.msra.mxu0 %v2132_v31 }
  0x91   :  { %1967 = vmatprep.subr.bf16.mxu0 %v2133_v32 }
  0x94   :  { %1968 = vmatpush3.bf16.msra.mxu0 %v2134_v34 }
  0x95   :  { %1969 = vmatprep.subr.bf16.mxu0 %v2135_v36 }
  0x98   :  { %1970 = vmatpush3.bf16.msra.mxu0 %v2136_v37 }
  0x99   :  { %1971 = vmatprep.subr.bf16.mxu0 %v2137_v38 }
  0x9c   :  { %1972 = vmatpush3.bf16.msra.mxu0 %v2138_v39 }
  0x9d   :  { %1973 = vmatprep.subr.bf16.mxu0 %v2139_v40 }
  0xa0   :  { %1974 = vmatpush3.bf16.msra.mxu0 %v2140_v41 }
  0xa3   :  { %1607 = vmatmul.mubr.bf16.vlgmr.msra.gmra.mxu0 %v1733_v42 }
  0xe3   :  { %v1799_v43 = vpop.f32.mrf.mxu0 }
  0xe4   :  { %v1821_v44 = vpop.f32.mrf.mxu1 }
  0xe5   :  { %v1800_v45 = vpop.f32.mrf.mxu0 }
  0xe6   :  { %v1822_v46 = vpop.f32.mrf.mxu1  ;;  %v1801_v47 = vadd.f32 %v1800_v45, %v1799_v43 }
  0xe7   :  { %v1823_v48 = vadd.f32 %v1822_v46, %v1821_v44  ;;  %v1802_v49 = vpop.f32.mrf.mxu0 }
  0xe8   :  { %v1824_v50 = vpop.f32.mrf.mxu1 }
  0xe9   :  { %v511_v51 = vadd.f32 %v1823_v48, %v1801_v47  ;;  %v1803_v52 = vpop.f32.mrf.mxu0 }
  0xea   :  { %v1825_v53 = vpop.f32.mrf.mxu1 }
 0x103   :  { %v1843_v54 = vpop.f32.mrf.mxu0 }
 0x104   :  { %v1865_v55 = vpop.f32.mrf.mxu1 }
 0x105   :  { %v1844_v56 = vpop.f32.mrf.mxu0 }
 0x106   :  { %v1845_v57 = vadd.f32 %v1844_v56, %v1843_v54  ;;  %v1866_v58 = vpop.f32.mrf.mxu1 }
 0x107   :  { %v1846_v59 = vpop.f32.mrf.mxu0  ;;  %v1867_v60 = vadd.f32 %v1866_v58, %v1865_v55 }
 0x108   :  { %v551_v61 = vadd.f32 %v1845_v57, %v511_v51  ;;  %v1868_v62 = vpop.f32.mrf.mxu1 }
 0x109   :  { %v1847_v63 = vpop.f32.mrf.mxu0 }
 0x10a   :  { %v1869_v0 = vpop.f32.mrf.mxu1  ;;  %v556_v12 = vadd.f32 %v551_v61, %v27_v6 }
 0x123   :  { %v1887_v1 = vpop.f32.mrf.mxu0 }
 0x124   :  { %v1909_v2 = vpop.f32.mrf.mxu1 }
 0x125   :  { %v1888_v3 = vpop.f32.mrf.mxu0 }
 0x126   :  { %v1889_v4 = vadd.f32 %v1888_v3, %v1887_v1  ;;  %v1910_v5 = vpop.f32.mrf.mxu1 }
 0x127   :  { %v1890_v7 = vpop.f32.mrf.mxu0  ;;  %v1911_v8 = vadd.f32 %v1910_v5, %v1909_v2 }
 0x128   :  { %v1040_v9 = vadd.f32 %v1889_v4, %v1867_v60  ;;  %v1912_v10 = vpop.f32.mrf.mxu1 }
 0x129   :  { %v1891_v11 = vpop.f32.mrf.mxu0 }
 0x12a   :  { %v1080_v13 = vadd.f32 %v1911_v8, %v1040_v9  ;;  %v1913_v14 = vpop.f32.mrf.mxu1 }
 0x12c   :  { %v1085_v15 = vadd.f32 %v1080_v13, %v556_v12 }
 0x143   :  { %v1931_v16 = vpop.f32.mrf.mxu0 }
 0x144   :  { %v1953_v17 = vpop.f32.mrf.mxu1 }
 0x145   :  { %v1932_v18 = vpop.f32.mrf.mxu0 }
 0x146   :  { %v1954_v19 = vpop.f32.mrf.mxu1  ;;  %v1933_v24 = vadd.f32 %v1932_v18, %v1931_v16 }
 0x147   :  { %v1934_v20 = vpop.f32.mrf.mxu0  ;;  %v1955_v25 = vadd.f32 %v1954_v19, %v1953_v17 }
 0x148   :  { %v1956_v21 = vpop.f32.mrf.mxu1 }
 0x149   :  { %v1935_v22 = vpop.f32.mrf.mxu0  ;;  %v1569_v28 = vadd.f32 %v1955_v25, %v1933_v24 }
 0x14a   :  { %v1957_v23 = vpop.f32.mrf.mxu1 }
 0x163   :  { %v1975_v26 = vpop.f32.mrf.mxu0 }
 0x165   :  { %v1976_v27 = vpop.f32.mrf.mxu0 }
 0x166   :  { %v1977_v29 = vadd.f32 %v1976_v27, %v1975_v26 }
 0x167   :  { %v1978_v30 = vpop.f32.mrf.mxu0 }
 0x168   :  { %v1609_v31 = vadd.f32 %v1977_v29, %v1569_v28 }
 0x169   :  { %v1979_v32 = vpop.f32.mrf.mxu0 }
 0x16a   :  { %v1614_v33 = vadd.f32 %v1609_v31, %v1085_v15 }
 0x16c   :  { %1616 = vst.msk [vmem:[%s2655_s7] sm:$0xff] %vm1615_vm0, %v1614_v33 }

</bundles_post_ra>
